<compile_context>
chip_gen: v6e
topology: v6e:2x2x1
jax: 0.10.0
libtpu: 0.0.40
codegen_flags: <defaults>
</compile_context>

<pallas_src>
import functools
import math

import jax
import jax.numpy as jnp
from jax.experimental import pallas as pl
from jax.experimental.pallas import tpu as pltpu

CFG = dict(vocab=64, d_model=32, heads=4, ffn=64, max_pos=32,
           pad_id=1, dec_start_id=2, vocab_padded=128)

_VMEM = pl.BlockSpec(memory_space=pltpu.MemorySpace.VMEM)

# Fixed order of the weight arrays streamed into the single fused kernel.
PARAM_ORDER = (
    'embed_tokens', 'enc_pos', 'dec_pos', 'final_logits_bias',
    'enc_emb_ln_g', 'enc_emb_ln_b', 'enc_attn_ln_g', 'enc_attn_ln_b',
    'enc_final_ln_g', 'enc_final_ln_b',
    'dec_emb_ln_g', 'dec_emb_ln_b', 'dec_attn_ln_g', 'dec_attn_ln_b',
    'dec_cross_ln_g', 'dec_cross_ln_b', 'dec_final_ln_g', 'dec_final_ln_b',
    'enc_self_q_w', 'enc_self_q_b', 'enc_self_k_w', 'enc_self_k_b',
    'enc_self_v_w', 'enc_self_v_b', 'enc_self_o_w', 'enc_self_o_b',
    'dec_self_q_w', 'dec_self_q_b', 'dec_self_k_w', 'dec_self_k_b',
    'dec_self_v_w', 'dec_self_v_b', 'dec_self_o_w', 'dec_self_o_b',
    'dec_xattn_q_w', 'dec_xattn_q_b', 'dec_xattn_k_w', 'dec_xattn_k_b',
    'dec_xattn_v_w', 'dec_xattn_v_b', 'dec_xattn_o_w', 'dec_xattn_o_b',
    'enc_fc1_w', 'enc_fc1_b', 'enc_fc2_w', 'enc_fc2_b',
    'dec_fc1_w', 'dec_fc1_b', 'dec_fc2_w', 'dec_fc2_b',
)


# ----------------------------------------------------------------------------
# In-kernel math helpers (VPU/EUP-only ops; no unsupported primitives)
# ----------------------------------------------------------------------------

def _erf(x):
    # Abramowitz & Stegun 7.1.26 (|abs err| < 1.5e-7, float32-accurate);
    # avoids relying on a Mosaic lowering for lax.erf.
    a1, a2, a3, a4, a5 = (0.254829592, -0.284496736, 1.421413741,
                          -1.453152027, 1.061405429)
    pp = 0.3275911
    z = jnp.abs(x)
    t = 1.0 / (1.0 + pp * z)
    poly = ((((a5 * t + a4) * t + a3) * t + a2) * t + a1) * t
    y = 1.0 - poly * jnp.exp(-z * z)
    return jnp.where(x >= 0, y, -y)


def _gelu(x):
    # BART uses exact (erf) GELU.
    return 0.5 * x * (1.0 + _erf(x * 0.7071067811865476))


# ----------------------------------------------------------------------------
# The single fused forward kernel
# ----------------------------------------------------------------------------

def _forward_kernel(enc_ids_ref, enc_mask_ref, dec_ids_ref, *refs,
                    B, S_enc, S_dec):
    o_ref = refs[-1]
    w = dict(zip(PARAM_ORDER, refs[:-1]))

    H, NH, VP = CFG['d_model'], CFG['heads'], CFG['vocab_padded']
    DH = H // NH
    scale = 1.0 / math.sqrt(DH)
    NEG = -1e9

    # ---- small fused building blocks (2-D (rows, features) slabs) ----------
    def proj(x, wn, bn):
        return jnp.dot(x, w[wn][...],
                       preferred_element_type=jnp.float32) + w[bn][...]

    def layer_norm(x, name):
        mu = jnp.mean(x, axis=-1, keepdims=True)
        var = jnp.mean(jnp.square(x - mu), axis=-1, keepdims=True)
        return ((x - mu) * jax.lax.rsqrt(var + 1e-5)
                * w[f'{name}_ln_g'][...] + w[f'{name}_ln_b'][...])

    def softmax_last(s):
        m = jnp.max(s, axis=-1, keepdims=True)
        e = jnp.exp(s - m)
        # denominator >= 1; approx reciprocal runs on the otherwise-idle EUP
        return e * pl.reciprocal(jnp.sum(e, axis=-1, keepdims=True), approx=True)

    def embed(ids_ref, S, pos_name):
        # one-hot @ (padded) table: gather-free, MXU-friendly lookup (V<=128)
        rows = B * S
        onehot = (jax.lax.broadcasted_iota(jnp.int32, (rows, VP), 1)
                  == ids_ref[...]).astype(jnp.float32)
        e = jnp.dot(onehot, w['embed_tokens'][...],
                    preferred_element_type=jnp.float32)          # (rows, H)
        # TODO(synk): HF BartLearnedPositionalEmbedding has a +2 offset;
        #             irrelevant for synthetic weights.
        pos = w[pos_name][pl.ds(0, S), :]                        # (S, H)
        # broadcast-add per batch block (replaces the old sublane concat)
        return (e.reshape(B, S, H) + pos[None, :, :]).reshape(rows, H)

    def attend(q2, k2, v2, Sq, Sk, add3, o_wn, o_bn):
        # q2: (B*Sq, H), k2/v2: (B*Sk, H), add3: (B, Sq, Sk) additive mask
        # (pre-broadcast once — reused for every head).
        q3 = q2.reshape(B, Sq, H)
        k3 = k2.reshape(B, Sk, H)
        v3 = v2.reshape(B, Sk, H)
        ctxs = []
        for h in range(NH):                                      # NH=4, static
            sl = slice(h * DH, (h + 1) * DH)
            s = jnp.einsum('bqd,bkd->bqk', q3[:, :, sl], k3[:, :, sl],
                           preferred_element_type=jnp.float32) * scale + add3
            ctxs.append(jnp.einsum('bqk,bkd->bqd', softmax_last(s), v3[:, :, sl],
                                   preferred_element_type=jnp.float32))
        # lane concat of head contexts (cheap) -> ONE output-projection matmul
        ctx = jnp.concatenate(ctxs, axis=-1).reshape(B * Sq, H)
        return (jnp.dot(ctx, w[o_wn][...], preferred_element_type=jnp.float32)
                + w[o_bn][...])

    # ---- additive masks, built & broadcast ONCE ----------------------------
    enc_pad_add = (1.0 - enc_mask_ref[...].astype(jnp.float32)) * NEG    # (B, S_enc)
    enc_self_mask = jnp.broadcast_to(enc_pad_add[:, None, :], (B, S_enc, S_enc))
    cross_mask = jnp.broadcast_to(enc_pad_add[:, None, :], (B, S_dec, S_enc))
    rows_i = jax.lax.broadcasted_iota(jnp.int32, (S_dec, S_dec), 0)
    cols_i = jax.lax.broadcasted_iota(jnp.int32, (S_dec, S_dec), 1)
    causal = jnp.where(cols_i <= rows_i, 0.0, NEG)                       # (S_dec, S_dec)
    dec_self_mask = jnp.broadcast_to(causal[None, :, :], (B, S_dec, S_dec))

    # ------------------------------ encoder ---------------------------------
    x = layer_norm(embed(enc_ids_ref, S_enc, 'enc_pos'), 'enc_emb')
    attn = attend(proj(x, 'enc_self_q_w', 'enc_self_q_b'),
                  proj(x, 'enc_self_k_w', 'enc_self_k_b'),
                  proj(x, 'enc_self_v_w', 'enc_self_v_b'),
                  S_enc, S_enc, enc_self_mask, 'enc_self_o_w', 'enc_self_o_b')
    x = layer_norm(x + attn, 'enc_attn')
    x = layer_norm(x + proj(_gelu(proj(x, 'enc_fc1_w', 'enc_fc1_b')),
                            'enc_fc2_w', 'enc_fc2_b'), 'enc_final')
    ho = x                                                               # (B*S_enc, H)

    # weighted context: softmax over a size-1 axis is identically 1.0, so
    # ct == ho exactly (v_o / temperature provably cannot affect the output).
    ct = ho

    # ------------------------------ decoder ---------------------------------
    y = layer_norm(embed(dec_ids_ref, S_dec, 'dec_pos'), 'dec_emb')
    attn_d = attend(proj(y, 'dec_self_q_w', 'dec_self_q_b'),
                    proj(y, 'dec_self_k_w', 'dec_self_k_b'),
                    proj(y, 'dec_self_v_w', 'dec_self_v_b'),
                    S_dec, S_dec, dec_self_mask, 'dec_self_o_w', 'dec_self_o_b')
    y = layer_norm(y + attn_d, 'dec_attn')
    attn_x = attend(proj(y, 'dec_xattn_q_w', 'dec_xattn_q_b'),
                    proj(ct, 'dec_xattn_k_w', 'dec_xattn_k_b'),
                    proj(ct, 'dec_xattn_v_w', 'dec_xattn_v_b'),
                    S_dec, S_enc, cross_mask, 'dec_xattn_o_w', 'dec_xattn_o_b')
    y = layer_norm(y + attn_x, 'dec_cross')
    y = layer_norm(y + proj(_gelu(proj(y, 'dec_fc1_w', 'dec_fc1_b')),
                            'dec_fc2_w', 'dec_fc2_b'), 'dec_final')

    # LM head: tied (vocab-padded) embedding contracted untransposed on the
    # MXU; VP=128 makes the output store lane-dense (unmasked vst).
    logits = jax.lax.dot_general(
        y, w['embed_tokens'][...], (((1,), (1,)), ((), ())),
        preferred_element_type=jnp.float32) + w['final_logits_bias'][...]
    o_ref[...] = logits                                                  # (B*S_dec, VP)


# ----------------------------------------------------------------------------
# Parameters (synthetic, deterministic)
# ----------------------------------------------------------------------------

def init_params(key):
    H, F, V, P = CFG['d_model'], CFG['ffn'], CFG['vocab'], CFG['max_pos']
    keys = iter(jax.random.split(key, 64))

    def w(shape, scale=0.02):
        return (scale * jax.random.normal(next(keys), shape)).astype(jnp.float32)

    p = {
        'embed_tokens': w((V, H)),
        'enc_pos': w((P, H)),
        'dec_pos': w((P, H)),
        'final_logits_bias': jnp.zeros((1, V), jnp.float32),
        # DualEncoderBART-specific parameters.  softmax over a size-1 dim == 1.0,
        # so these provably never influence the forward output; kept only for
        # module fidelity (not fed to the kernel).
        'v_o': w((H, 1), 0.01),
        'temperature': jnp.full((1, 1), 1.5, jnp.float32),
    }
    for name in ['enc_emb', 'enc_attn', 'enc_final',
                 'dec_emb', 'dec_attn', 'dec_cross', 'dec_final']:
        p[f'{name}_ln_g'] = jnp.ones((1, H), jnp.float32)
        p[f'{name}_ln_b'] = jnp.zeros((1, H), jnp.float32)
    for prefix in ['enc_self', 'dec_self', 'dec_xattn']:
        for nm in ['q', 'k', 'v', 'o']:
            p[f'{prefix}_{nm}_w'] = w((H, H))
            p[f'{prefix}_{nm}_b'] = jnp.zeros((1, H), jnp.float32)
    for lyr in ['enc', 'dec']:
        p[f'{lyr}_fc1_w'] = w((H, F))
        p[f'{lyr}_fc1_b'] = jnp.zeros((1, F), jnp.float32)
        p[f'{lyr}_fc2_w'] = w((F, H))
        p[f'{lyr}_fc2_b'] = jnp.zeros((1, H), jnp.float32)
    return p


# ----------------------------------------------------------------------------
# Forward wrapper (tiny int-id glue + vocab padding live outside the kernel)
# ----------------------------------------------------------------------------

def shift_tokens_right(input_ids, pad_token_id, decoder_start_token_id):
    shifted = jnp.zeros_like(input_ids)
    shifted = shifted.at[:, 1:].set(input_ids[:, :-1])
    shifted = shifted.at[:, 0].set(decoder_start_token_id)
    return jnp.where(shifted == -100, pad_token_id, shifted)


def dual_encoder_bart_forward(params, oas_input_ids, oas_attention_mask,
                              decoder_input):
    B, S_enc = oas_input_ids.shape
    V, VP = CFG['vocab'], CFG['vocab_padded']
    # truncate decoder input / attention mask exactly as in the PyTorch forward
    S_dec = min(S_enc, decoder_input.shape[1])
    decoder_input = decoder_input[:, :S_dec]
    attention_mask = oas_attention_mask[:, :S_enc]           # no-op slice, kept for fidelity
    dec_ids = shift_tokens_right(decoder_input, CFG['pad_id'], CFG['dec_start_id'])

    # Pad tied embedding / logits bias to a lane-dense vocab of 128.
    kp = dict(params)
    kp['embed_tokens'] = jnp.pad(params['embed_tokens'], ((0, VP - V), (0, 0)))
    kp['final_logits_bias'] = jnp.pad(params['final_logits_bias'],
                                      ((0, 0), (0, VP - V)))
    weights = [kp[k] for k in PARAM_ORDER]

    # TODO(synk): for v7x, add grid=(B,) + dimension_semantics=("parallel",)
    #             to shard batches across the two TensorCores.
    logits2d = pl.pallas_call(
        functools.partial(_forward_kernel, B=B, S_enc=S_enc, S_dec=S_dec),
        out_shape=jax.ShapeDtypeStruct((B * S_dec, VP), jnp.float32),
        in_specs=[_VMEM] * (3 + len(weights)),
        out_specs=_VMEM,
        compiler_params=pltpu.CompilerParams(vmem_limit_bytes=32 * 1024 * 1024),
    )(oas_input_ids.astype(jnp.int32).reshape(B * S_enc, 1),
      attention_mask.astype(jnp.int32),
      dec_ids.astype(jnp.int32).reshape(B * S_dec, 1),
      *weights)
    # drop padded vocab lanes + metadata reshape only
    return logits2d[:, :V].reshape(B, S_dec, V)


# ----------------------------------------------------------------------------

if __name__ == "__main__":
    key = jax.random.PRNGKey(0)
    kp_, ki, kd = jax.random.split(key, 3)
    params = init_params(kp_)

    B, S_ENC, S_DEC = 2, 8, 12
    oas_input_ids = jax.random.randint(ki, (B, S_ENC), 0, CFG['vocab'], dtype=jnp.int32)
    oas_attention_mask = jnp.ones((B, S_ENC), dtype=jnp.int32)
    decoder_input = jax.random.randint(kd, (B, S_DEC), 0, CFG['vocab'], dtype=jnp.int32)

    fwd = jax.jit(dual_encoder_bart_forward)
    logits = fwd(params, oas_input_ids, oas_attention_mask, decoder_input)
    logits = jax.block_until_ready(logits)

    expected = (B, min(S_ENC, S_DEC), CFG['vocab'])
    assert logits.shape == expected, (logits.shape, expected)
    assert bool(jnp.all(jnp.isfinite(logits)))
    print("KERNEL_OK")
</pallas_src>

<mosaic_0001>
module attributes {stable_mosaic.version = 11 : i64} {
  func.func @_forward_kernel(%arg0: memref<16x1xi32, #tpu.memory_space<vmem>>, %arg1: memref<2x8xi32, #tpu.memory_space<vmem>>, %arg2: memref<16x1xi32, #tpu.memory_space<vmem>>, %arg3: memref<128x32xf32, #tpu.memory_space<vmem>>, %arg4: memref<32x32xf32, #tpu.memory_space<vmem>>, %arg5: memref<32x32xf32, #tpu.memory_space<vmem>>, %arg6: memref<1x128xf32, #tpu.memory_space<vmem>>, %arg7: memref<1x32xf32, #tpu.memory_space<vmem>>, %arg8: memref<1x32xf32, #tpu.memory_space<vmem>>, %arg9: memref<1x32xf32, #tpu.memory_space<vmem>>, %arg10: memref<1x32xf32, #tpu.memory_space<vmem>>, %arg11: memref<1x32xf32, #tpu.memory_space<vmem>>, %arg12: memref<1x32xf32, #tpu.memory_space<vmem>>, %arg13: memref<1x32xf32, #tpu.memory_space<vmem>>, %arg14: memref<1x32xf32, #tpu.memory_space<vmem>>, %arg15: memref<1x32xf32, #tpu.memory_space<vmem>>, %arg16: memref<1x32xf32, #tpu.memory_space<vmem>>, %arg17: memref<1x32xf32, #tpu.memory_space<vmem>>, %arg18: memref<1x32xf32, #tpu.memory_space<vmem>>, %arg19: memref<1x32xf32, #tpu.memory_space<vmem>>, %arg20: memref<1x32xf32, #tpu.memory_space<vmem>>, %arg21: memref<32x32xf32, #tpu.memory_space<vmem>>, %arg22: memref<1x32xf32, #tpu.memory_space<vmem>>, %arg23: memref<32x32xf32, #tpu.memory_space<vmem>>, %arg24: memref<1x32xf32, #tpu.memory_space<vmem>>, %arg25: memref<32x32xf32, #tpu.memory_space<vmem>>, %arg26: memref<1x32xf32, #tpu.memory_space<vmem>>, %arg27: memref<32x32xf32, #tpu.memory_space<vmem>>, %arg28: memref<1x32xf32, #tpu.memory_space<vmem>>, %arg29: memref<32x32xf32, #tpu.memory_space<vmem>>, %arg30: memref<1x32xf32, #tpu.memory_space<vmem>>, %arg31: memref<32x32xf32, #tpu.memory_space<vmem>>, %arg32: memref<1x32xf32, #tpu.memory_space<vmem>>, %arg33: memref<32x32xf32, #tpu.memory_space<vmem>>, %arg34: memref<1x32xf32, #tpu.memory_space<vmem>>, %arg35: memref<32x32xf32, #tpu.memory_space<vmem>>, %arg36: memref<1x32xf32, #tpu.memory_space<vmem>>, %arg37: memref<32x32xf32, #tpu.memory_space<vmem>>, %arg38: memref<1x32xf32, #tpu.memory_space<vmem>>, %arg39: memref<32x32xf32, #tpu.memory_space<vmem>>, %arg40: memref<1x32xf32, #tpu.memory_space<vmem>>, %arg41: memref<32x32xf32, #tpu.memory_space<vmem>>, %arg42: memref<1x32xf32, #tpu.memory_space<vmem>>, %arg43: memref<32x32xf32, #tpu.memory_space<vmem>>, %arg44: memref<1x32xf32, #tpu.memory_space<vmem>>, %arg45: memref<32x64xf32, #tpu.memory_space<vmem>>, %arg46: memref<1x64xf32, #tpu.memory_space<vmem>>, %arg47: memref<64x32xf32, #tpu.memory_space<vmem>>, %arg48: memref<1x32xf32, #tpu.memory_space<vmem>>, %arg49: memref<32x64xf32, #tpu.memory_space<vmem>>, %arg50: memref<1x64xf32, #tpu.memory_space<vmem>>, %arg51: memref<64x32xf32, #tpu.memory_space<vmem>>, %arg52: memref<1x32xf32, #tpu.memory_space<vmem>>, %arg53: memref<16x128xf32, #tpu.memory_space<vmem>>) attributes {dimension_semantics = [], scalar_prefetch = 0 : i64, scratch_operands = 0 : i64, tpu.core_type = #tpu.core_type<tc>} {
    %c0 = arith.constant 0 : index
    %c0_0 = arith.constant 0 : index
    %0 = vector.load %arg1[%c0, %c0_0] : memref<2x8xi32, #tpu.memory_space<vmem>>, vector<2x8xi32>
    %1 = arith.sitofp %0 : vector<2x8xi32> to vector<2x8xf32>
    %cst = arith.constant 1.000000e+00 : f32
    %2 = vector.broadcast %cst : f32 to vector<2x8xf32>
    %3 = arith.subf %2, %1 : vector<2x8xf32>
    %cst_1 = arith.constant -1.000000e+09 : f32
    %4 = vector.broadcast %cst_1 : f32 to vector<2x8xf32>
    %5 = arith.mulf %3, %4 : vector<2x8xf32>
    %6 = vector.shape_cast %5 : vector<2x8xf32> to vector<2x1x8xf32>
    %7 = vector.shape_cast %6 : vector<2x1x8xf32> to vector<2x1x8xf32>
    %8 = vector.broadcast %7 : vector<2x1x8xf32> to vector<2x8x8xf32>
    %9 = vector.shape_cast %5 : vector<2x8xf32> to vector<2x1x8xf32>
    %10 = vector.shape_cast %9 : vector<2x1x8xf32> to vector<2x1x8xf32>
    %11 = vector.broadcast %10 : vector<2x1x8xf32> to vector<2x8x8xf32>
    %12 = tpu.iota {dimensions = array<i32: 0>} : vector<8x8xi32>
    %13 = tpu.iota {dimensions = array<i32: 1>} : vector<8x8xi32>
    %14 = arith.cmpi sle, %13, %12 : vector<8x8xi32>
    %cst_2 = arith.constant 0.000000e+00 : f32
    %cst_3 = arith.constant -1.000000e+09 : f32
    %15 = vector.broadcast %cst_2 : f32 to vector<8x8xf32>
    %16 = vector.broadcast %cst_3 : f32 to vector<8x8xf32>
    %17 = arith.select %14, %15, %16 : vector<8x8xi1>, vector<8x8xf32>
    %18 = vector.shape_cast %17 : vector<8x8xf32> to vector<1x8x8xf32>
    %19 = vector.shape_cast %18 : vector<1x8x8xf32> to vector<1x8x8xf32>
    %20 = vector.broadcast %19 : vector<1x8x8xf32> to vector<2x8x8xf32>
    %21 = tpu.iota {dimensions = array<i32: 1>} : vector<16x128xi32>
    %c0_4 = arith.constant 0 : index
    %c0_5 = arith.constant 0 : index
    %22 = vector.load %arg0[%c0_4, %c0_5] : memref<16x1xi32, #tpu.memory_space<vmem>>, vector<16x1xi32>
    %23 = vector.broadcast %22 : vector<16x1xi32> to vector<16x128xi32>
    %24 = arith.cmpi eq, %21, %23 : vector<16x128xi32>
    %25 = arith.extui %24 : vector<16x128xi1> to vector<16x128xi32>
    %26 = arith.sitofp %25 : vector<16x128xi32> to vector<16x128xf32>
    %c0_6 = arith.constant 0 : index
    %c0_7 = arith.constant 0 : index
    %27 = vector.load %arg3[%c0_6, %c0_7] : memref<128x32xf32, #tpu.memory_space<vmem>>, vector<128x32xf32>
    %cst_8 = arith.constant dense<0.000000e+00> : vector<16x32xf32>
    %28 = tpu.matmul %26, %27, %cst_8 {dimension_numbers = #tpu.dot_dimension_numbers<[1], [0], [0], [1], [0, 0, 1, 1], [], []>} : vector<16x128xf32>, vector<128x32xf32>, vector<16x32xf32> -> vector<16x32xf32>
    %c0_9 = arith.constant 0 : index
    %c0_10 = arith.constant 0 : index
    %29 = vector.load %arg4[%c0_9, %c0_10] : memref<32x32xf32, #tpu.memory_space<vmem>>, vector<8x32xf32>
    %30 = vector.shape_cast %28 : vector<16x32xf32> to vector<2x8x32xf32>
    %31 = vector.shape_cast %29 : vector<8x32xf32> to vector<1x8x32xf32>
    %32 = vector.broadcast %31 : vector<1x8x32xf32> to vector<2x8x32xf32>
    %33 = arith.addf %30, %32 : vector<2x8x32xf32>
    %34 = vector.shape_cast %33 : vector<2x8x32xf32> to vector<16x32xf32>
    %cst_11 = arith.constant dense<0.000000e+00> : vector<16xf32>
    %35 = vector.multi_reduction <add>, %34, %cst_11 [1] : vector<16x32xf32> to vector<16xf32>
    %36 = vector.shape_cast %35 : vector<16xf32> to vector<16x1xf32>
    %cst_12 = arith.constant 3.200000e+01 : f32
    %37 = vector.broadcast %cst_12 : f32 to vector<16x1xf32>
    %38 = arith.divf %36, %37 : vector<16x1xf32>
    %39 = vector.broadcast %38 : vector<16x1xf32> to vector<16x32xf32>
    %40 = arith.subf %34, %39 : vector<16x32xf32>
    %41 = arith.mulf %40, %40 : vector<16x32xf32>
    %cst_13 = arith.constant dense<0.000000e+00> : vector<16xf32>
    %42 = vector.multi_reduction <add>, %41, %cst_13 [1] : vector<16x32xf32> to vector<16xf32>
    %43 = vector.shape_cast %42 : vector<16xf32> to vector<16x1xf32>
    %cst_14 = arith.constant 3.200000e+01 : f32
    %44 = vector.broadcast %cst_14 : f32 to vector<16x1xf32>
    %45 = arith.divf %43, %44 : vector<16x1xf32>
    %46 = vector.broadcast %38 : vector<16x1xf32> to vector<16x32xf32>
    %47 = arith.subf %34, %46 : vector<16x32xf32>
    %cst_15 = arith.constant 9.99999974E-6 : f32
    %48 = vector.broadcast %cst_15 : f32 to vector<16x1xf32>
    %49 = arith.addf %45, %48 : vector<16x1xf32>
    %50 = math.rsqrt %49 : vector<16x1xf32>
    %51 = vector.broadcast %50 : vector<16x1xf32> to vector<16x32xf32>
    %52 = arith.mulf %47, %51 : vector<16x32xf32>
    %c0_16 = arith.constant 0 : index
    %c0_17 = arith.constant 0 : index
    %53 = vector.load %arg7[%c0_16, %c0_17] : memref<1x32xf32, #tpu.memory_space<vmem>>, vector<1x32xf32>
    %54 = vector.broadcast %53 : vector<1x32xf32> to vector<16x32xf32>
    %55 = arith.mulf %52, %54 : vector<16x32xf32>
    %c0_18 = arith.constant 0 : index
    %c0_19 = arith.constant 0 : index
    %56 = vector.load %arg8[%c0_18, %c0_19] : memref<1x32xf32, #tpu.memory_space<vmem>>, vector<1x32xf32>
    %57 = vector.broadcast %56 : vector<1x32xf32> to vector<16x32xf32>
    %58 = arith.addf %55, %57 : vector<16x32xf32>
    %c0_20 = arith.constant 0 : index
    %c0_21 = arith.constant 0 : index
    %59 = vector.load %arg21[%c0_20, %c0_21] : memref<32x32xf32, #tpu.memory_space<vmem>>, vector<32x32xf32>
    %cst_22 = arith.constant dense<0.000000e+00> : vector<16x32xf32>
    %60 = tpu.matmul %58, %59, %cst_22 {dimension_numbers = #tpu.dot_dimension_numbers<[1], [0], [0], [1], [0, 0, 1, 1], [], []>} : vector<16x32xf32>, vector<32x32xf32>, vector<16x32xf32> -> vector<16x32xf32>
    %c0_23 = arith.constant 0 : index
    %c0_24 = arith.constant 0 : index
    %61 = vector.load %arg22[%c0_23, %c0_24] : memref<1x32xf32, #tpu.memory_space<vmem>>, vector<1x32xf32>
    %62 = vector.broadcast %61 : vector<1x32xf32> to vector<16x32xf32>
    %63 = arith.addf %60, %62 : vector<16x32xf32>
    %c0_25 = arith.constant 0 : index
    %c0_26 = arith.constant 0 : index
    %64 = vector.load %arg23[%c0_25, %c0_26] : memref<32x32xf32, #tpu.memory_space<vmem>>, vector<32x32xf32>
    %cst_27 = arith.constant dense<0.000000e+00> : vector<16x32xf32>
    %65 = tpu.matmul %58, %64, %cst_27 {dimension_numbers = #tpu.dot_dimension_numbers<[1], [0], [0], [1], [0, 0, 1, 1], [], []>} : vector<16x32xf32>, vector<32x32xf32>, vector<16x32xf32> -> vector<16x32xf32>
    %c0_28 = arith.constant 0 : index
    %c0_29 = arith.constant 0 : index
    %66 = vector.load %arg24[%c0_28, %c0_29] : memref<1x32xf32, #tpu.memory_space<vmem>>, vector<1x32xf32>
    %67 = vector.broadcast %66 : vector<1x32xf32> to vector<16x32xf32>
    %68 = arith.addf %65, %67 : vector<16x32xf32>
    %c0_30 = arith.constant 0 : index
    %c0_31 = arith.constant 0 : index
    %69 = vector.load %arg25[%c0_30, %c0_31] : memref<32x32xf32, #tpu.memory_space<vmem>>, vector<32x32xf32>
    %cst_32 = arith.constant dense<0.000000e+00> : vector<16x32xf32>
    %70 = tpu.matmul %58, %69, %cst_32 {dimension_numbers = #tpu.dot_dimension_numbers<[1], [0], [0], [1], [0, 0, 1, 1], [], []>} : vector<16x32xf32>, vector<32x32xf32>, vector<16x32xf32> -> vector<16x32xf32>
    %c0_33 = arith.constant 0 : index
    %c0_34 = arith.constant 0 : index
    %71 = vector.load %arg26[%c0_33, %c0_34] : memref<1x32xf32, #tpu.memory_space<vmem>>, vector<1x32xf32>
    %72 = vector.broadcast %71 : vector<1x32xf32> to vector<16x32xf32>
    %73 = arith.addf %70, %72 : vector<16x32xf32>
    %74 = vector.shape_cast %63 : vector<16x32xf32> to vector<2x8x32xf32>
    %75 = vector.shape_cast %68 : vector<16x32xf32> to vector<2x8x32xf32>
    %76 = vector.shape_cast %73 : vector<16x32xf32> to vector<2x8x32xf32>
    %77 = vector.extract_strided_slice %74 {offsets = [0, 0, 0], sizes = [2, 8, 8], strides = [1, 1, 1]} : vector<2x8x32xf32> to vector<2x8x8xf32>
    %78 = vector.extract_strided_slice %75 {offsets = [0, 0, 0], sizes = [2, 8, 8], strides = [1, 1, 1]} : vector<2x8x32xf32> to vector<2x8x8xf32>
    "tpu.trace_start"() <{level = 10 : i32, message = "bqd,bkd->bqk"}> : () -> ()
    %cst_35 = arith.constant dense<0.000000e+00> : vector<2x8x8xf32>
    %79 = tpu.matmul %77, %78, %cst_35 {dimension_numbers = #tpu.dot_dimension_numbers<[2], [2], [1], [1], [0, 0, 0, 1, 1, 1], [0], [0]>} : vector<2x8x8xf32>, vector<2x8x8xf32>, vector<2x8x8xf32> -> vector<2x8x8xf32>
    "tpu.trace_stop"() : () -> ()
    %cst_36 = arith.constant 0.353553385 : f32
    %80 = vector.broadcast %cst_36 : f32 to vector<2x8x8xf32>
    %81 = arith.mulf %79, %80 : vector<2x8x8xf32>
    %82 = arith.addf %81, %8 : vector<2x8x8xf32>
    %cst_37 = arith.constant dense<0xFF800000> : vector<2x8xf32>
    %83 = vector.multi_reduction <maximumf>, %82, %cst_37 [2] : vector<2x8x8xf32> to vector<2x8xf32>
    %84 = vector.shape_cast %83 : vector<2x8xf32> to vector<2x8x1xf32>
    %85 = vector.broadcast %84 : vector<2x8x1xf32> to vector<2x8x8xf32>
    %86 = arith.subf %82, %85 : vector<2x8x8xf32>
    %87 = math.exp %86 : vector<2x8x8xf32>
    %cst_38 = arith.constant dense<0.000000e+00> : vector<2x8xf32>
    %88 = vector.multi_reduction <add>, %87, %cst_38 [2] : vector<2x8x8xf32> to vector<2x8xf32>
    %89 = vector.shape_cast %88 : vector<2x8xf32> to vector<2x8x1xf32>
    %90 = tpu.reciprocal %89 {approx = true} : vector<2x8x1xf32> -> vector<2x8x1xf32>
    %91 = vector.broadcast %90 : vector<2x8x1xf32> to vector<2x8x8xf32>
    %92 = arith.mulf %87, %91 : vector<2x8x8xf32>
    %93 = vector.extract_strided_slice %76 {offsets = [0, 0, 0], sizes = [2, 8, 8], strides = [1, 1, 1]} : vector<2x8x32xf32> to vector<2x8x8xf32>
    "tpu.trace_start"() <{level = 10 : i32, message = "bqk,bkd->bqd"}> : () -> ()
    %cst_39 = arith.constant dense<0.000000e+00> : vector<2x8x8xf32>
    %94 = tpu.matmul %92, %93, %cst_39 {dimension_numbers = #tpu.dot_dimension_numbers<[2], [1], [1], [2], [0, 0, 0, 1, 1, 2], [0], [0]>} : vector<2x8x8xf32>, vector<2x8x8xf32>, vector<2x8x8xf32> -> vector<2x8x8xf32>
    "tpu.trace_stop"() : () -> ()
    %95 = vector.extract_strided_slice %74 {offsets = [0, 0, 8], sizes = [2, 8, 8], strides = [1, 1, 1]} : vector<2x8x32xf32> to vector<2x8x8xf32>
    %96 = vector.extract_strided_slice %75 {offsets = [0, 0, 8], sizes = [2, 8, 8], strides = [1, 1, 1]} : vector<2x8x32xf32> to vector<2x8x8xf32>
    "tpu.trace_start"() <{level = 10 : i32, message = "bqd,bkd->bqk"}> : () -> ()
    %cst_40 = arith.constant dense<0.000000e+00> : vector<2x8x8xf32>
    %97 = tpu.matmul %95, %96, %cst_40 {dimension_numbers = #tpu.dot_dimension_numbers<[2], [2], [1], [1], [0, 0, 0, 1, 1, 1], [0], [0]>} : vector<2x8x8xf32>, vector<2x8x8xf32>, vector<2x8x8xf32> -> vector<2x8x8xf32>
    "tpu.trace_stop"() : () -> ()
    %cst_41 = arith.constant 0.353553385 : f32
    %98 = vector.broadcast %cst_41 : f32 to vector<2x8x8xf32>
    %99 = arith.mulf %97, %98 : vector<2x8x8xf32>
    %100 = arith.addf %99, %8 : vector<2x8x8xf32>
    %cst_42 = arith.constant dense<0xFF800000> : vector<2x8xf32>
    %101 = vector.multi_reduction <maximumf>, %100, %cst_42 [2] : vector<2x8x8xf32> to vector<2x8xf32>
    %102 = vector.shape_cast %101 : vector<2x8xf32> to vector<2x8x1xf32>
    %103 = vector.broadcast %102 : vector<2x8x1xf32> to vector<2x8x8xf32>
    %104 = arith.subf %100, %103 : vector<2x8x8xf32>
    %105 = math.exp %104 : vector<2x8x8xf32>
    %cst_43 = arith.constant dense<0.000000e+00> : vector<2x8xf32>
    %106 = vector.multi_reduction <add>, %105, %cst_43 [2] : vector<2x8x8xf32> to vector<2x8xf32>
    %107 = vector.shape_cast %106 : vector<2x8xf32> to vector<2x8x1xf32>
    %108 = tpu.reciprocal %107 {approx = true} : vector<2x8x1xf32> -> vector<2x8x1xf32>
    %109 = vector.broadcast %108 : vector<2x8x1xf32> to vector<2x8x8xf32>
    %110 = arith.mulf %105, %109 : vector<2x8x8xf32>
    %111 = vector.extract_strided_slice %76 {offsets = [0, 0, 8], sizes = [2, 8, 8], strides = [1, 1, 1]} : vector<2x8x32xf32> to vector<2x8x8xf32>
    "tpu.trace_start"() <{level = 10 : i32, message = "bqk,bkd->bqd"}> : () -> ()
    %cst_44 = arith.constant dense<0.000000e+00> : vector<2x8x8xf32>
    %112 = tpu.matmul %110, %111, %cst_44 {dimension_numbers = #tpu.dot_dimension_numbers<[2], [1], [1], [2], [0, 0, 0, 1, 1, 2], [0], [0]>} : vector<2x8x8xf32>, vector<2x8x8xf32>, vector<2x8x8xf32> -> vector<2x8x8xf32>
    "tpu.trace_stop"() : () -> ()
    %113 = vector.extract_strided_slice %74 {offsets = [0, 0, 16], sizes = [2, 8, 8], strides = [1, 1, 1]} : vector<2x8x32xf32> to vector<2x8x8xf32>
    %114 = vector.extract_strided_slice %75 {offsets = [0, 0, 16], sizes = [2, 8, 8], strides = [1, 1, 1]} : vector<2x8x32xf32> to vector<2x8x8xf32>
    "tpu.trace_start"() <{level = 10 : i32, message = "bqd,bkd->bqk"}> : () -> ()
    %cst_45 = arith.constant dense<0.000000e+00> : vector<2x8x8xf32>
    %115 = tpu.matmul %113, %114, %cst_45 {dimension_numbers = #tpu.dot_dimension_numbers<[2], [2], [1], [1], [0, 0, 0, 1, 1, 1], [0], [0]>} : vector<2x8x8xf32>, vector<2x8x8xf32>, vector<2x8x8xf32> -> vector<2x8x8xf32>
    "tpu.trace_stop"() : () -> ()
    %cst_46 = arith.constant 0.353553385 : f32
    %116 = vector.broadcast %cst_46 : f32 to vector<2x8x8xf32>
    %117 = arith.mulf %115, %116 : vector<2x8x8xf32>
    %118 = arith.addf %117, %8 : vector<2x8x8xf32>
    %cst_47 = arith.constant dense<0xFF800000> : vector<2x8xf32>
    %119 = vector.multi_reduction <maximumf>, %118, %cst_47 [2] : vector<2x8x8xf32> to vector<2x8xf32>
    %120 = vector.shape_cast %119 : vector<2x8xf32> to vector<2x8x1xf32>
    %121 = vector.broadcast %120 : vector<2x8x1xf32> to vector<2x8x8xf32>
    %122 = arith.subf %118, %121 : vector<2x8x8xf32>
    %123 = math.exp %122 : vector<2x8x8xf32>
    %cst_48 = arith.constant dense<0.000000e+00> : vector<2x8xf32>
    %124 = vector.multi_reduction <add>, %123, %cst_48 [2] : vector<2x8x8xf32> to vector<2x8xf32>
    %125 = vector.shape_cast %124 : vector<2x8xf32> to vector<2x8x1xf32>
    %126 = tpu.reciprocal %125 {approx = true} : vector<2x8x1xf32> -> vector<2x8x1xf32>
    %127 = vector.broadcast %126 : vector<2x8x1xf32> to vector<2x8x8xf32>
    %128 = arith.mulf %123, %127 : vector<2x8x8xf32>
    %129 = vector.extract_strided_slice %76 {offsets = [0, 0, 16], sizes = [2, 8, 8], strides = [1, 1, 1]} : vector<2x8x32xf32> to vector<2x8x8xf32>
    "tpu.trace_start"() <{level = 10 : i32, message = "bqk,bkd->bqd"}> : () -> ()
    %cst_49 = arith.constant dense<0.000000e+00> : vector<2x8x8xf32>
    %130 = tpu.matmul %128, %129, %cst_49 {dimension_numbers = #tpu.dot_dimension_numbers<[2], [1], [1], [2], [0, 0, 0, 1, 1, 2], [0], [0]>} : vector<2x8x8xf32>, vector<2x8x8xf32>, vector<2x8x8xf32> -> vector<2x8x8xf32>
    "tpu.trace_stop"() : () -> ()
    %131 = vector.extract_strided_slice %74 {offsets = [0, 0, 24], sizes = [2, 8, 8], strides = [1, 1, 1]} : vector<2x8x32xf32> to vector<2x8x8xf32>
    %132 = vector.extract_strided_slice %75 {offsets = [0, 0, 24], sizes = [2, 8, 8], strides = [1, 1, 1]} : vector<2x8x32xf32> to vector<2x8x8xf32>
    "tpu.trace_start"() <{level = 10 : i32, message = "bqd,bkd->bqk"}> : () -> ()
    %cst_50 = arith.constant dense<0.000000e+00> : vector<2x8x8xf32>
    %133 = tpu.matmul %131, %132, %cst_50 {dimension_numbers = #tpu.dot_dimension_numbers<[2], [2], [1], [1], [0, 0, 0, 1, 1, 1], [0], [0]>} : vector<2x8x8xf32>, vector<2x8x8xf32>, vector<2x8x8xf32> -> vector<2x8x8xf32>
    "tpu.trace_stop"() : () -> ()
    %cst_51 = arith.constant 0.353553385 : f32
    %134 = vector.broadcast %cst_51 : f32 to vector<2x8x8xf32>
    %135 = arith.mulf %133, %134 : vector<2x8x8xf32>
    %136 = arith.addf %135, %8 : vector<2x8x8xf32>
    %cst_52 = arith.constant dense<0xFF800000> : vector<2x8xf32>
    %137 = vector.multi_reduction <maximumf>, %136, %cst_52 [2] : vector<2x8x8xf32> to vector<2x8xf32>
    %138 = vector.shape_cast %137 : vector<2x8xf32> to vector<2x8x1xf32>
    %139 = vector.broadcast %138 : vector<2x8x1xf32> to vector<2x8x8xf32>
    %140 = arith.subf %136, %139 : vector<2x8x8xf32>
    %141 = math.exp %140 : vector<2x8x8xf32>
    %cst_53 = arith.constant dense<0.000000e+00> : vector<2x8xf32>
    %142 = vector.multi_reduction <add>, %141, %cst_53 [2] : vector<2x8x8xf32> to vector<2x8xf32>
    %143 = vector.shape_cast %142 : vector<2x8xf32> to vector<2x8x1xf32>
    %144 = tpu.reciprocal %143 {approx = true} : vector<2x8x1xf32> -> vector<2x8x1xf32>
    %145 = vector.broadcast %144 : vector<2x8x1xf32> to vector<2x8x8xf32>
    %146 = arith.mulf %141, %145 : vector<2x8x8xf32>
    %147 = vector.extract_strided_slice %76 {offsets = [0, 0, 24], sizes = [2, 8, 8], strides = [1, 1, 1]} : vector<2x8x32xf32> to vector<2x8x8xf32>
    "tpu.trace_start"() <{level = 10 : i32, message = "bqk,bkd->bqd"}> : () -> ()
    %cst_54 = arith.constant dense<0.000000e+00> : vector<2x8x8xf32>
    %148 = tpu.matmul %146, %147, %cst_54 {dimension_numbers = #tpu.dot_dimension_numbers<[2], [1], [1], [2], [0, 0, 0, 1, 1, 2], [0], [0]>} : vector<2x8x8xf32>, vector<2x8x8xf32>, vector<2x8x8xf32> -> vector<2x8x8xf32>
    "tpu.trace_stop"() : () -> ()
    %149 = tpu.concatenate %94, %112, %130, %148 in 2 : vector<2x8x8xf32>, vector<2x8x8xf32>, vector<2x8x8xf32>, vector<2x8x8xf32> -> vector<2x8x32xf32>
    %150 = vector.shape_cast %149 : vector<2x8x32xf32> to vector<16x32xf32>
    %c0_55 = arith.constant 0 : index
    %c0_56 = arith.constant 0 : index
    %151 = vector.load %arg27[%c0_55, %c0_56] : memref<32x32xf32, #tpu.memory_space<vmem>>, vector<32x32xf32>
    %cst_57 = arith.constant dense<0.000000e+00> : vector<16x32xf32>
    %152 = tpu.matmul %150, %151, %cst_57 {dimension_numbers = #tpu.dot_dimension_numbers<[1], [0], [0], [1], [0, 0, 1, 1], [], []>} : vector<16x32xf32>, vector<32x32xf32>, vector<16x32xf32> -> vector<16x32xf32>
    %c0_58 = arith.constant 0 : index
    %c0_59 = arith.constant 0 : index
    %153 = vector.load %arg28[%c0_58, %c0_59] : memref<1x32xf32, #tpu.memory_space<vmem>>, vector<1x32xf32>
    %154 = vector.broadcast %153 : vector<1x32xf32> to vector<16x32xf32>
    %155 = arith.addf %152, %154 : vector<16x32xf32>
    %156 = arith.addf %58, %155 : vector<16x32xf32>
    %cst_60 = arith.constant dense<0.000000e+00> : vector<16xf32>
    %157 = vector.multi_reduction <add>, %156, %cst_60 [1] : vector<16x32xf32> to vector<16xf32>
    %158 = vector.shape_cast %157 : vector<16xf32> to vector<16x1xf32>
    %cst_61 = arith.constant 3.200000e+01 : f32
    %159 = vector.broadcast %cst_61 : f32 to vector<16x1xf32>
    %160 = arith.divf %158, %159 : vector<16x1xf32>
    %161 = vector.broadcast %160 : vector<16x1xf32> to vector<16x32xf32>
    %162 = arith.subf %156, %161 : vector<16x32xf32>
    %163 = arith.mulf %162, %162 : vector<16x32xf32>
    %cst_62 = arith.constant dense<0.000000e+00> : vector<16xf32>
    %164 = vector.multi_reduction <add>, %163, %cst_62 [1] : vector<16x32xf32> to vector<16xf32>
    %165 = vector.shape_cast %164 : vector<16xf32> to vector<16x1xf32>
    %cst_63 = arith.constant 3.200000e+01 : f32
    %166 = vector.broadcast %cst_63 : f32 to vector<16x1xf32>
    %167 = arith.divf %165, %166 : vector<16x1xf32>
    %168 = vector.broadcast %160 : vector<16x1xf32> to vector<16x32xf32>
    %169 = arith.subf %156, %168 : vector<16x32xf32>
    %cst_64 = arith.constant 9.99999974E-6 : f32
    %170 = vector.broadcast %cst_64 : f32 to vector<16x1xf32>
    %171 = arith.addf %167, %170 : vector<16x1xf32>
    %172 = math.rsqrt %171 : vector<16x1xf32>
    %173 = vector.broadcast %172 : vector<16x1xf32> to vector<16x32xf32>
    %174 = arith.mulf %169, %173 : vector<16x32xf32>
    %c0_65 = arith.constant 0 : index
    %c0_66 = arith.constant 0 : index
    %175 = vector.load %arg9[%c0_65, %c0_66] : memref<1x32xf32, #tpu.memory_space<vmem>>, vector<1x32xf32>
    %176 = vector.broadcast %175 : vector<1x32xf32> to vector<16x32xf32>
    %177 = arith.mulf %174, %176 : vector<16x32xf32>
    %c0_67 = arith.constant 0 : index
    %c0_68 = arith.constant 0 : index
    %178 = vector.load %arg10[%c0_67, %c0_68] : memref<1x32xf32, #tpu.memory_space<vmem>>, vector<1x32xf32>
    %179 = vector.broadcast %178 : vector<1x32xf32> to vector<16x32xf32>
    %180 = arith.addf %177, %179 : vector<16x32xf32>
    %c0_69 = arith.constant 0 : index
    %c0_70 = arith.constant 0 : index
    %181 = vector.load %arg45[%c0_69, %c0_70] : memref<32x64xf32, #tpu.memory_space<vmem>>, vector<32x64xf32>
    %cst_71 = arith.constant dense<0.000000e+00> : vector<16x64xf32>
    %182 = tpu.matmul %180, %181, %cst_71 {dimension_numbers = #tpu.dot_dimension_numbers<[1], [0], [0], [1], [0, 0, 1, 1], [], []>} : vector<16x32xf32>, vector<32x64xf32>, vector<16x64xf32> -> vector<16x64xf32>
    %c0_72 = arith.constant 0 : index
    %c0_73 = arith.constant 0 : index
    %183 = vector.load %arg46[%c0_72, %c0_73] : memref<1x64xf32, #tpu.memory_space<vmem>>, vector<1x64xf32>
    %184 = vector.broadcast %183 : vector<1x64xf32> to vector<16x64xf32>
    %185 = arith.addf %182, %184 : vector<16x64xf32>
    %cst_74 = arith.constant 5.000000e-01 : f32
    %186 = vector.broadcast %cst_74 : f32 to vector<16x64xf32>
    %187 = arith.mulf %186, %185 : vector<16x64xf32>
    %cst_75 = arith.constant 0.707106769 : f32
    %188 = vector.broadcast %cst_75 : f32 to vector<16x64xf32>
    %189 = arith.mulf %185, %188 : vector<16x64xf32>
    %190 = math.absf %189 : vector<16x64xf32>
    %cst_76 = arith.constant 0.327591091 : f32
    %191 = vector.broadcast %cst_76 : f32 to vector<16x64xf32>
    %192 = arith.mulf %191, %190 : vector<16x64xf32>
    %cst_77 = arith.constant 1.000000e+00 : f32
    %193 = vector.broadcast %cst_77 : f32 to vector<16x64xf32>
    %194 = arith.addf %193, %192 : vector<16x64xf32>
    %cst_78 = arith.constant 1.000000e+00 : f32
    %195 = vector.broadcast %cst_78 : f32 to vector<16x64xf32>
    %196 = arith.divf %195, %194 : vector<16x64xf32>
    %cst_79 = arith.constant 1.06140542 : f32
    %197 = vector.broadcast %cst_79 : f32 to vector<16x64xf32>
    %198 = arith.mulf %197, %196 : vector<16x64xf32>
    %cst_80 = arith.constant -1.45315206 : f32
    %199 = vector.broadcast %cst_80 : f32 to vector<16x64xf32>
    %200 = arith.addf %198, %199 : vector<16x64xf32>
    %201 = arith.mulf %200, %196 : vector<16x64xf32>
    %cst_81 = arith.constant 1.42141378 : f32
    %202 = vector.broadcast %cst_81 : f32 to vector<16x64xf32>
    %203 = arith.addf %201, %202 : vector<16x64xf32>
    %204 = arith.mulf %203, %196 : vector<16x64xf32>
    %cst_82 = arith.constant -0.284496725 : f32
    %205 = vector.broadcast %cst_82 : f32 to vector<16x64xf32>
    %206 = arith.addf %204, %205 : vector<16x64xf32>
    %207 = arith.mulf %206, %196 : vector<16x64xf32>
    %cst_83 = arith.constant 0.254829586 : f32
    %208 = vector.broadcast %cst_83 : f32 to vector<16x64xf32>
    %209 = arith.addf %207, %208 : vector<16x64xf32>
    %210 = arith.mulf %209, %196 : vector<16x64xf32>
    %cst_84 = arith.constant 0.000000e+00 : f32
    %211 = vector.broadcast %cst_84 : f32 to vector<16x64xf32>
    %212 = arith.subf %211, %190 : vector<16x64xf32>
    %213 = arith.mulf %212, %190 : vector<16x64xf32>
    %214 = math.exp %213 : vector<16x64xf32>
    %215 = arith.mulf %210, %214 : vector<16x64xf32>
    %cst_85 = arith.constant 1.000000e+00 : f32
    %216 = vector.broadcast %cst_85 : f32 to vector<16x64xf32>
    %217 = arith.subf %216, %215 : vector<16x64xf32>
    %cst_86 = arith.constant 0.000000e+00 : f32
    %218 = vector.broadcast %cst_86 : f32 to vector<16x64xf32>
    %219 = arith.cmpf oge, %189, %218 : vector<16x64xf32>
    %cst_87 = arith.constant 0.000000e+00 : f32
    %220 = vector.broadcast %cst_87 : f32 to vector<16x64xf32>
    %221 = arith.subf %220, %217 : vector<16x64xf32>
    %222 = arith.select %219, %217, %221 : vector<16x64xi1>, vector<16x64xf32>
    %cst_88 = arith.constant 1.000000e+00 : f32
    %223 = vector.broadcast %cst_88 : f32 to vector<16x64xf32>
    %224 = arith.addf %223, %222 : vector<16x64xf32>
    %225 = arith.mulf %187, %224 : vector<16x64xf32>
    %c0_89 = arith.constant 0 : index
    %c0_90 = arith.constant 0 : index
    %226 = vector.load %arg47[%c0_89, %c0_90] : memref<64x32xf32, #tpu.memory_space<vmem>>, vector<64x32xf32>
    %cst_91 = arith.constant dense<0.000000e+00> : vector<16x32xf32>
    %227 = tpu.matmul %225, %226, %cst_91 {dimension_numbers = #tpu.dot_dimension_numbers<[1], [0], [0], [1], [0, 0, 1, 1], [], []>} : vector<16x64xf32>, vector<64x32xf32>, vector<16x32xf32> -> vector<16x32xf32>
    %c0_92 = arith.constant 0 : index
    %c0_93 = arith.constant 0 : index
    %228 = vector.load %arg48[%c0_92, %c0_93] : memref<1x32xf32, #tpu.memory_space<vmem>>, vector<1x32xf32>
    %229 = vector.broadcast %228 : vector<1x32xf32> to vector<16x32xf32>
    %230 = arith.addf %227, %229 : vector<16x32xf32>
    %231 = arith.addf %180, %230 : vector<16x32xf32>
    %cst_94 = arith.constant dense<0.000000e+00> : vector<16xf32>
    %232 = vector.multi_reduction <add>, %231, %cst_94 [1] : vector<16x32xf32> to vector<16xf32>
    %233 = vector.shape_cast %232 : vector<16xf32> to vector<16x1xf32>
    %cst_95 = arith.constant 3.200000e+01 : f32
    %234 = vector.broadcast %cst_95 : f32 to vector<16x1xf32>
    %235 = arith.divf %233, %234 : vector<16x1xf32>
    %236 = vector.broadcast %235 : vector<16x1xf32> to vector<16x32xf32>
    %237 = arith.subf %231, %236 : vector<16x32xf32>
    %238 = arith.mulf %237, %237 : vector<16x32xf32>
    %cst_96 = arith.constant dense<0.000000e+00> : vector<16xf32>
    %239 = vector.multi_reduction <add>, %238, %cst_96 [1] : vector<16x32xf32> to vector<16xf32>
    %240 = vector.shape_cast %239 : vector<16xf32> to vector<16x1xf32>
    %cst_97 = arith.constant 3.200000e+01 : f32
    %241 = vector.broadcast %cst_97 : f32 to vector<16x1xf32>
    %242 = arith.divf %240, %241 : vector<16x1xf32>
    %243 = vector.broadcast %235 : vector<16x1xf32> to vector<16x32xf32>
    %244 = arith.subf %231, %243 : vector<16x32xf32>
    %cst_98 = arith.constant 9.99999974E-6 : f32
    %245 = vector.broadcast %cst_98 : f32 to vector<16x1xf32>
    %246 = arith.addf %242, %245 : vector<16x1xf32>
    %247 = math.rsqrt %246 : vector<16x1xf32>
    %248 = vector.broadcast %247 : vector<16x1xf32> to vector<16x32xf32>
    %249 = arith.mulf %244, %248 : vector<16x32xf32>
    %c0_99 = arith.constant 0 : index
    %c0_100 = arith.constant 0 : index
    %250 = vector.load %arg11[%c0_99, %c0_100] : memref<1x32xf32, #tpu.memory_space<vmem>>, vector<1x32xf32>
    %251 = vector.broadcast %250 : vector<1x32xf32> to vector<16x32xf32>
    %252 = arith.mulf %249, %251 : vector<16x32xf32>
    %c0_101 = arith.constant 0 : index
    %c0_102 = arith.constant 0 : index
    %253 = vector.load %arg12[%c0_101, %c0_102] : memref<1x32xf32, #tpu.memory_space<vmem>>, vector<1x32xf32>
    %254 = vector.broadcast %253 : vector<1x32xf32> to vector<16x32xf32>
    %255 = arith.addf %252, %254 : vector<16x32xf32>
    %256 = tpu.iota {dimensions = array<i32: 1>} : vector<16x128xi32>
    %c0_103 = arith.constant 0 : index
    %c0_104 = arith.constant 0 : index
    %257 = vector.load %arg2[%c0_103, %c0_104] : memref<16x1xi32, #tpu.memory_space<vmem>>, vector<16x1xi32>
    %258 = vector.broadcast %257 : vector<16x1xi32> to vector<16x128xi32>
    %259 = arith.cmpi eq, %256, %258 : vector<16x128xi32>
    %260 = arith.extui %259 : vector<16x128xi1> to vector<16x128xi32>
    %261 = arith.sitofp %260 : vector<16x128xi32> to vector<16x128xf32>
    %c0_105 = arith.constant 0 : index
    %c0_106 = arith.constant 0 : index
    %262 = vector.load %arg3[%c0_105, %c0_106] : memref<128x32xf32, #tpu.memory_space<vmem>>, vector<128x32xf32>
    %cst_107 = arith.constant dense<0.000000e+00> : vector<16x32xf32>
    %263 = tpu.matmul %261, %262, %cst_107 {dimension_numbers = #tpu.dot_dimension_numbers<[1], [0], [0], [1], [0, 0, 1, 1], [], []>} : vector<16x128xf32>, vector<128x32xf32>, vector<16x32xf32> -> vector<16x32xf32>
    %c0_108 = arith.constant 0 : index
    %c0_109 = arith.constant 0 : index
    %264 = vector.load %arg5[%c0_108, %c0_109] : memref<32x32xf32, #tpu.memory_space<vmem>>, vector<8x32xf32>
    %265 = vector.shape_cast %263 : vector<16x32xf32> to vector<2x8x32xf32>
    %266 = vector.shape_cast %264 : vector<8x32xf32> to vector<1x8x32xf32>
    %267 = vector.broadcast %266 : vector<1x8x32xf32> to vector<2x8x32xf32>
    %268 = arith.addf %265, %267 : vector<2x8x32xf32>
    %269 = vector.shape_cast %268 : vector<2x8x32xf32> to vector<16x32xf32>
    %cst_110 = arith.constant dense<0.000000e+00> : vector<16xf32>
    %270 = vector.multi_reduction <add>, %269, %cst_110 [1] : vector<16x32xf32> to vector<16xf32>
    %271 = vector.shape_cast %270 : vector<16xf32> to vector<16x1xf32>
    %cst_111 = arith.constant 3.200000e+01 : f32
    %272 = vector.broadcast %cst_111 : f32 to vector<16x1xf32>
    %273 = arith.divf %271, %272 : vector<16x1xf32>
    %274 = vector.broadcast %273 : vector<16x1xf32> to vector<16x32xf32>
    %275 = arith.subf %269, %274 : vector<16x32xf32>
    %276 = arith.mulf %275, %275 : vector<16x32xf32>
    %cst_112 = arith.constant dense<0.000000e+00> : vector<16xf32>
    %277 = vector.multi_reduction <add>, %276, %cst_112 [1] : vector<16x32xf32> to vector<16xf32>
    %278 = vector.shape_cast %277 : vector<16xf32> to vector<16x1xf32>
    %cst_113 = arith.constant 3.200000e+01 : f32
    %279 = vector.broadcast %cst_113 : f32 to vector<16x1xf32>
    %280 = arith.divf %278, %279 : vector<16x1xf32>
    %281 = vector.broadcast %273 : vector<16x1xf32> to vector<16x32xf32>
    %282 = arith.subf %269, %281 : vector<16x32xf32>
    %cst_114 = arith.constant 9.99999974E-6 : f32
    %283 = vector.broadcast %cst_114 : f32 to vector<16x1xf32>
    %284 = arith.addf %280, %283 : vector<16x1xf32>
    %285 = math.rsqrt %284 : vector<16x1xf32>
    %286 = vector.broadcast %285 : vector<16x1xf32> to vector<16x32xf32>
    %287 = arith.mulf %282, %286 : vector<16x32xf32>
    %c0_115 = arith.constant 0 : index
    %c0_116 = arith.constant 0 : index
    %288 = vector.load %arg13[%c0_115, %c0_116] : memref<1x32xf32, #tpu.memory_space<vmem>>, vector<1x32xf32>
    %289 = vector.broadcast %288 : vector<1x32xf32> to vector<16x32xf32>
    %290 = arith.mulf %287, %289 : vector<16x32xf32>
    %c0_117 = arith.constant 0 : index
    %c0_118 = arith.constant 0 : index
    %291 = vector.load %arg14[%c0_117, %c0_118] : memref<1x32xf32, #tpu.memory_space<vmem>>, vector<1x32xf32>
    %292 = vector.broadcast %291 : vector<1x32xf32> to vector<16x32xf32>
    %293 = arith.addf %290, %292 : vector<16x32xf32>
    %c0_119 = arith.constant 0 : index
    %c0_120 = arith.constant 0 : index
    %294 = vector.load %arg29[%c0_119, %c0_120] : memref<32x32xf32, #tpu.memory_space<vmem>>, vector<32x32xf32>
    %cst_121 = arith.constant dense<0.000000e+00> : vector<16x32xf32>
    %295 = tpu.matmul %293, %294, %cst_121 {dimension_numbers = #tpu.dot_dimension_numbers<[1], [0], [0], [1], [0, 0, 1, 1], [], []>} : vector<16x32xf32>, vector<32x32xf32>, vector<16x32xf32> -> vector<16x32xf32>
    %c0_122 = arith.constant 0 : index
    %c0_123 = arith.constant 0 : index
    %296 = vector.load %arg30[%c0_122, %c0_123] : memref<1x32xf32, #tpu.memory_space<vmem>>, vector<1x32xf32>
    %297 = vector.broadcast %296 : vector<1x32xf32> to vector<16x32xf32>
    %298 = arith.addf %295, %297 : vector<16x32xf32>
    %c0_124 = arith.constant 0 : index
    %c0_125 = arith.constant 0 : index
    %299 = vector.load %arg31[%c0_124, %c0_125] : memref<32x32xf32, #tpu.memory_space<vmem>>, vector<32x32xf32>
    %cst_126 = arith.constant dense<0.000000e+00> : vector<16x32xf32>
    %300 = tpu.matmul %293, %299, %cst_126 {dimension_numbers = #tpu.dot_dimension_numbers<[1], [0], [0], [1], [0, 0, 1, 1], [], []>} : vector<16x32xf32>, vector<32x32xf32>, vector<16x32xf32> -> vector<16x32xf32>
    %c0_127 = arith.constant 0 : index
    %c0_128 = arith.constant 0 : index
    %301 = vector.load %arg32[%c0_127, %c0_128] : memref<1x32xf32, #tpu.memory_space<vmem>>, vector<1x32xf32>
    %302 = vector.broadcast %301 : vector<1x32xf32> to vector<16x32xf32>
    %303 = arith.addf %300, %302 : vector<16x32xf32>
    %c0_129 = arith.constant 0 : index
    %c0_130 = arith.constant 0 : index
    %304 = vector.load %arg33[%c0_129, %c0_130] : memref<32x32xf32, #tpu.memory_space<vmem>>, vector<32x32xf32>
    %cst_131 = arith.constant dense<0.000000e+00> : vector<16x32xf32>
    %305 = tpu.matmul %293, %304, %cst_131 {dimension_numbers = #tpu.dot_dimension_numbers<[1], [0], [0], [1], [0, 0, 1, 1], [], []>} : vector<16x32xf32>, vector<32x32xf32>, vector<16x32xf32> -> vector<16x32xf32>
    %c0_132 = arith.constant 0 : index
    %c0_133 = arith.constant 0 : index
    %306 = vector.load %arg34[%c0_132, %c0_133] : memref<1x32xf32, #tpu.memory_space<vmem>>, vector<1x32xf32>
    %307 = vector.broadcast %306 : vector<1x32xf32> to vector<16x32xf32>
    %308 = arith.addf %305, %307 : vector<16x32xf32>
    %309 = vector.shape_cast %298 : vector<16x32xf32> to vector<2x8x32xf32>
    %310 = vector.shape_cast %303 : vector<16x32xf32> to vector<2x8x32xf32>
    %311 = vector.shape_cast %308 : vector<16x32xf32> to vector<2x8x32xf32>
    %312 = vector.extract_strided_slice %309 {offsets = [0, 0, 0], sizes = [2, 8, 8], strides = [1, 1, 1]} : vector<2x8x32xf32> to vector<2x8x8xf32>
    %313 = vector.extract_strided_slice %310 {offsets = [0, 0, 0], sizes = [2, 8, 8], strides = [1, 1, 1]} : vector<2x8x32xf32> to vector<2x8x8xf32>
    "tpu.trace_start"() <{level = 10 : i32, message = "bqd,bkd->bqk"}> : () -> ()
    %cst_134 = arith.constant dense<0.000000e+00> : vector<2x8x8xf32>
    %314 = tpu.matmul %312, %313, %cst_134 {dimension_numbers = #tpu.dot_dimension_numbers<[2], [2], [1], [1], [0, 0, 0, 1, 1, 1], [0], [0]>} : vector<2x8x8xf32>, vector<2x8x8xf32>, vector<2x8x8xf32> -> vector<2x8x8xf32>
    "tpu.trace_stop"() : () -> ()
    %cst_135 = arith.constant 0.353553385 : f32
    %315 = vector.broadcast %cst_135 : f32 to vector<2x8x8xf32>
    %316 = arith.mulf %314, %315 : vector<2x8x8xf32>
    %317 = arith.addf %316, %20 : vector<2x8x8xf32>
    %cst_136 = arith.constant dense<0xFF800000> : vector<2x8xf32>
    %318 = vector.multi_reduction <maximumf>, %317, %cst_136 [2] : vector<2x8x8xf32> to vector<2x8xf32>
    %319 = vector.shape_cast %318 : vector<2x8xf32> to vector<2x8x1xf32>
    %320 = vector.broadcast %319 : vector<2x8x1xf32> to vector<2x8x8xf32>
    %321 = arith.subf %317, %320 : vector<2x8x8xf32>
    %322 = math.exp %321 : vector<2x8x8xf32>
    %cst_137 = arith.constant dense<0.000000e+00> : vector<2x8xf32>
    %323 = vector.multi_reduction <add>, %322, %cst_137 [2] : vector<2x8x8xf32> to vector<2x8xf32>
    %324 = vector.shape_cast %323 : vector<2x8xf32> to vector<2x8x1xf32>
    %325 = tpu.reciprocal %324 {approx = true} : vector<2x8x1xf32> -> vector<2x8x1xf32>
    %326 = vector.broadcast %325 : vector<2x8x1xf32> to vector<2x8x8xf32>
    %327 = arith.mulf %322, %326 : vector<2x8x8xf32>
    %328 = vector.extract_strided_slice %311 {offsets = [0, 0, 0], sizes = [2, 8, 8], strides = [1, 1, 1]} : vector<2x8x32xf32> to vector<2x8x8xf32>
    "tpu.trace_start"() <{level = 10 : i32, message = "bqk,bkd->bqd"}> : () -> ()
    %cst_138 = arith.constant dense<0.000000e+00> : vector<2x8x8xf32>
    %329 = tpu.matmul %327, %328, %cst_138 {dimension_numbers = #tpu.dot_dimension_numbers<[2], [1], [1], [2], [0, 0, 0, 1, 1, 2], [0], [0]>} : vector<2x8x8xf32>, vector<2x8x8xf32>, vector<2x8x8xf32> -> vector<2x8x8xf32>
    "tpu.trace_stop"() : () -> ()
    %330 = vector.extract_strided_slice %309 {offsets = [0, 0, 8], sizes = [2, 8, 8], strides = [1, 1, 1]} : vector<2x8x32xf32> to vector<2x8x8xf32>
    %331 = vector.extract_strided_slice %310 {offsets = [0, 0, 8], sizes = [2, 8, 8], strides = [1, 1, 1]} : vector<2x8x32xf32> to vector<2x8x8xf32>
    "tpu.trace_start"() <{level = 10 : i32, message = "bqd,bkd->bqk"}> : () -> ()
    %cst_139 = arith.constant dense<0.000000e+00> : vector<2x8x8xf32>
    %332 = tpu.matmul %330, %331, %cst_139 {dimension_numbers = #tpu.dot_dimension_numbers<[2], [2], [1], [1], [0, 0, 0, 1, 1, 1], [0], [0]>} : vector<2x8x8xf32>, vector<2x8x8xf32>, vector<2x8x8xf32> -> vector<2x8x8xf32>
    "tpu.trace_stop"() : () -> ()
    %cst_140 = arith.constant 0.353553385 : f32
    %333 = vector.broadcast %cst_140 : f32 to vector<2x8x8xf32>
    %334 = arith.mulf %332, %333 : vector<2x8x8xf32>
    %335 = arith.addf %334, %20 : vector<2x8x8xf32>
    %cst_141 = arith.constant dense<0xFF800000> : vector<2x8xf32>
    %336 = vector.multi_reduction <maximumf>, %335, %cst_141 [2] : vector<2x8x8xf32> to vector<2x8xf32>
    %337 = vector.shape_cast %336 : vector<2x8xf32> to vector<2x8x1xf32>
    %338 = vector.broadcast %337 : vector<2x8x1xf32> to vector<2x8x8xf32>
    %339 = arith.subf %335, %338 : vector<2x8x8xf32>
    %340 = math.exp %339 : vector<2x8x8xf32>
    %cst_142 = arith.constant dense<0.000000e+00> : vector<2x8xf32>
    %341 = vector.multi_reduction <add>, %340, %cst_142 [2] : vector<2x8x8xf32> to vector<2x8xf32>
    %342 = vector.shape_cast %341 : vector<2x8xf32> to vector<2x8x1xf32>
    %343 = tpu.reciprocal %342 {approx = true} : vector<2x8x1xf32> -> vector<2x8x1xf32>
    %344 = vector.broadcast %343 : vector<2x8x1xf32> to vector<2x8x8xf32>
    %345 = arith.mulf %340, %344 : vector<2x8x8xf32>
    %346 = vector.extract_strided_slice %311 {offsets = [0, 0, 8], sizes = [2, 8, 8], strides = [1, 1, 1]} : vector<2x8x32xf32> to vector<2x8x8xf32>
    "tpu.trace_start"() <{level = 10 : i32, message = "bqk,bkd->bqd"}> : () -> ()
    %cst_143 = arith.constant dense<0.000000e+00> : vector<2x8x8xf32>
    %347 = tpu.matmul %345, %346, %cst_143 {dimension_numbers = #tpu.dot_dimension_numbers<[2], [1], [1], [2], [0, 0, 0, 1, 1, 2], [0], [0]>} : vector<2x8x8xf32>, vector<2x8x8xf32>, vector<2x8x8xf32> -> vector<2x8x8xf32>
    "tpu.trace_stop"() : () -> ()
    %348 = vector.extract_strided_slice %309 {offsets = [0, 0, 16], sizes = [2, 8, 8], strides = [1, 1, 1]} : vector<2x8x32xf32> to vector<2x8x8xf32>
    %349 = vector.extract_strided_slice %310 {offsets = [0, 0, 16], sizes = [2, 8, 8], strides = [1, 1, 1]} : vector<2x8x32xf32> to vector<2x8x8xf32>
    "tpu.trace_start"() <{level = 10 : i32, message = "bqd,bkd->bqk"}> : () -> ()
    %cst_144 = arith.constant dense<0.000000e+00> : vector<2x8x8xf32>
    %350 = tpu.matmul %348, %349, %cst_144 {dimension_numbers = #tpu.dot_dimension_numbers<[2], [2], [1], [1], [0, 0, 0, 1, 1, 1], [0], [0]>} : vector<2x8x8xf32>, vector<2x8x8xf32>, vector<2x8x8xf32> -> vector<2x8x8xf32>
    "tpu.trace_stop"() : () -> ()
    %cst_145 = arith.constant 0.353553385 : f32
    %351 = vector.broadcast %cst_145 : f32 to vector<2x8x8xf32>
    %352 = arith.mulf %350, %351 : vector<2x8x8xf32>
    %353 = arith.addf %352, %20 : vector<2x8x8xf32>
    %cst_146 = arith.constant dense<0xFF800000> : vector<2x8xf32>
    %354 = vector.multi_reduction <maximumf>, %353, %cst_146 [2] : vector<2x8x8xf32> to vector<2x8xf32>
    %355 = vector.shape_cast %354 : vector<2x8xf32> to vector<2x8x1xf32>
    %356 = vector.broadcast %355 : vector<2x8x1xf32> to vector<2x8x8xf32>
    %357 = arith.subf %353, %356 : vector<2x8x8xf32>
    %358 = math.exp %357 : vector<2x8x8xf32>
    %cst_147 = arith.constant dense<0.000000e+00> : vector<2x8xf32>
    %359 = vector.multi_reduction <add>, %358, %cst_147 [2] : vector<2x8x8xf32> to vector<2x8xf32>
    %360 = vector.shape_cast %359 : vector<2x8xf32> to vector<2x8x1xf32>
    %361 = tpu.reciprocal %360 {approx = true} : vector<2x8x1xf32> -> vector<2x8x1xf32>
    %362 = vector.broadcast %361 : vector<2x8x1xf32> to vector<2x8x8xf32>
    %363 = arith.mulf %358, %362 : vector<2x8x8xf32>
    %364 = vector.extract_strided_slice %311 {offsets = [0, 0, 16], sizes = [2, 8, 8], strides = [1, 1, 1]} : vector<2x8x32xf32> to vector<2x8x8xf32>
    "tpu.trace_start"() <{level = 10 : i32, message = "bqk,bkd->bqd"}> : () -> ()
    %cst_148 = arith.constant dense<0.000000e+00> : vector<2x8x8xf32>
    %365 = tpu.matmul %363, %364, %cst_148 {dimension_numbers = #tpu.dot_dimension_numbers<[2], [1], [1], [2], [0, 0, 0, 1, 1, 2], [0], [0]>} : vector<2x8x8xf32>, vector<2x8x8xf32>, vector<2x8x8xf32> -> vector<2x8x8xf32>
    "tpu.trace_stop"() : () -> ()
    %366 = vector.extract_strided_slice %309 {offsets = [0, 0, 24], sizes = [2, 8, 8], strides = [1, 1, 1]} : vector<2x8x32xf32> to vector<2x8x8xf32>
    %367 = vector.extract_strided_slice %310 {offsets = [0, 0, 24], sizes = [2, 8, 8], strides = [1, 1, 1]} : vector<2x8x32xf32> to vector<2x8x8xf32>
    "tpu.trace_start"() <{level = 10 : i32, message = "bqd,bkd->bqk"}> : () -> ()
    %cst_149 = arith.constant dense<0.000000e+00> : vector<2x8x8xf32>
    %368 = tpu.matmul %366, %367, %cst_149 {dimension_numbers = #tpu.dot_dimension_numbers<[2], [2], [1], [1], [0, 0, 0, 1, 1, 1], [0], [0]>} : vector<2x8x8xf32>, vector<2x8x8xf32>, vector<2x8x8xf32> -> vector<2x8x8xf32>
    "tpu.trace_stop"() : () -> ()
    %cst_150 = arith.constant 0.353553385 : f32
    %369 = vector.broadcast %cst_150 : f32 to vector<2x8x8xf32>
    %370 = arith.mulf %368, %369 : vector<2x8x8xf32>
    %371 = arith.addf %370, %20 : vector<2x8x8xf32>
    %cst_151 = arith.constant dense<0xFF800000> : vector<2x8xf32>
    %372 = vector.multi_reduction <maximumf>, %371, %cst_151 [2] : vector<2x8x8xf32> to vector<2x8xf32>
    %373 = vector.shape_cast %372 : vector<2x8xf32> to vector<2x8x1xf32>
    %374 = vector.broadcast %373 : vector<2x8x1xf32> to vector<2x8x8xf32>
    %375 = arith.subf %371, %374 : vector<2x8x8xf32>
    %376 = math.exp %375 : vector<2x8x8xf32>
    %cst_152 = arith.constant dense<0.000000e+00> : vector<2x8xf32>
    %377 = vector.multi_reduction <add>, %376, %cst_152 [2] : vector<2x8x8xf32> to vector<2x8xf32>
    %378 = vector.shape_cast %377 : vector<2x8xf32> to vector<2x8x1xf32>
    %379 = tpu.reciprocal %378 {approx = true} : vector<2x8x1xf32> -> vector<2x8x1xf32>
    %380 = vector.broadcast %379 : vector<2x8x1xf32> to vector<2x8x8xf32>
    %381 = arith.mulf %376, %380 : vector<2x8x8xf32>
    %382 = vector.extract_strided_slice %311 {offsets = [0, 0, 24], sizes = [2, 8, 8], strides = [1, 1, 1]} : vector<2x8x32xf32> to vector<2x8x8xf32>
    "tpu.trace_start"() <{level = 10 : i32, message = "bqk,bkd->bqd"}> : () -> ()
    %cst_153 = arith.constant dense<0.000000e+00> : vector<2x8x8xf32>
    %383 = tpu.matmul %381, %382, %cst_153 {dimension_numbers = #tpu.dot_dimension_numbers<[2], [1], [1], [2], [0, 0, 0, 1, 1, 2], [0], [0]>} : vector<2x8x8xf32>, vector<2x8x8xf32>, vector<2x8x8xf32> -> vector<2x8x8xf32>
    "tpu.trace_stop"() : () -> ()
    %384 = tpu.concatenate %329, %347, %365, %383 in 2 : vector<2x8x8xf32>, vector<2x8x8xf32>, vector<2x8x8xf32>, vector<2x8x8xf32> -> vector<2x8x32xf32>
    %385 = vector.shape_cast %384 : vector<2x8x32xf32> to vector<16x32xf32>
    %c0_154 = arith.constant 0 : index
    %c0_155 = arith.constant 0 : index
    %386 = vector.load %arg35[%c0_154, %c0_155] : memref<32x32xf32, #tpu.memory_space<vmem>>, vector<32x32xf32>
    %cst_156 = arith.constant dense<0.000000e+00> : vector<16x32xf32>
    %387 = tpu.matmul %385, %386, %cst_156 {dimension_numbers = #tpu.dot_dimension_numbers<[1], [0], [0], [1], [0, 0, 1, 1], [], []>} : vector<16x32xf32>, vector<32x32xf32>, vector<16x32xf32> -> vector<16x32xf32>
    %c0_157 = arith.constant 0 : index
    %c0_158 = arith.constant 0 : index
    %388 = vector.load %arg36[%c0_157, %c0_158] : memref<1x32xf32, #tpu.memory_space<vmem>>, vector<1x32xf32>
    %389 = vector.broadcast %388 : vector<1x32xf32> to vector<16x32xf32>
    %390 = arith.addf %387, %389 : vector<16x32xf32>
    %391 = arith.addf %293, %390 : vector<16x32xf32>
    %cst_159 = arith.constant dense<0.000000e+00> : vector<16xf32>
    %392 = vector.multi_reduction <add>, %391, %cst_159 [1] : vector<16x32xf32> to vector<16xf32>
    %393 = vector.shape_cast %392 : vector<16xf32> to vector<16x1xf32>
    %cst_160 = arith.constant 3.200000e+01 : f32
    %394 = vector.broadcast %cst_160 : f32 to vector<16x1xf32>
    %395 = arith.divf %393, %394 : vector<16x1xf32>
    %396 = vector.broadcast %395 : vector<16x1xf32> to vector<16x32xf32>
    %397 = arith.subf %391, %396 : vector<16x32xf32>
    %398 = arith.mulf %397, %397 : vector<16x32xf32>
    %cst_161 = arith.constant dense<0.000000e+00> : vector<16xf32>
    %399 = vector.multi_reduction <add>, %398, %cst_161 [1] : vector<16x32xf32> to vector<16xf32>
    %400 = vector.shape_cast %399 : vector<16xf32> to vector<16x1xf32>
    %cst_162 = arith.constant 3.200000e+01 : f32
    %401 = vector.broadcast %cst_162 : f32 to vector<16x1xf32>
    %402 = arith.divf %400, %401 : vector<16x1xf32>
    %403 = vector.broadcast %395 : vector<16x1xf32> to vector<16x32xf32>
    %404 = arith.subf %391, %403 : vector<16x32xf32>
    %cst_163 = arith.constant 9.99999974E-6 : f32
    %405 = vector.broadcast %cst_163 : f32 to vector<16x1xf32>
    %406 = arith.addf %402, %405 : vector<16x1xf32>
    %407 = math.rsqrt %406 : vector<16x1xf32>
    %408 = vector.broadcast %407 : vector<16x1xf32> to vector<16x32xf32>
    %409 = arith.mulf %404, %408 : vector<16x32xf32>
    %c0_164 = arith.constant 0 : index
    %c0_165 = arith.constant 0 : index
    %410 = vector.load %arg15[%c0_164, %c0_165] : memref<1x32xf32, #tpu.memory_space<vmem>>, vector<1x32xf32>
    %411 = vector.broadcast %410 : vector<1x32xf32> to vector<16x32xf32>
    %412 = arith.mulf %409, %411 : vector<16x32xf32>
    %c0_166 = arith.constant 0 : index
    %c0_167 = arith.constant 0 : index
    %413 = vector.load %arg16[%c0_166, %c0_167] : memref<1x32xf32, #tpu.memory_space<vmem>>, vector<1x32xf32>
    %414 = vector.broadcast %413 : vector<1x32xf32> to vector<16x32xf32>
    %415 = arith.addf %412, %414 : vector<16x32xf32>
    %c0_168 = arith.constant 0 : index
    %c0_169 = arith.constant 0 : index
    %416 = vector.load %arg37[%c0_168, %c0_169] : memref<32x32xf32, #tpu.memory_space<vmem>>, vector<32x32xf32>
    %cst_170 = arith.constant dense<0.000000e+00> : vector<16x32xf32>
    %417 = tpu.matmul %415, %416, %cst_170 {dimension_numbers = #tpu.dot_dimension_numbers<[1], [0], [0], [1], [0, 0, 1, 1], [], []>} : vector<16x32xf32>, vector<32x32xf32>, vector<16x32xf32> -> vector<16x32xf32>
    %c0_171 = arith.constant 0 : index
    %c0_172 = arith.constant 0 : index
    %418 = vector.load %arg38[%c0_171, %c0_172] : memref<1x32xf32, #tpu.memory_space<vmem>>, vector<1x32xf32>
    %419 = vector.broadcast %418 : vector<1x32xf32> to vector<16x32xf32>
    %420 = arith.addf %417, %419 : vector<16x32xf32>
    %c0_173 = arith.constant 0 : index
    %c0_174 = arith.constant 0 : index
    %421 = vector.load %arg39[%c0_173, %c0_174] : memref<32x32xf32, #tpu.memory_space<vmem>>, vector<32x32xf32>
    %cst_175 = arith.constant dense<0.000000e+00> : vector<16x32xf32>
    %422 = tpu.matmul %255, %421, %cst_175 {dimension_numbers = #tpu.dot_dimension_numbers<[1], [0], [0], [1], [0, 0, 1, 1], [], []>} : vector<16x32xf32>, vector<32x32xf32>, vector<16x32xf32> -> vector<16x32xf32>
    %c0_176 = arith.constant 0 : index
    %c0_177 = arith.constant 0 : index
    %423 = vector.load %arg40[%c0_176, %c0_177] : memref<1x32xf32, #tpu.memory_space<vmem>>, vector<1x32xf32>
    %424 = vector.broadcast %423 : vector<1x32xf32> to vector<16x32xf32>
    %425 = arith.addf %422, %424 : vector<16x32xf32>
    %c0_178 = arith.constant 0 : index
    %c0_179 = arith.constant 0 : index
    %426 = vector.load %arg41[%c0_178, %c0_179] : memref<32x32xf32, #tpu.memory_space<vmem>>, vector<32x32xf32>
    %cst_180 = arith.constant dense<0.000000e+00> : vector<16x32xf32>
    %427 = tpu.matmul %255, %426, %cst_180 {dimension_numbers = #tpu.dot_dimension_numbers<[1], [0], [0], [1], [0, 0, 1, 1], [], []>} : vector<16x32xf32>, vector<32x32xf32>, vector<16x32xf32> -> vector<16x32xf32>
    %c0_181 = arith.constant 0 : index
    %c0_182 = arith.constant 0 : index
    %428 = vector.load %arg42[%c0_181, %c0_182] : memref<1x32xf32, #tpu.memory_space<vmem>>, vector<1x32xf32>
    %429 = vector.broadcast %428 : vector<1x32xf32> to vector<16x32xf32>
    %430 = arith.addf %427, %429 : vector<16x32xf32>
    %431 = vector.shape_cast %420 : vector<16x32xf32> to vector<2x8x32xf32>
    %432 = vector.shape_cast %425 : vector<16x32xf32> to vector<2x8x32xf32>
    %433 = vector.shape_cast %430 : vector<16x32xf32> to vector<2x8x32xf32>
    %434 = vector.extract_strided_slice %431 {offsets = [0, 0, 0], sizes = [2, 8, 8], strides = [1, 1, 1]} : vector<2x8x32xf32> to vector<2x8x8xf32>
    %435 = vector.extract_strided_slice %432 {offsets = [0, 0, 0], sizes = [2, 8, 8], strides = [1, 1, 1]} : vector<2x8x32xf32> to vector<2x8x8xf32>
    "tpu.trace_start"() <{level = 10 : i32, message = "bqd,bkd->bqk"}> : () -> ()
    %cst_183 = arith.constant dense<0.000000e+00> : vector<2x8x8xf32>
    %436 = tpu.matmul %434, %435, %cst_183 {dimension_numbers = #tpu.dot_dimension_numbers<[2], [2], [1], [1], [0, 0, 0, 1, 1, 1], [0], [0]>} : vector<2x8x8xf32>, vector<2x8x8xf32>, vector<2x8x8xf32> -> vector<2x8x8xf32>
    "tpu.trace_stop"() : () -> ()
    %cst_184 = arith.constant 0.353553385 : f32
    %437 = vector.broadcast %cst_184 : f32 to vector<2x8x8xf32>
    %438 = arith.mulf %436, %437 : vector<2x8x8xf32>
    %439 = arith.addf %438, %11 : vector<2x8x8xf32>
    %cst_185 = arith.constant dense<0xFF800000> : vector<2x8xf32>
    %440 = vector.multi_reduction <maximumf>, %439, %cst_185 [2] : vector<2x8x8xf32> to vector<2x8xf32>
    %441 = vector.shape_cast %440 : vector<2x8xf32> to vector<2x8x1xf32>
    %442 = vector.broadcast %441 : vector<2x8x1xf32> to vector<2x8x8xf32>
    %443 = arith.subf %439, %442 : vector<2x8x8xf32>
    %444 = math.exp %443 : vector<2x8x8xf32>
    %cst_186 = arith.constant dense<0.000000e+00> : vector<2x8xf32>
    %445 = vector.multi_reduction <add>, %444, %cst_186 [2] : vector<2x8x8xf32> to vector<2x8xf32>
    %446 = vector.shape_cast %445 : vector<2x8xf32> to vector<2x8x1xf32>
    %447 = tpu.reciprocal %446 {approx = true} : vector<2x8x1xf32> -> vector<2x8x1xf32>
    %448 = vector.broadcast %447 : vector<2x8x1xf32> to vector<2x8x8xf32>
    %449 = arith.mulf %444, %448 : vector<2x8x8xf32>
    %450 = vector.extract_strided_slice %433 {offsets = [0, 0, 0], sizes = [2, 8, 8], strides = [1, 1, 1]} : vector<2x8x32xf32> to vector<2x8x8xf32>
    "tpu.trace_start"() <{level = 10 : i32, message = "bqk,bkd->bqd"}> : () -> ()
    %cst_187 = arith.constant dense<0.000000e+00> : vector<2x8x8xf32>
    %451 = tpu.matmul %449, %450, %cst_187 {dimension_numbers = #tpu.dot_dimension_numbers<[2], [1], [1], [2], [0, 0, 0, 1, 1, 2], [0], [0]>} : vector<2x8x8xf32>, vector<2x8x8xf32>, vector<2x8x8xf32> -> vector<2x8x8xf32>
    "tpu.trace_stop"() : () -> ()
    %452 = vector.extract_strided_slice %431 {offsets = [0, 0, 8], sizes = [2, 8, 8], strides = [1, 1, 1]} : vector<2x8x32xf32> to vector<2x8x8xf32>
    %453 = vector.extract_strided_slice %432 {offsets = [0, 0, 8], sizes = [2, 8, 8], strides = [1, 1, 1]} : vector<2x8x32xf32> to vector<2x8x8xf32>
    "tpu.trace_start"() <{level = 10 : i32, message = "bqd,bkd->bqk"}> : () -> ()
    %cst_188 = arith.constant dense<0.000000e+00> : vector<2x8x8xf32>
    %454 = tpu.matmul %452, %453, %cst_188 {dimension_numbers = #tpu.dot_dimension_numbers<[2], [2], [1], [1], [0, 0, 0, 1, 1, 1], [0], [0]>} : vector<2x8x8xf32>, vector<2x8x8xf32>, vector<2x8x8xf32> -> vector<2x8x8xf32>
    "tpu.trace_stop"() : () -> ()
    %cst_189 = arith.constant 0.353553385 : f32
    %455 = vector.broadcast %cst_189 : f32 to vector<2x8x8xf32>
    %456 = arith.mulf %454, %455 : vector<2x8x8xf32>
    %457 = arith.addf %456, %11 : vector<2x8x8xf32>
    %cst_190 = arith.constant dense<0xFF800000> : vector<2x8xf32>
    %458 = vector.multi_reduction <maximumf>, %457, %cst_190 [2] : vector<2x8x8xf32> to vector<2x8xf32>
    %459 = vector.shape_cast %458 : vector<2x8xf32> to vector<2x8x1xf32>
    %460 = vector.broadcast %459 : vector<2x8x1xf32> to vector<2x8x8xf32>
    %461 = arith.subf %457, %460 : vector<2x8x8xf32>
    %462 = math.exp %461 : vector<2x8x8xf32>
    %cst_191 = arith.constant dense<0.000000e+00> : vector<2x8xf32>
    %463 = vector.multi_reduction <add>, %462, %cst_191 [2] : vector<2x8x8xf32> to vector<2x8xf32>
    %464 = vector.shape_cast %463 : vector<2x8xf32> to vector<2x8x1xf32>
    %465 = tpu.reciprocal %464 {approx = true} : vector<2x8x1xf32> -> vector<2x8x1xf32>
    %466 = vector.broadcast %465 : vector<2x8x1xf32> to vector<2x8x8xf32>
    %467 = arith.mulf %462, %466 : vector<2x8x8xf32>
    %468 = vector.extract_strided_slice %433 {offsets = [0, 0, 8], sizes = [2, 8, 8], strides = [1, 1, 1]} : vector<2x8x32xf32> to vector<2x8x8xf32>
    "tpu.trace_start"() <{level = 10 : i32, message = "bqk,bkd->bqd"}> : () -> ()
    %cst_192 = arith.constant dense<0.000000e+00> : vector<2x8x8xf32>
    %469 = tpu.matmul %467, %468, %cst_192 {dimension_numbers = #tpu.dot_dimension_numbers<[2], [1], [1], [2], [0, 0, 0, 1, 1, 2], [0], [0]>} : vector<2x8x8xf32>, vector<2x8x8xf32>, vector<2x8x8xf32> -> vector<2x8x8xf32>
    "tpu.trace_stop"() : () -> ()
    %470 = vector.extract_strided_slice %431 {offsets = [0, 0, 16], sizes = [2, 8, 8], strides = [1, 1, 1]} : vector<2x8x32xf32> to vector<2x8x8xf32>
    %471 = vector.extract_strided_slice %432 {offsets = [0, 0, 16], sizes = [2, 8, 8], strides = [1, 1, 1]} : vector<2x8x32xf32> to vector<2x8x8xf32>
    "tpu.trace_start"() <{level = 10 : i32, message = "bqd,bkd->bqk"}> : () -> ()
    %cst_193 = arith.constant dense<0.000000e+00> : vector<2x8x8xf32>
    %472 = tpu.matmul %470, %471, %cst_193 {dimension_numbers = #tpu.dot_dimension_numbers<[2], [2], [1], [1], [0, 0, 0, 1, 1, 1], [0], [0]>} : vector<2x8x8xf32>, vector<2x8x8xf32>, vector<2x8x8xf32> -> vector<2x8x8xf32>
    "tpu.trace_stop"() : () -> ()
    %cst_194 = arith.constant 0.353553385 : f32
    %473 = vector.broadcast %cst_194 : f32 to vector<2x8x8xf32>
    %474 = arith.mulf %472, %473 : vector<2x8x8xf32>
    %475 = arith.addf %474, %11 : vector<2x8x8xf32>
    %cst_195 = arith.constant dense<0xFF800000> : vector<2x8xf32>
    %476 = vector.multi_reduction <maximumf>, %475, %cst_195 [2] : vector<2x8x8xf32> to vector<2x8xf32>
    %477 = vector.shape_cast %476 : vector<2x8xf32> to vector<2x8x1xf32>
    %478 = vector.broadcast %477 : vector<2x8x1xf32> to vector<2x8x8xf32>
    %479 = arith.subf %475, %478 : vector<2x8x8xf32>
    %480 = math.exp %479 : vector<2x8x8xf32>
    %cst_196 = arith.constant dense<0.000000e+00> : vector<2x8xf32>
    %481 = vector.multi_reduction <add>, %480, %cst_196 [2] : vector<2x8x8xf32> to vector<2x8xf32>
    %482 = vector.shape_cast %481 : vector<2x8xf32> to vector<2x8x1xf32>
    %483 = tpu.reciprocal %482 {approx = true} : vector<2x8x1xf32> -> vector<2x8x1xf32>
    %484 = vector.broadcast %483 : vector<2x8x1xf32> to vector<2x8x8xf32>
    %485 = arith.mulf %480, %484 : vector<2x8x8xf32>
    %486 = vector.extract_strided_slice %433 {offsets = [0, 0, 16], sizes = [2, 8, 8], strides = [1, 1, 1]} : vector<2x8x32xf32> to vector<2x8x8xf32>
    "tpu.trace_start"() <{level = 10 : i32, message = "bqk,bkd->bqd"}> : () -> ()
    %cst_197 = arith.constant dense<0.000000e+00> : vector<2x8x8xf32>
    %487 = tpu.matmul %485, %486, %cst_197 {dimension_numbers = #tpu.dot_dimension_numbers<[2], [1], [1], [2], [0, 0, 0, 1, 1, 2], [0], [0]>} : vector<2x8x8xf32>, vector<2x8x8xf32>, vector<2x8x8xf32> -> vector<2x8x8xf32>
    "tpu.trace_stop"() : () -> ()
    %488 = vector.extract_strided_slice %431 {offsets = [0, 0, 24], sizes = [2, 8, 8], strides = [1, 1, 1]} : vector<2x8x32xf32> to vector<2x8x8xf32>
    %489 = vector.extract_strided_slice %432 {offsets = [0, 0, 24], sizes = [2, 8, 8], strides = [1, 1, 1]} : vector<2x8x32xf32> to vector<2x8x8xf32>
    "tpu.trace_start"() <{level = 10 : i32, message = "bqd,bkd->bqk"}> : () -> ()
    %cst_198 = arith.constant dense<0.000000e+00> : vector<2x8x8xf32>
    %490 = tpu.matmul %488, %489, %cst_198 {dimension_numbers = #tpu.dot_dimension_numbers<[2], [2], [1], [1], [0, 0, 0, 1, 1, 1], [0], [0]>} : vector<2x8x8xf32>, vector<2x8x8xf32>, vector<2x8x8xf32> -> vector<2x8x8xf32>
    "tpu.trace_stop"() : () -> ()
    %cst_199 = arith.constant 0.353553385 : f32
    %491 = vector.broadcast %cst_199 : f32 to vector<2x8x8xf32>
    %492 = arith.mulf %490, %491 : vector<2x8x8xf32>
    %493 = arith.addf %492, %11 : vector<2x8x8xf32>
    %cst_200 = arith.constant dense<0xFF800000> : vector<2x8xf32>
    %494 = vector.multi_reduction <maximumf>, %493, %cst_200 [2] : vector<2x8x8xf32> to vector<2x8xf32>
    %495 = vector.shape_cast %494 : vector<2x8xf32> to vector<2x8x1xf32>
    %496 = vector.broadcast %495 : vector<2x8x1xf32> to vector<2x8x8xf32>
    %497 = arith.subf %493, %496 : vector<2x8x8xf32>
    %498 = math.exp %497 : vector<2x8x8xf32>
    %cst_201 = arith.constant dense<0.000000e+00> : vector<2x8xf32>
    %499 = vector.multi_reduction <add>, %498, %cst_201 [2] : vector<2x8x8xf32> to vector<2x8xf32>
    %500 = vector.shape_cast %499 : vector<2x8xf32> to vector<2x8x1xf32>
    %501 = tpu.reciprocal %500 {approx = true} : vector<2x8x1xf32> -> vector<2x8x1xf32>
    %502 = vector.broadcast %501 : vector<2x8x1xf32> to vector<2x8x8xf32>
    %503 = arith.mulf %498, %502 : vector<2x8x8xf32>
    %504 = vector.extract_strided_slice %433 {offsets = [0, 0, 24], sizes = [2, 8, 8], strides = [1, 1, 1]} : vector<2x8x32xf32> to vector<2x8x8xf32>
    "tpu.trace_start"() <{level = 10 : i32, message = "bqk,bkd->bqd"}> : () -> ()
    %cst_202 = arith.constant dense<0.000000e+00> : vector<2x8x8xf32>
    %505 = tpu.matmul %503, %504, %cst_202 {dimension_numbers = #tpu.dot_dimension_numbers<[2], [1], [1], [2], [0, 0, 0, 1, 1, 2], [0], [0]>} : vector<2x8x8xf32>, vector<2x8x8xf32>, vector<2x8x8xf32> -> vector<2x8x8xf32>
    "tpu.trace_stop"() : () -> ()
    %506 = tpu.concatenate %451, %469, %487, %505 in 2 : vector<2x8x8xf32>, vector<2x8x8xf32>, vector<2x8x8xf32>, vector<2x8x8xf32> -> vector<2x8x32xf32>
    %507 = vector.shape_cast %506 : vector<2x8x32xf32> to vector<16x32xf32>
    %c0_203 = arith.constant 0 : index
    %c0_204 = arith.constant 0 : index
    %508 = vector.load %arg43[%c0_203, %c0_204] : memref<32x32xf32, #tpu.memory_space<vmem>>, vector<32x32xf32>
    %cst_205 = arith.constant dense<0.000000e+00> : vector<16x32xf32>
    %509 = tpu.matmul %507, %508, %cst_205 {dimension_numbers = #tpu.dot_dimension_numbers<[1], [0], [0], [1], [0, 0, 1, 1], [], []>} : vector<16x32xf32>, vector<32x32xf32>, vector<16x32xf32> -> vector<16x32xf32>
    %c0_206 = arith.constant 0 : index
    %c0_207 = arith.constant 0 : index
    %510 = vector.load %arg44[%c0_206, %c0_207] : memref<1x32xf32, #tpu.memory_space<vmem>>, vector<1x32xf32>
    %511 = vector.broadcast %510 : vector<1x32xf32> to vector<16x32xf32>
    %512 = arith.addf %509, %511 : vector<16x32xf32>
    %513 = arith.addf %415, %512 : vector<16x32xf32>
    %cst_208 = arith.constant dense<0.000000e+00> : vector<16xf32>
    %514 = vector.multi_reduction <add>, %513, %cst_208 [1] : vector<16x32xf32> to vector<16xf32>
    %515 = vector.shape_cast %514 : vector<16xf32> to vector<16x1xf32>
    %cst_209 = arith.constant 3.200000e+01 : f32
    %516 = vector.broadcast %cst_209 : f32 to vector<16x1xf32>
    %517 = arith.divf %515, %516 : vector<16x1xf32>
    %518 = vector.broadcast %517 : vector<16x1xf32> to vector<16x32xf32>
    %519 = arith.subf %513, %518 : vector<16x32xf32>
    %520 = arith.mulf %519, %519 : vector<16x32xf32>
    %cst_210 = arith.constant dense<0.000000e+00> : vector<16xf32>
    %521 = vector.multi_reduction <add>, %520, %cst_210 [1] : vector<16x32xf32> to vector<16xf32>
    %522 = vector.shape_cast %521 : vector<16xf32> to vector<16x1xf32>
    %cst_211 = arith.constant 3.200000e+01 : f32
    %523 = vector.broadcast %cst_211 : f32 to vector<16x1xf32>
    %524 = arith.divf %522, %523 : vector<16x1xf32>
    %525 = vector.broadcast %517 : vector<16x1xf32> to vector<16x32xf32>
    %526 = arith.subf %513, %525 : vector<16x32xf32>
    %cst_212 = arith.constant 9.99999974E-6 : f32
    %527 = vector.broadcast %cst_212 : f32 to vector<16x1xf32>
    %528 = arith.addf %524, %527 : vector<16x1xf32>
    %529 = math.rsqrt %528 : vector<16x1xf32>
    %530 = vector.broadcast %529 : vector<16x1xf32> to vector<16x32xf32>
    %531 = arith.mulf %526, %530 : vector<16x32xf32>
    %c0_213 = arith.constant 0 : index
    %c0_214 = arith.constant 0 : index
    %532 = vector.load %arg17[%c0_213, %c0_214] : memref<1x32xf32, #tpu.memory_space<vmem>>, vector<1x32xf32>
    %533 = vector.broadcast %532 : vector<1x32xf32> to vector<16x32xf32>
    %534 = arith.mulf %531, %533 : vector<16x32xf32>
    %c0_215 = arith.constant 0 : index
    %c0_216 = arith.constant 0 : index
    %535 = vector.load %arg18[%c0_215, %c0_216] : memref<1x32xf32, #tpu.memory_space<vmem>>, vector<1x32xf32>
    %536 = vector.broadcast %535 : vector<1x32xf32> to vector<16x32xf32>
    %537 = arith.addf %534, %536 : vector<16x32xf32>
    %c0_217 = arith.constant 0 : index
    %c0_218 = arith.constant 0 : index
    %538 = vector.load %arg49[%c0_217, %c0_218] : memref<32x64xf32, #tpu.memory_space<vmem>>, vector<32x64xf32>
    %cst_219 = arith.constant dense<0.000000e+00> : vector<16x64xf32>
    %539 = tpu.matmul %537, %538, %cst_219 {dimension_numbers = #tpu.dot_dimension_numbers<[1], [0], [0], [1], [0, 0, 1, 1], [], []>} : vector<16x32xf32>, vector<32x64xf32>, vector<16x64xf32> -> vector<16x64xf32>
    %c0_220 = arith.constant 0 : index
    %c0_221 = arith.constant 0 : index
    %540 = vector.load %arg50[%c0_220, %c0_221] : memref<1x64xf32, #tpu.memory_space<vmem>>, vector<1x64xf32>
    %541 = vector.broadcast %540 : vector<1x64xf32> to vector<16x64xf32>
    %542 = arith.addf %539, %541 : vector<16x64xf32>
    %cst_222 = arith.constant 5.000000e-01 : f32
    %543 = vector.broadcast %cst_222 : f32 to vector<16x64xf32>
    %544 = arith.mulf %543, %542 : vector<16x64xf32>
    %cst_223 = arith.constant 0.707106769 : f32
    %545 = vector.broadcast %cst_223 : f32 to vector<16x64xf32>
    %546 = arith.mulf %542, %545 : vector<16x64xf32>
    %547 = math.absf %546 : vector<16x64xf32>
    %cst_224 = arith.constant 0.327591091 : f32
    %548 = vector.broadcast %cst_224 : f32 to vector<16x64xf32>
    %549 = arith.mulf %548, %547 : vector<16x64xf32>
    %cst_225 = arith.constant 1.000000e+00 : f32
    %550 = vector.broadcast %cst_225 : f32 to vector<16x64xf32>
    %551 = arith.addf %550, %549 : vector<16x64xf32>
    %cst_226 = arith.constant 1.000000e+00 : f32
    %552 = vector.broadcast %cst_226 : f32 to vector<16x64xf32>
    %553 = arith.divf %552, %551 : vector<16x64xf32>
    %cst_227 = arith.constant 1.06140542 : f32
    %554 = vector.broadcast %cst_227 : f32 to vector<16x64xf32>
    %555 = arith.mulf %554, %553 : vector<16x64xf32>
    %cst_228 = arith.constant -1.45315206 : f32
    %556 = vector.broadcast %cst_228 : f32 to vector<16x64xf32>
    %557 = arith.addf %555, %556 : vector<16x64xf32>
    %558 = arith.mulf %557, %553 : vector<16x64xf32>
    %cst_229 = arith.constant 1.42141378 : f32
    %559 = vector.broadcast %cst_229 : f32 to vector<16x64xf32>
    %560 = arith.addf %558, %559 : vector<16x64xf32>
    %561 = arith.mulf %560, %553 : vector<16x64xf32>
    %cst_230 = arith.constant -0.284496725 : f32
    %562 = vector.broadcast %cst_230 : f32 to vector<16x64xf32>
    %563 = arith.addf %561, %562 : vector<16x64xf32>
    %564 = arith.mulf %563, %553 : vector<16x64xf32>
    %cst_231 = arith.constant 0.254829586 : f32
    %565 = vector.broadcast %cst_231 : f32 to vector<16x64xf32>
    %566 = arith.addf %564, %565 : vector<16x64xf32>
    %567 = arith.mulf %566, %553 : vector<16x64xf32>
    %cst_232 = arith.constant 0.000000e+00 : f32
    %568 = vector.broadcast %cst_232 : f32 to vector<16x64xf32>
    %569 = arith.subf %568, %547 : vector<16x64xf32>
    %570 = arith.mulf %569, %547 : vector<16x64xf32>
    %571 = math.exp %570 : vector<16x64xf32>
    %572 = arith.mulf %567, %571 : vector<16x64xf32>
    %cst_233 = arith.constant 1.000000e+00 : f32
    %573 = vector.broadcast %cst_233 : f32 to vector<16x64xf32>
    %574 = arith.subf %573, %572 : vector<16x64xf32>
    %cst_234 = arith.constant 0.000000e+00 : f32
    %575 = vector.broadcast %cst_234 : f32 to vector<16x64xf32>
    %576 = arith.cmpf oge, %546, %575 : vector<16x64xf32>
    %cst_235 = arith.constant 0.000000e+00 : f32
    %577 = vector.broadcast %cst_235 : f32 to vector<16x64xf32>
    %578 = arith.subf %577, %574 : vector<16x64xf32>
    %579 = arith.select %576, %574, %578 : vector<16x64xi1>, vector<16x64xf32>
    %cst_236 = arith.constant 1.000000e+00 : f32
    %580 = vector.broadcast %cst_236 : f32 to vector<16x64xf32>
    %581 = arith.addf %580, %579 : vector<16x64xf32>
    %582 = arith.mulf %544, %581 : vector<16x64xf32>
    %c0_237 = arith.constant 0 : index
    %c0_238 = arith.constant 0 : index
    %583 = vector.load %arg51[%c0_237, %c0_238] : memref<64x32xf32, #tpu.memory_space<vmem>>, vector<64x32xf32>
    %cst_239 = arith.constant dense<0.000000e+00> : vector<16x32xf32>
    %584 = tpu.matmul %582, %583, %cst_239 {dimension_numbers = #tpu.dot_dimension_numbers<[1], [0], [0], [1], [0, 0, 1, 1], [], []>} : vector<16x64xf32>, vector<64x32xf32>, vector<16x32xf32> -> vector<16x32xf32>
    %c0_240 = arith.constant 0 : index
    %c0_241 = arith.constant 0 : index
    %585 = vector.load %arg52[%c0_240, %c0_241] : memref<1x32xf32, #tpu.memory_space<vmem>>, vector<1x32xf32>
    %586 = vector.broadcast %585 : vector<1x32xf32> to vector<16x32xf32>
    %587 = arith.addf %584, %586 : vector<16x32xf32>
    %588 = arith.addf %537, %587 : vector<16x32xf32>
    %cst_242 = arith.constant dense<0.000000e+00> : vector<16xf32>
    %589 = vector.multi_reduction <add>, %588, %cst_242 [1] : vector<16x32xf32> to vector<16xf32>
    %590 = vector.shape_cast %589 : vector<16xf32> to vector<16x1xf32>
    %cst_243 = arith.constant 3.200000e+01 : f32
    %591 = vector.broadcast %cst_243 : f32 to vector<16x1xf32>
    %592 = arith.divf %590, %591 : vector<16x1xf32>
    %593 = vector.broadcast %592 : vector<16x1xf32> to vector<16x32xf32>
    %594 = arith.subf %588, %593 : vector<16x32xf32>
    %595 = arith.mulf %594, %594 : vector<16x32xf32>
    %cst_244 = arith.constant dense<0.000000e+00> : vector<16xf32>
    %596 = vector.multi_reduction <add>, %595, %cst_244 [1] : vector<16x32xf32> to vector<16xf32>
    %597 = vector.shape_cast %596 : vector<16xf32> to vector<16x1xf32>
    %cst_245 = arith.constant 3.200000e+01 : f32
    %598 = vector.broadcast %cst_245 : f32 to vector<16x1xf32>
    %599 = arith.divf %597, %598 : vector<16x1xf32>
    %600 = vector.broadcast %592 : vector<16x1xf32> to vector<16x32xf32>
    %601 = arith.subf %588, %600 : vector<16x32xf32>
    %cst_246 = arith.constant 9.99999974E-6 : f32
    %602 = vector.broadcast %cst_246 : f32 to vector<16x1xf32>
    %603 = arith.addf %599, %602 : vector<16x1xf32>
    %604 = math.rsqrt %603 : vector<16x1xf32>
    %605 = vector.broadcast %604 : vector<16x1xf32> to vector<16x32xf32>
    %606 = arith.mulf %601, %605 : vector<16x32xf32>
    %c0_247 = arith.constant 0 : index
    %c0_248 = arith.constant 0 : index
    %607 = vector.load %arg19[%c0_247, %c0_248] : memref<1x32xf32, #tpu.memory_space<vmem>>, vector<1x32xf32>
    %608 = vector.broadcast %607 : vector<1x32xf32> to vector<16x32xf32>
    %609 = arith.mulf %606, %608 : vector<16x32xf32>
    %c0_249 = arith.constant 0 : index
    %c0_250 = arith.constant 0 : index
    %610 = vector.load %arg20[%c0_249, %c0_250] : memref<1x32xf32, #tpu.memory_space<vmem>>, vector<1x32xf32>
    %611 = vector.broadcast %610 : vector<1x32xf32> to vector<16x32xf32>
    %612 = arith.addf %609, %611 : vector<16x32xf32>
    %c0_251 = arith.constant 0 : index
    %c0_252 = arith.constant 0 : index
    %613 = vector.load %arg3[%c0_251, %c0_252] : memref<128x32xf32, #tpu.memory_space<vmem>>, vector<128x32xf32>
    %cst_253 = arith.constant dense<0.000000e+00> : vector<16x128xf32>
    %614 = tpu.matmul %612, %613, %cst_253 {dimension_numbers = #tpu.dot_dimension_numbers<[1], [1], [0], [0], [0, 0, 1, 0], [], []>} : vector<16x32xf32>, vector<128x32xf32>, vector<16x128xf32> -> vector<16x128xf32>
    %c0_254 = arith.constant 0 : index
    %c0_255 = arith.constant 0 : index
    %615 = vector.load %arg6[%c0_254, %c0_255] : memref<1x128xf32, #tpu.memory_space<vmem>>, vector<1x128xf32>
    %616 = vector.broadcast %615 : vector<1x128xf32> to vector<16x128xf32>
    %617 = arith.addf %614, %616 : vector<16x128xf32>
    %c0_256 = arith.constant 0 : index
    %c0_257 = arith.constant 0 : index
    %618 = vector.load %arg53[%c0_256, %c0_257] : memref<16x128xf32, #tpu.memory_space<vmem>>, vector<16x128xf32>
    tpu.vector_store %arg53[%c0_256, %c0_257], %617 {strides = array<i32>} : memref<16x128xf32, #tpu.memory_space<vmem>>, vector<16x128xf32>,
    return
  }
}

</mosaic_0001>

<bundles_post_ra>
// kernel: dual_encoder_bart_forward.1
= control target key start
LH: loop header
LB: loop body
LE: loop exit
PB: predicated region body
PF: predicated region fallthrough
CT: control target
= control target key end

     0   :  { %s8422_s6 = smov 1   ;;  %s8423_s10 = smov 2   ;;  %s9641_s0 = inlined_call_operand.smem [shape: u32[54], index: -1, kind: input, shape index: {}] }
   0x1   :  { %s8514_s5 = sld [smem:[%s9641_s0]]   ;;  %s8424_s14 = smov 3  }
   0x2   :  { %s8519_s9 = sld [smem:[%s9641_s0 + %s8422_s6]]   ;;  %s8425_s18 = smov 4  }
   0x3   :  { %s8524_s13 = sld [smem:[%s9641_s0 + %s8423_s10]]   ;;  %s8426_s22 = smov 5  }
   0x4   :  { %s8529_s17 = sld [smem:[%s9641_s0 + %s8424_s14]]   ;;  %s8427_s26 = smov 6  }
   0x5   :  { %s8534_s21 = sld [smem:[%s9641_s0 + %s8425_s18]]   ;;  %s8428_s30 = smov 7  }
   0x6   :  { %s8539_s25 = sld [smem:[%s9641_s0 + %s8426_s22]]   ;;  %s8429_s4 = smov 8  }
   0x7   :  { %9659 = sst [smem:[#allocation40_spill]] %s8514_s5  ;;  %s8430_s10 = smov 9  }
   0x8   :  { %9660 = sst [smem:[#allocation41_spill]] %s8519_s9  ;;  %s8431_s15 = smov 10  }
   0x9   :  { %9661 = sst [smem:[#allocation42_spill]] %s8524_s13  ;;  %s8432_s20 = smov 11  }
   0xa   :  { %9662 = sst [smem:[#allocation43_spill]] %s8529_s17  ;;  %s8434_s1 = smov 13  }
   0xb   :  { %9663 = sst [smem:[#allocation44_spill]] %s8534_s21  ;;  %s8435_s7 = smov 14  }
   0xc   :  { %9664 = sst [smem:[#allocation45_spill]] %s8539_s25  ;;  %s8437_s22 = smov 16  }
   0xd   :  { %s8544_s29 = sld [smem:[%s9641_s0 + %s8427_s26]]   ;;  %s8433_s26 = smov 12  }
   0xe   :  { %s8549_s3 = sld [smem:[%s9641_s0 + %s8428_s30]]   ;;  %s8438_s28 = smov 17  }
   0xf   :  { %s8554_s8 = sld [smem:[%s9641_s0 + %s8429_s4]]  }
  0x10   :  { %s8559_s14 = sld [smem:[%s9641_s0 + %s8430_s10]]  }
  0x11   :  { %s8564_s19 = sld [smem:[%s9641_s0 + %s8431_s15]]   ;;  %s8436_s15 = smov 15  }
  0x12   :  { %s8569_s24 = sld [smem:[%s9641_s0 + %s8432_s20]]  }
  0x13   :  { %9665 = sst [smem:[#allocation46_spill]] %s8544_s29 }
  0x14   :  { %9666 = sst [smem:[#allocation47_spill]] %s8549_s3 }
  0x15   :  { %9667 = sst [smem:[#allocation48_spill]] %s8554_s8 }
  0x16   :  { %9668 = sst [smem:[#allocation49_spill]] %s8559_s14 }
  0x17   :  { %9669 = sst [smem:[#allocation50_spill]] %s8564_s19 }
  0x18   :  { %9670 = sst [smem:[#allocation51_spill]] %s8569_s24 }
  0x19   :  { %s8574_s30 = sld [smem:[%s9641_s0 + %s8433_s26]]  }
  0x1a   :  { %s8579_s6 = sld [smem:[%s9641_s0 + %s8434_s1]]  }
  0x1b   :  { %s8584_s12 = sld [smem:[%s9641_s0 + %s8435_s7]]   ;;  %s8439_s7 = smov 18  }
  0x1c   :  { %s8589_s20 = sld [smem:[%s9641_s0 + %s8436_s15]]   ;;  %s8440_s15 = smov 19  }
  0x1d   :  { %s8594_s27 = sld [smem:[%s9641_s0 + %s8437_s22]]   ;;  %s8441_s22 = smov 20  }
  0x1e   :  { %s8599_s4 = sld [smem:[%s9641_s0 + %s8438_s28]]   ;;  %s8442_s28 = smov 21  }
  0x1f   :  { %9671 = sst [smem:[#allocation52_spill]] %s8574_s30 }
  0x20   :  { %s8604_s29 = sld [smem:[%s9641_s0 + %s8439_s7]]   ;;  %s8443_s7 = smov 22  }
  0x21   :  { %s8609_s30 = sld [smem:[%s9641_s0 + %s8440_s15]]   ;;  %s8444_s15 = smov 23  }
  0x22   :  { %s8614_s24 = sld [smem:[%s9641_s0 + %s8441_s22]]   ;;  %s8445_s22 = smov 24  }
  0x23   :  { %s8619_s25 = sld [smem:[%s9641_s0 + %s8442_s28]]   ;;  %s8446_s28 = smov 25  }
  0x24   :  { %s8624_s19 = sld [smem:[%s9641_s0 + %s8443_s7]]   ;;  %s8447_s7 = smov 26  }
  0x25   :  { %s8629_s14 = sld [smem:[%s9641_s0 + %s8444_s15]]   ;;  %s8448_s15 = smov 27  }
  0x26   :  { %s8634_s13 = sld [smem:[%s9641_s0 + %s8445_s22]]   ;;  %s8449_s22 = smov 28  }
  0x27   :  { %s8639_s9 = sld [smem:[%s9641_s0 + %s8446_s28]]   ;;  %s8450_s28 = smov 29  }
  0x28   :  { %s8649_s8 = sld [smem:[%s9641_s0 + %s8448_s15]]   ;;  %s8452_s15 = smov 31  }
  0x29   :  { %9672 = sst [smem:[#allocation53_spill]] %s8619_s25 }
  0x2a   :  { %9673 = sst [smem:[#allocation54_spill]] %s8624_s19 }
  0x2b   :  { %9674 = sst [smem:[#allocation55_spill]] %s8629_s14 }
  0x2c   :  { %9675 = sst [smem:[#allocation56_spill]] %s8634_s13 }
  0x2d   :  { %9676 = sst [smem:[#allocation57_spill]] %s8639_s9 }
  0x2e   :  { %s8644_s19 = sld [smem:[%s9641_s0 + %s8447_s7]]   ;;  %s8451_s7 = smov 30  }
  0x2f   :  { %9678 = sst [smem:[#allocation59_spill]] %s8649_s8 }
  0x30   :  { %s8654_s13 = sld [smem:[%s9641_s0 + %s8449_s22]]   ;;  %s8453_s22 = smov 32  }
  0x31   :  { %s8659_s9 = sld [smem:[%s9641_s0 + %s8450_s28]]   ;;  %s8454_s28 = smov 33  }
  0x32   :  { %s8669_s8 = sld [smem:[%s9641_s0 + %s8452_s15]]   ;;  %s8456_s15 = smov 35  }
  0x34   :  { %9677 = sst [smem:[#allocation58_spill]] %s8644_s19 }
  0x35   :  { %s8664_s19 = sld [smem:[%s9641_s0 + %s8451_s7]]   ;;  %s8455_s7 = smov 34  }
  0x36   :  { %9679 = sst [smem:[#allocation60_spill]] %s8654_s13 }
  0x37   :  { %9680 = sst [smem:[#allocation61_spill]] %s8659_s9 }
  0x38   :  { %9681 = sst [smem:[#allocation62_spill]] %s8669_s8 }
  0x39   :  { %s8674_s13 = sld [smem:[%s9641_s0 + %s8453_s22]]   ;;  %s8457_s22 = smov 36  }
  0x3a   :  { %s8679_s9 = sld [smem:[%s9641_s0 + %s8454_s28]]   ;;  %s8458_s28 = smov 37  }
  0x3b   :  { %s8684_s3 = sld [smem:[%s9641_s0 + %s8455_s7]]   ;;  %s8459_s7 = smov 38  }
  0x3c   :  { %s8689_s8 = sld [smem:[%s9641_s0 + %s8456_s15]]   ;;  %s8460_s15 = smov 39  }
  0x3d   :  { %s8694_s14 = sld [smem:[%s9641_s0 + %s8457_s22]]   ;;  %s8461_s22 = smov 40  }
  0x3e   :  { %s8704_s25 = sld [smem:[%s9641_s0 + %s8459_s7]]   ;;  %s8463_s7 = smov 42  }
  0x3f   :  { %s8714_s21 = sld [smem:[%s9641_s0 + %s8461_s22]]   ;;  %s8465_s22 = smov 44  }
  0x40   :  { %9682 = sst [smem:[#allocation63_spill]] %s8679_s9 }
  0x41   :  { %s8699_s9 = sld [smem:[%s9641_s0 + %s8458_s28]]   ;;  %s8462_s28 = smov 41  }
  0x42   :  { %9683 = sst [smem:[#allocation64_spill]] %s8689_s8 }
  0x43   :  { %s8709_s8 = sld [smem:[%s9641_s0 + %s8460_s15]]   ;;  %s8464_s15 = smov 43  }
  0x44   :  { %9685 = sst [smem:[#allocation66_spill]] %s8704_s25 }
  0x45   :  { %s8724_s17 = sld [smem:[%s9641_s0 + %s8463_s7]]   ;;  %s8467_s7 = smov 46  }
  0x46   :  { %s8734_s5 = sld [smem:[%s9641_s0 + %s8465_s22]]   ;;  %s8469_s22 = smov 48  }
  0x47   :  { %9684 = sst [smem:[#allocation65_spill]] %s8699_s9 }
  0x48   :  { %s8719_s9 = sld [smem:[%s9641_s0 + %s8462_s28]]   ;;  %s8466_s28 = smov 45  }
  0x49   :  { %9686 = sst [smem:[#allocation67_spill]] %s8709_s8 }
  0x4a   :  { %s8729_s8 = sld [smem:[%s9641_s0 + %s8464_s15]]   ;;  %s8468_s15 = smov 47  }
  0x4b   :  { %9688 = sst [smem:[#allocation69_spill]] %s8724_s17 }
  0x4c   :  { %9690 = sst [smem:[#allocation71_spill]] %s8734_s5 }
  0x4d   :  { %s8744_s17 = sld [smem:[%s9641_s0 + %s8467_s7]]   ;;  %s8471_s7 = smov 50  }
  0x4e   :  { %9687 = sst [smem:[#allocation68_spill]] %s8719_s9 }
  0x4f   :  { %s8739_s9 = sld [smem:[%s9641_s0 + %s8466_s28]]   ;;  %s8470_s28 = smov 49  }
  0x50   :  { %9689 = sst [smem:[#allocation70_spill]] %s8729_s8 }
  0x51   :  { %s8749_s8 = sld [smem:[%s9641_s0 + %s8468_s15]]   ;;  %s8472_s15 = smov 51  }
  0x52   :  { %s8754_s5 = sld [smem:[%s9641_s0 + %s8469_s22]]   ;;  %s8473_s22 = smov 52  }
  0x53   :  { %9692 = sst [smem:[#allocation73_spill]] %s8744_s17 }
  0x54   :  { %s8764_s17 = sld [smem:[%s9641_s0 + %s8471_s7]]  }
  0x55   :  { %9691 = sst [smem:[#allocation72_spill]] %s8739_s9 }
  0x56   :  { %s8759_s9 = sld [smem:[%s9641_s0 + %s8470_s28]]   ;;  %s8474_s28 = smov 53  }
  0x57   :  { %9693 = sst [smem:[#allocation74_spill]] %s8749_s8 }
  0x58   :  { %9694 = sst [smem:[#allocation75_spill]] %s8754_s5 }
  0x59   :  { %s8769_s8 = sld [smem:[%s9641_s0 + %s8472_s15]]  }
  0x5a   :  { %s8774_s5 = sld [smem:[%s9641_s0 + %s8473_s22]]  }
  0x5b   :  { %s8779_s25 = sld [smem:[%s9641_s0 + %s8474_s28]]  }
  0x5c   :  { %112 = vsyncpa [#allocation3], 0 }
  0x5d   :  { %113 = vsyncpa [#allocation5], 0 }
  0x5e   :  { %114 = vsyncpa [#allocation8], 0 }
  0x5f   :  { %115 = vsyncpa [#allocation11], 0 }
  0x60   :  { %116 = vsyncpa [#allocation14], 0 }
  0x61   :  { %117 = vsyncpa [#allocation17], 0 }
  0x62   :  { %118 = vsyncpa [#allocation20], 0 }
  0x63   :  { %119 = vsyncpa [#allocation23], 0 }
  0x64   :  { %120 = vsyncpa [#allocation26], 0 }
  0x65   :  { %121 = vsyncpa [#allocation29], 0  ;;  %s8475_s7 = smov [#allocation4]   ;;  %s8476_s11 = smov [#allocation7]  }
  0x66   :  { %s164_s10 = sshll.u32 %s8475_s7, 4  ;;  %s184_s15 = sshll.u32 %s8476_s11, 4  ;;  %s165_s10 = int_to_ptr.vmem [resolvable:$true] %s164_s10  ;;  %s185_s15 = int_to_ptr.vmem [resolvable:$true] %s184_s15 }
  0x67   :  { %s8050_s16 = scalar_lea.vmem %s165_s10, 16  ;;  %s8054_s0 = scalar_lea.vmem %s165_s10, 32 }
  0x68   :  { %p8051_p0 = scmp.ne.s32.totalorder %s165_s10, %s8050_s16  ;;  %p8055_p1 = scmp.lt.s32.totalorder %s165_s10, %s165_s10 }
  0x69   :  { %p8056_p2 = scmp.lt.s32.totalorder %s8054_s0, %s8050_s16 }
  0x6b   :  { %p8057_p3 = por %p8056_p2, %p8055_p1 }
  0x6d   :  { %p8058_p4 = pnand %p8057_p3, %p8051_p0 }
  0x6f   :  { %8061 = shalt.err (!%p8058_p4)
}
  0x70   :  { %167 = dma.hbm_to_vmem [thread:$0]  %s8584_s12, 16, %s165_s10, [#allocation5]  }
  0x71   :  { %s8070_s18 = scalar_lea.vmem %s185_s15, 16  ;;  %s8074_s22 = scalar_lea.vmem %s185_s15, 32 }
  0x72   :  { %p8071_p5 = scmp.ne.s32.totalorder %s185_s15, %s8070_s18  ;;  %p8075_p6 = scmp.lt.s32.totalorder %s185_s15, %s185_s15 }
  0x73   :  { %p8076_p7 = scmp.lt.s32.totalorder %s8074_s22, %s8070_s18 }
  0x75   :  { %p8077_p8 = por %p8076_p7, %p8075_p6 }
  0x77   :  { %p8078_p9 = pnand %p8077_p8, %p8071_p5 }
  0x79   :  { %8081 = shalt.err (!%p8078_p9)
}
  0x7a   :  { %187 = dma.hbm_to_vmem [thread:$0]  %s8594_s27, 16, %s185_s15, [#allocation8]  }
  0x7b   :  { %s8477_s23 = smov [#allocation10]   ;;  %s8478_s28 = smov [#allocation13]  }
  0x7c   :  { %s204_s26 = sshll.u32 %s8477_s23, 4  ;;  %s224_s1 = sshll.u32 %s8478_s28, 4  ;;  %s205_s26 = int_to_ptr.vmem [resolvable:$true] %s204_s26  ;;  %s225_s1 = int_to_ptr.vmem [resolvable:$true] %s224_s1 }
  0x7d   :  { %s8090_s2 = scalar_lea.vmem %s205_s26, 16  ;;  %s8094_s7 = scalar_lea.vmem %s205_s26, 32 }
  0x7e   :  { %p8091_p10 = scmp.ne.s32.totalorder %s205_s26, %s8090_s2  ;;  %p8095_p11 = scmp.lt.s32.totalorder %s205_s26, %s205_s26 }
  0x7f   :  { %p8096_p12 = scmp.lt.s32.totalorder %s8094_s7, %s8090_s2 }
  0x81   :  { %p8097_p13 = por %p8096_p12, %p8095_p11 }
  0x83   :  { %p8098_p0 = pnand %p8097_p13, %p8091_p10 }
  0x85   :  { %8101 = shalt.err (!%p8098_p0)
}
  0x86   :  { %207 = dma.hbm_to_vmem [thread:$0]  %s8604_s29, 16, %s205_s26, [#allocation11]  }
  0x87   :  { %s8110_s12 = scalar_lea.vmem %s225_s1, 16  ;;  %s8114_s10 = scalar_lea.vmem %s225_s1, 32 }
  0x88   :  { %p8111_p1 = scmp.ne.s32.totalorder %s225_s1, %s8110_s12  ;;  %p8115_p2 = scmp.lt.s32.totalorder %s225_s1, %s225_s1 }
  0x89   :  { %p8116_p3 = scmp.lt.s32.totalorder %s8114_s10, %s8110_s12 }
  0x8b   :  { %p8117_p4 = por %p8116_p3, %p8115_p2 }
  0x8d   :  { %p8118_p5 = pnand %p8117_p4, %p8111_p1 }
  0x8f   :  { %8121 = shalt.err (!%p8118_p5)
}
  0x90   :  { %227 = dma.hbm_to_vmem [thread:$0]  %s8614_s24, 16, %s225_s1, [#allocation14]  }
  0x91   :  { %s8479_s27 = smov [#allocation16]   ;;  %s8480_s15 = smov [#allocation19]  }
  0x92   :  { %s264_s11 = sshll.u32 %s8479_s27, 4  ;;  %s288_s16 = sshll.u32 %s8480_s15, 4  ;;  %s265_s11 = int_to_ptr.vmem [resolvable:$true] %s264_s11  ;;  %s289_s16 = int_to_ptr.vmem [resolvable:$true] %s288_s16 }
  0x93   :  { %s8130_s0 = scalar_lea.vmem %s265_s11, 16  ;;  %s8134_s18 = scalar_lea.vmem %s265_s11, 32 }
  0x94   :  { %p8131_p6 = scmp.ne.s32.totalorder %s265_s11, %s8130_s0  ;;  %p8135_p7 = scmp.lt.s32.totalorder %s265_s11, %s265_s11 }
  0x95   :  { %p8136_p8 = scmp.lt.s32.totalorder %s8134_s18, %s8130_s0 }
  0x97   :  { %p8137_p9 = por %p8136_p8, %p8135_p7 }
  0x99   :  { %p8138_p10 = pnand %p8137_p9, %p8131_p6 }
  0x9b   :  { %8141 = shalt.err (!%p8138_p10)
}
  0x9c   :  { %267 = dma.hbm_to_vmem [thread:$0]  %s8674_s13, 16, %s265_s11, [#allocation17]  }
  0x9d   :  { %s8150_s29 = scalar_lea.vmem %s289_s16, 16  ;;  %s8154_s22 = scalar_lea.vmem %s289_s16, 32 }
  0x9e   :  { %p8151_p11 = scmp.ne.s32.totalorder %s289_s16, %s8150_s29  ;;  %p8155_p12 = scmp.lt.s32.totalorder %s289_s16, %s289_s16 }
  0x9f   :  { %p8156_p13 = scmp.lt.s32.totalorder %s8154_s22, %s8150_s29 }
  0xa1   :  { %p8157_p0 = por %p8156_p13, %p8155_p12 }
  0xa3   :  { %p8158_p1 = pnand %p8157_p0, %p8151_p11 }
  0xa5   :  { %8161 = shalt.err (!%p8158_p1)
}
  0xa6   :  { %291 = dma.hbm_to_vmem [thread:$0]  %s8694_s14, 16, %s289_s16, [#allocation20]  }
  0xa7   :  { %s8481_s24 = smov [#allocation22]   ;;  %s8482_s26 = smov [#allocation25]  }
  0xa8   :  { %s312_s23 = sshll.u32 %s8481_s24, 4  ;;  %s345_s28 = sshll.u32 %s8482_s26, 4  ;;  %s313_s23 = int_to_ptr.vmem [resolvable:$true] %s312_s23  ;;  %s346_s28 = int_to_ptr.vmem [resolvable:$true] %s345_s28 }
  0xa9   :  { %s8170_s1 = scalar_lea.vmem %s313_s23, 16  ;;  %s8174_s2 = scalar_lea.vmem %s313_s23, 32 }
  0xaa   :  { %p8171_p2 = scmp.ne.s32.totalorder %s313_s23, %s8170_s1  ;;  %p8175_p3 = scmp.lt.s32.totalorder %s313_s23, %s313_s23 }
  0xab   :  { %p8176_p4 = scmp.lt.s32.totalorder %s8174_s2, %s8170_s1 }
  0xad   :  { %p8177_p5 = por %p8176_p4, %p8175_p3 }
  0xaf   :  { %p8178_p6 = pnand %p8177_p5, %p8171_p2 }
  0xb1   :  { %8181 = shalt.err (!%p8178_p6)
}
  0xb2   :  { %315 = dma.hbm_to_vmem [thread:$0]  %s8714_s21, 16, %s313_s23, [#allocation23]  }
  0xb3   :  { %s8190_s13 = scalar_lea.vmem %s346_s28, 512  ;;  %p8195_p8 = scmp.lt.s32.totalorder %s346_s28, %s346_s28 }
  0xb4   :  { %p8191_p7 = scmp.ne.s32.totalorder %s346_s28, %s8190_s13  ;;  %p8196_p9 = scmp.lt.s32.totalorder %s8190_s13, %s8190_s13 }
  0xb6   :  { %p8197_p10 = por %p8196_p9, %p8195_p8 }
  0xb8   :  { %p8198_p11 = pnand %p8197_p10, %p8191_p7 }
  0xba   :  { %8201 = shalt.err (!%p8198_p11)
}
  0xbb   :  { %s8483_s14 = smov 128   ;;  %s8484_s7 = smov 8  }
  0xbc   :  { %351 = dma.hbm_to_vmem [thread:$0]  %s8759_s9, 512, %s346_s28, [#allocation26], %s8483_s14, %s8483_s14, %s8484_s7  }
  0xbd   :  { %s8485_s12 = smov [#allocation2]   ;;  %s8486_s27 = smov [#allocation6]  }
  0xbe   :  { %s154_s10 = sshll.u32 %s8485_s12, 4  ;;  %s174_s11 = sshll.u32 %s8486_s27, 4  ;;  %s155_s10 = int_to_ptr.vmem [resolvable:$true] %s154_s10  ;;  %s175_s11 = int_to_ptr.vmem [resolvable:$true] %s174_s11 }
  0xbf   :  { %s8210_s15 = scalar_lea.vmem %s155_s10, 16  ;;  %s8214_s21 = scalar_lea.vmem %s155_s10, 32 }
  0xc0   :  { %p8211_p12 = scmp.ne.s32.totalorder %s155_s10, %s8210_s15  ;;  %p8215_p13 = scmp.lt.s32.totalorder %s155_s10, %s155_s10 }
  0xc1   :  { %p8216_p0 = scmp.lt.s32.totalorder %s8214_s21, %s8210_s15 }
  0xc3   :  { %p8217_p1 = por %p8216_p0, %p8215_p13 }
  0xc5   :  { %p8218_p2 = pnand %p8217_p1, %p8211_p12 }
  0xc7   :  { %8221 = shalt.err (!%p8218_p2)
}
  0xc8   :  { %157 = dma.hbm_to_vmem [thread:$0]  %s8579_s6, 16, %s155_s10, [#allocation3]  }
  0xc9   :  { %s8230_s16 = scalar_lea.vmem %s175_s11, 16  ;;  %s8234_s0 = scalar_lea.vmem %s175_s11, 32 }
  0xca   :  { %p8231_p3 = scmp.ne.s32.totalorder %s175_s11, %s8230_s16  ;;  %p8235_p4 = scmp.lt.s32.totalorder %s175_s11, %s175_s11 }
  0xcb   :  { %p8236_p5 = scmp.lt.s32.totalorder %s8234_s0, %s8230_s16 }
  0xcd   :  { %p8237_p6 = por %p8236_p5, %p8235_p4 }
  0xcf   :  { %p8238_p7 = pnand %p8237_p6, %p8231_p3 }
  0xd1   :  { %8241 = shalt.err (!%p8238_p7)
}
  0xd2   :  { %177 = dma.hbm_to_vmem [thread:$0]  %s8589_s20, 16, %s175_s11, [#allocation5]  }
  0xd3   :  { %s8487_s9 = smov [#allocation9]   ;;  %s8488_s29 = smov [#allocation12]  }
  0xd4   :  { %s194_s18 = sshll.u32 %s8487_s9, 4  ;;  %s214_s22 = sshll.u32 %s8488_s29, 4  ;;  %s195_s18 = int_to_ptr.vmem [resolvable:$true] %s194_s18  ;;  %s215_s22 = int_to_ptr.vmem [resolvable:$true] %s214_s22 }
  0xd5   :  { %s8250_s24 = scalar_lea.vmem %s195_s18, 16  ;;  %s8254_s23 = scalar_lea.vmem %s195_s18, 32 }
  0xd6   :  { %p8251_p8 = scmp.ne.s32.totalorder %s195_s18, %s8250_s24  ;;  %p8255_p9 = scmp.lt.s32.totalorder %s195_s18, %s195_s18 }
  0xd7   :  { %p8256_p10 = scmp.lt.s32.totalorder %s8254_s23, %s8250_s24 }
  0xd9   :  { %p8257_p11 = por %p8256_p10, %p8255_p9 }
  0xdb   :  { %p8258_p12 = pnand %p8257_p11, %p8251_p8 }
  0xdd   :  { %8261 = shalt.err (!%p8258_p12)
}
  0xde   :  { %197 = dma.hbm_to_vmem [thread:$0]  %s8599_s4, 16, %s195_s18, [#allocation8]  }
  0xdf   :  { %s8270_s6 = scalar_lea.vmem %s215_s22, 16  ;;  %s8274_s26 = scalar_lea.vmem %s215_s22, 32 }
  0xe0   :  { %p8271_p13 = scmp.ne.s32.totalorder %s215_s22, %s8270_s6  ;;  %p8275_p0 = scmp.lt.s32.totalorder %s215_s22, %s215_s22 }
  0xe1   :  { %p8276_p1 = scmp.lt.s32.totalorder %s8274_s26, %s8270_s6 }
  0xe3   :  { %p8277_p2 = por %p8276_p1, %p8275_p0 }
  0xe5   :  { %p8278_p3 = pnand %p8277_p2, %p8271_p13 }
  0xe7   :  { %8281 = shalt.err (!%p8278_p3)
}
  0xe8   :  { %217 = dma.hbm_to_vmem [thread:$0]  %s8609_s30, 16, %s215_s22, [#allocation11]  }
  0xe9   :  { %s8489_s20 = smov [#allocation15]   ;;  %s8490_s1 = smov [#allocation18]  }
  0xea   :  { %s252_s28 = sshll.u32 %s8489_s20, 4  ;;  %s276_s2 = sshll.u32 %s8490_s1, 4  ;;  %s253_s28 = int_to_ptr.vmem [resolvable:$true] %s252_s28  ;;  %s277_s2 = int_to_ptr.vmem [resolvable:$true] %s276_s2 }
  0xeb   :  { %s8290_s13 = scalar_lea.vmem %s253_s28, 16  ;;  %s8294_s14 = scalar_lea.vmem %s253_s28, 32 }
  0xec   :  { %p8291_p4 = scmp.ne.s32.totalorder %s253_s28, %s8290_s13  ;;  %p8295_p5 = scmp.lt.s32.totalorder %s253_s28, %s253_s28 }
  0xed   :  { %p8296_p6 = scmp.lt.s32.totalorder %s8294_s14, %s8290_s13 }
  0xef   :  { %p8297_p7 = por %p8296_p6, %p8295_p5 }
  0xf1   :  { %p8298_p8 = pnand %p8297_p7, %p8291_p4 }
  0xf3   :  { %8301 = shalt.err (!%p8298_p8)
}
  0xf4   :  { %255 = dma.hbm_to_vmem [thread:$0]  %s8664_s19, 16, %s253_s28, [#allocation14]  }
  0xf5   :  { %s8310_s4 = scalar_lea.vmem %s277_s2, 16  ;;  %s8314_s12 = scalar_lea.vmem %s277_s2, 32 }
  0xf6   :  { %p8311_p9 = scmp.ne.s32.totalorder %s277_s2, %s8310_s4  ;;  %p8315_p10 = scmp.lt.s32.totalorder %s277_s2, %s277_s2 }
  0xf7   :  { %p8316_p11 = scmp.lt.s32.totalorder %s8314_s12, %s8310_s4 }
  0xf9   :  { %p8317_p12 = por %p8316_p11, %p8315_p10 }
  0xfb   :  { %p8318_p13 = pnand %p8317_p12, %p8311_p9 }
  0xfd   :  { %8321 = shalt.err (!%p8318_p13)
}
  0xfe   :  { %279 = dma.hbm_to_vmem [thread:$0]  %s8684_s3, 16, %s277_s2, [#allocation17]  }
  0xff   :  { %s8491_s30 = smov [#allocation21]   ;;  %s8492_s27 = smov [#allocation24]  }
 0x100   :  { %s300_s10 = sshll.u32 %s8491_s30, 4  ;;  %s328_s11 = sshll.u32 %s8492_s27, 4  ;;  %s301_s10 = int_to_ptr.vmem [resolvable:$true] %s300_s10  ;;  %s329_s11 = int_to_ptr.vmem [resolvable:$true] %s328_s11 }
 0x101   :  { %s8330_s15 = scalar_lea.vmem %s301_s10, 16  ;;  %s8334_s21 = scalar_lea.vmem %s301_s10, 32 }
 0x102   :  { %p8331_p0 = scmp.ne.s32.totalorder %s301_s10, %s8330_s15  ;;  %p8335_p1 = scmp.lt.s32.totalorder %s301_s10, %s301_s10 }
 0x103   :  { %p8336_p2 = scmp.lt.s32.totalorder %s8334_s21, %s8330_s15 }
 0x105   :  { %p8337_p3 = por %p8336_p2, %p8335_p1 }
 0x107   :  { %p8338_p4 = pnand %p8337_p3, %p8331_p0 }
 0x109   :  { %8341 = shalt.err (!%p8338_p4)
}
 0x10a   :  { %s9695_s19 = sld [smem:[#allocation66_spill]]  ;;  %s8350_s16 = scalar_lea.vmem %s329_s11, 16 }
 0x10b   :  { %p8351_p5 = scmp.ne.s32.totalorder %s329_s11, %s8350_s16  ;;  %s8354_s0 = scalar_lea.vmem %s329_s11, 32 }
 0x10c   :  { %p8355_p6 = scmp.lt.s32.totalorder %s329_s11, %s329_s11  ;;  %p8356_p7 = scmp.lt.s32.totalorder %s8354_s0, %s8350_s16 }
 0x10e   :  { %p8357_p8 = por %p8356_p7, %p8355_p6 }
 0x110   :  { %303 = dma.hbm_to_vmem [thread:$0]  %s9695_s19, 16, %s301_s10, [#allocation20]  }
 0x111   :  { %p8358_p9 = pnand %p8357_p8, %p8351_p5 }
 0x113   :  { %8361 = shalt.err (!%p8358_p9)
}
 0x114   :  { %s9696_s3 = sld [smem:[#allocation71_spill]]  ;;  %s8493_s9 = smov [#allocation27]  }
 0x115   :  { %s358_s18 = sshll.u32 %s8493_s9, 4  ;;  %s8494_s29 = smov [#allocation28]   ;;  %s359_s18 = int_to_ptr.vmem [resolvable:$true] %s358_s18 }
 0x116   :  { %s370_s22 = sshll.u32 %s8494_s29, 4  ;;  %s8370_s24 = scalar_lea.vmem %s359_s18, 16  ;;  %s371_s22 = int_to_ptr.vmem [resolvable:$true] %s370_s22 }
 0x117   :  { %p8371_p10 = scmp.ne.s32.totalorder %s359_s18, %s8370_s24  ;;  %s8374_s23 = scalar_lea.vmem %s359_s18, 32 }
 0x118   :  { %p8375_p11 = scmp.lt.s32.totalorder %s359_s18, %s359_s18  ;;  %p8376_p12 = scmp.lt.s32.totalorder %s8374_s23, %s8370_s24 }
 0x11a   :  { %331 = dma.hbm_to_vmem [thread:$0]  %s9696_s3, 16, %s329_s11, [#allocation23]  }
 0x11b   :  { %p8377_p13 = por %p8376_p12, %p8375_p11 }
 0x11d   :  { %p8378_p0 = pnand %p8377_p13, %p8371_p10 }
 0x11f   :  { %8381 = shalt.err (!%p8378_p0)
}
 0x120   :  { %361 = dma.hbm_to_vmem [thread:$0]  %s8764_s17, 16, %s359_s18, [#allocation26]  }
 0x121   :  { %s8390_s6 = scalar_lea.vmem %s371_s22, 16  ;;  %s8394_s26 = scalar_lea.vmem %s371_s22, 32 }
 0x122   :  { %p8391_p1 = scmp.ne.s32.totalorder %s371_s22, %s8390_s6  ;;  %p8395_p2 = scmp.lt.s32.totalorder %s371_s22, %s371_s22 }
 0x123   :  { %p8396_p3 = scmp.lt.s32.totalorder %s8394_s26, %s8390_s6 }
 0x125   :  { %p8397_p4 = por %p8396_p3, %p8395_p2 }
 0x127   :  { %p8398_p5 = pnand %p8397_p4, %p8391_p1 }
 0x129   :  { %8401 = shalt.err (!%p8398_p5)
}
 0x12a   :  { %373 = dma.hbm_to_vmem [thread:$0]  %s8774_s5, 16, %s371_s22, [#allocation29]  }
 0x12b   :  { %8402 = dma.done.wait [#allocation3], 16  }
 0x12c   :  { %8403 = vsyncadd [#allocation3], 4294967280 }
 0x12d   :  { %8404 = dma.done.wait [#allocation5], 32  }
 0x12e   :  { %8405 = vsyncadd [#allocation5], 4294967264 }
 0x12f   :  { %8406 = dma.done.wait [#allocation8], 32  }
 0x130   :  { %8407 = vsyncadd [#allocation8], 4294967264 }
 0x131   :  { %8408 = dma.done.wait [#allocation11], 32  }
 0x132   :  { %8409 = vsyncadd [#allocation11], 4294967264 }
 0x133   :  { %8410 = dma.done.wait [#allocation14], 32  }
 0x134   :  { %8411 = vsyncadd [#allocation14], 4294967264 }
 0x135   :  { %8412 = dma.done.wait [#allocation17], 32  }
 0x136   :  { %8413 = vsyncadd [#allocation17], 4294967264 }
 0x137   :  { %8414 = dma.done.wait [#allocation20], 32  }
 0x138   :  { %8415 = vsyncadd [#allocation20], 4294967264 }
 0x139   :  { %8416 = dma.done.wait [#allocation23], 32  }
 0x13a   :  { %8417 = vsyncadd [#allocation23], 4294967264 }
 0x13b   :  { %8418 = dma.done.wait [#allocation26], 528  }
 0x13c   :  { %8419 = vsyncadd [#allocation26], 4294966768 }
 0x13d   :  { %8420 = dma.done.wait [#allocation29], 16  }
 0x13e   :  { %8421 = vsyncadd [#allocation29], 4294967280  ;;  %s9697_s5 = sld [smem:[#allocation40_spill]]  ;;  %v8495_v0 = vmov 0   ;;  %v436_v19 = vlaneseq  ;;  %v8496_v22 = vmov 1.0   ;;  %vm579_vm2 = vcmask 261120  }
 0x13f   :  { %s9698_s17 = sld [smem:[#allocation43_spill]]  ;;  %7900 = vset.pattern.permute.xlu0 %v8495_v0  ;;  %7901 = vset.pattern.permute.xlu1 %v8495_v0  ;;  %vm8498_vm3 = vmmov 0   ;;  %vm889_vm4 = vcmask 64512   ;;  %s8499_s10 = smov 120   ;;  %vm2247_vm5 = vcmask 195584   ;;  %vm2244_vm6 = vcmask 130048  }
 0x140   :  { %s9699_s20 = sld [smem:[#allocation44_spill]]  ;;  %v8819_v20 = vand.u32 127, %v436_v19  ;;  %s8501_s11 = smov 112   ;;  %vm2549_vm9 = vcmask 523264  }
 0x141   :  { %s9700_s28 = sld [smem:[#allocation53_spill]]  ;;  %s8502_s15 = smov 104  }
 0x142   :  { %s9701_s1 = sld [smem:[#allocation55_spill]]  ;;  %s8503_s21 = smov 16  }
 0x143   :  { %s9702_s2 = sld [smem:[#allocation47_spill]]  ;;  %s8504_s16 = smov 24  }
 0x144   :  { %v471_v1 = vld [vmem:[%s9697_s5] sm:$0xff]  ;;  %v472_v4 = vld [vmem:[%s9697_s5 + $0x8] sm:$0xff]  ;;  %s9703_s13 = sld [smem:[#allocation48_spill]] }
 0x145   :  { %v500_v2 = vld [vmem:[%s9698_s17 + $0x78] sm:$0xff]  ;;  %474 = vperm.xlu0 %7900, %v471_v1   ;;  %v499_v3 = vld [vmem:[%s9698_s17 + $0x70] sm:$0xff]  ;;  %v498_v5 = vld [vmem:[%s9698_s17 + $0x68] sm:$0xff]  ;;  %s9704_s14 = sld [smem:[#allocation57_spill]] }
 0x146   :  { %7279 = vmatprep.subr.mxu0 %v500_v2  ;;  %v497_v6 = vld [vmem:[%s9698_s17 + $0x60] sm:$0xff]  ;;  %v496_v7 = vld [vmem:[%s9698_s17 + $0x58] sm:$0xff]  ;;  %v495_v8 = vld [vmem:[%s9698_s17 + $0x50] sm:$0xff]  ;;  %s9705_s4 = sld [smem:[#allocation56_spill]] }
 0x147   :  { %7280 = vmatpush3.msra.mxu0 %v500_v2  ;;  %v494_v9 = vld [vmem:[%s9698_s17 + $0x48] sm:$0xff]  ;;  %v493_v10 = vld [vmem:[%s9698_s17 + $0x40] sm:$0xff]  ;;  %v492_v11 = vld [vmem:[%s9698_s17 + $0x38] sm:$0xff]  ;;  %s9706_s12 = sld [smem:[#allocation54_spill]] }
 0x148   :  { %7281 = vmatprep.subr.mxu0 %v499_v3  ;;  %v491_v12 = vld [vmem:[%s9698_s17 + $0x30] sm:$0xff]  ;;  %v490_v13 = vld [vmem:[%s9698_s17 + $0x28] sm:$0xff]  ;;  %v489_v14 = vld [vmem:[%s9698_s17 + $0x20] sm:$0xff]  ;;  %s9707_s30 = sld [smem:[#allocation58_spill]] }
 0x149   :  { %7282 = vmatpush3.msra.mxu0 %v499_v3  ;;  %477 = vperm.xlu0 %7900, %v472_v4   ;;  %v488_v15 = vld [vmem:[%s9698_s17 + $0x18] sm:$0xff]  ;;  %v487_v16 = vld [vmem:[%s9698_s17 + $0x10] sm:$0xff]  ;;  %v486_v17 = vld [vmem:[%s9698_s17 + $0x8] sm:$0xff]  ;;  %s9708_s27 = sld [smem:[#allocation41_spill]] }
 0x14a   :  { %7283 = vmatprep.subr.mxu0 %v498_v5  ;;  %v485_v18 = vld [vmem:[%s9698_s17] sm:$0xff]  ;;  %v628_v41 = vld [vmem:[%s9700_s28 + $0x18] sm:$0xff]  ;;  %v627_v42 = vld [vmem:[%s9700_s28 + $0x10] sm:$0xff]  ;;  %s9709_s19 = sld [smem:[#allocation59_spill]] }
 0x14b   :  { %7284 = vmatpush3.msra.mxu0 %v498_v5  ;;  %v576_v25 = vld [vmem:[%s9699_s20] sm:$0xff]  ;;  %7314 = vmatprep.subr.mxu1 %v628_v41  ;;  %v626_v43 = vld [vmem:[%s9700_s28 + $0x8] sm:$0xff]  ;;  %v720_v45 = vld [vmem:[%s9701_s1 + $0x18] sm:$0xff]  ;;  %v8497_v5 = vmov 0.0   ;;  %s9710_s0 = sld [smem:[#allocation60_spill]] }
 0x14c   :  { %7285 = vmatprep.subr.mxu0 %v497_v6  ;;  %7315 = vmatpush3.msra.mxu1 %v628_v41  ;;  %v625_v44 = vld [vmem:[%s9700_s28] sm:$0xff]  ;;  %v719_v62 = vld [vmem:[%s9701_s1 + $0x10] sm:$0xff]  ;;  %v718_v63 = vld [vmem:[%s9701_s1 + $0x8] sm:$0xff]  ;;  %s9711_s3 = sld [smem:[#allocation72_spill]] }
 0x14d   :  { %7286 = vmatpush3.msra.mxu0 %v497_v6  ;;  %7316 = vmatprep.subr.mxu1 %v627_v42  ;;  %v6868_v53 = vld [vmem:[%s9702_s2] ss:$0 sm:$0xff]  ;;  %v806_v1 = vld [vmem:[%s9704_s14 + $0x18] sm:$0xff]  ;;  %v805_v2 = vld [vmem:[%s9704_s14 + $0x10] sm:$0xff]  ;;  %s9712_s9 = sld [smem:[#allocation42_spill]] }
 0x14e   :  { %7287 = vmatprep.subr.mxu0 %v496_v7  ;;  %7317 = vmatpush3.msra.mxu1 %v627_v42  ;;  %v6869_v55 = vld [vmem:[%s9703_s13] ss:$0 sm:$0xff]  ;;  %v804_v3 = vld [vmem:[%s9704_s14 + $0x8] sm:$0xff]  ;;  %s9713_s18 = sld [smem:[#allocation49_spill]] }
 0x14f   :  { %7288 = vmatpush3.msra.mxu0 %v496_v7  ;;  %7318 = vmatprep.subr.mxu1 %v626_v43  ;;  %v717_v0 = vld [vmem:[%s9701_s1] sm:$0xff]  ;;  %s9714_s29 = sld [smem:[#allocation50_spill]] }
 0x150   :  { %7289 = vmatprep.subr.mxu0 %v495_v8  ;;  %7319 = vmatpush3.msra.mxu1 %v626_v43  ;;  %v803_v4 = vld [vmem:[%s9704_s14] sm:$0xff]  ;;  %s9715_s22 = sld [smem:[#allocation74_spill]] }
 0x151   :  { %7290 = vmatpush3.msra.mxu0 %v495_v8  ;;  %7320 = vmatprep.subr.mxu1 %v625_v44  ;;  %v6873_v8 = vld [vmem:[%s9705_s4] ss:$0 sm:$0xff]  ;;  %s9716_s24 = sld [smem:[#allocation73_spill]] }
 0x152   :  { %7291 = vmatprep.subr.mxu0 %v494_v9  ;;  %7321 = vmatpush3.msra.mxu1 %v625_v44  ;;  %s9717_s23 = sld [smem:[#allocation45_spill]] }
 0x153   :  { %7292 = vmatpush3.msra.mxu0 %v494_v9  ;;  %7325 = vmatprep.subr.mxu1 %v720_v45  ;;  %s9718_s6 = sld [smem:[#allocation61_spill]] }
 0x154   :  { %7293 = vmatprep.subr.mxu0 %v493_v10  ;;  %s9719_s26 = sld [smem:[#allocation62_spill]] }
 0x155   :  { %7294 = vmatpush3.msra.mxu0 %v493_v10  ;;  %s9720_s5 = sld [smem:[#allocation63_spill]] }
 0x156   :  { %7295 = vmatprep.subr.mxu0 %v492_v11  ;;  %s9721_s20 = sld [smem:[#allocation64_spill]] }
 0x157   :  { %7296 = vmatpush3.msra.mxu0 %v492_v11  ;;  %s9722_s28 = sld [smem:[#allocation75_spill]] }
 0x158   :  { %7297 = vmatprep.subr.mxu0 %v491_v12  ;;  %s9723_s1 = sld [smem:[#allocation51_spill]] }
 0x159   :  { %7298 = vmatpush3.msra.mxu0 %v491_v12  ;;  %s9724_s2 = sld [smem:[#allocation52_spill]] }
 0x15a   :  { %7299 = vmatprep.subr.mxu0 %v490_v13  ;;  %s9725_s13 = sld [smem:[#allocation67_spill]] }
 0x15b   :  { %7300 = vmatpush3.msra.mxu0 %v490_v13  ;;  %v6870_v13 = vld [vmem:[%s9706_s12] ss:$0 sm:$0xff]  ;;  %s9726_s14 = sld [smem:[#allocation65_spill]] }
 0x15c   :  { %7301 = vmatprep.subr.mxu0 %v489_v14  ;;  %s9727_s4 = sld [smem:[#allocation68_spill]] }
 0x15d   :  { %7302 = vmatpush3.msra.mxu0 %v489_v14  ;;  %s9728_s12 = sld [smem:[#allocation69_spill]] }
 0x15e   :  { %7303 = vmatprep.subr.mxu0 %v488_v15 }
 0x15f   :  { %7304 = vmatpush3.msra.mxu0 %v488_v15 }
 0x160   :  { %7305 = vmatprep.subr.mxu0 %v487_v16 }
 0x161   :  { %7306 = vmatpush3.msra.mxu0 %v487_v16  ;;  %v6876_v16 = vld [vmem:[%s9707_s30] ss:$0 sm:$0xff] }
 0x162   :  { %7307 = vmatprep.subr.mxu0 %v486_v17 }
 0x163   :  { %7308 = vmatpush3.msra.mxu0 %v486_v17 }
 0x164   :  { %7309 = vmatprep.subr.mxu0 %v485_v18 }
 0x165   :  { %7310 = vmatpush3.msra.mxu0 %v485_v18 }
 0x166   :  { %7357 = vmatprep.subr.mxu0 %v8497_v5 }
 0x1c0   :  { %v475_v21 = vpop.permute.xlu0 %474 }
 0x1c1   :  { %vm479_vm0 = vcmp.eq.s32.totalorder %v8819_v20, %v475_v21 }
 0x1c2   :  { %7311 = vmatprep.mubr.msk.f32.mxu0 %vm479_vm0, %v8496_v22 }
 0x1c4   :  { %v478_v23 = vpop.permute.xlu0 %477 }
 0x1c5   :  { %vm480_vm1 = vcmp.eq.s32.totalorder %v8819_v20, %v478_v23 }
 0x1c6   :  { %7312 = vmatmul.mubr.msk.f32.vlgmr.msra.gmra.mxu0 %vm480_vm1, %v8496_v22 }
 0x1c7   :  { %7359 = vmatprep.mubr.msk.f32.mxu0 %vm8498_vm3, %v8497_v5 }
 0x286   :  { %v7313_v24 = vpop.f32.mrf.mxu0 }
 0x287   :  { %v578_v28 = vadd.f32 %v7313_v24, %v576_v25  ;;  %v428_v24 = vld [vmem:[%s9708_s27] sm:$0x3] }
 0x288   :  { %v567_v26 = vpop.f32.mrf.mxu0 }
 0x289   :  { %v577_v27 = vadd.f32 %v576_v25, %v567_v26  ;;  %v583_v30 = vsel %vm579_vm2, %v578_v28, 0.0  ;;  %v429_v25 = vcvt.s32.f32 %v428_v24  ;;  %v8500_v26 = vmov 1966171168  }
 0x28b   :  { %v580_v29 = vsel %vm579_vm2, %v577_v27, 0.0 }
 0x28c   :  { %581 = vadd.xlane.f32.xlu1 %v580_v29 }
 0x290   :  { %584 = vadd.xlane.f32.xlu1 %v583_v30  ;;  %v8903_v30 = vshrl.u32 %v436_v19, 7 }
 0x292   :  { %vm469_vm12 = vcmp.le.s32.totalorder %v8819_v20, %v8903_v30 }
 0x315   :  { %v582_v31 = vpop.xlane.xlu1 %581 }
 0x316   :  { %v587_v32 = vmul.f32 0.03125, %v582_v31 }
 0x318   :  { %v589_v33 = vsub.f32 %v577_v27, %v587_v32  ;;  %v434_v27 = vunpack.c.l.s4 %v8500_v26 }
 0x319   :  { %v585_v34 = vpop.xlane.xlu1 %584 }
 0x31a   :  { %v588_v35 = vmul.f32 0.03125, %v585_v34  ;;  %v591_v36 = vmul.f32 %v589_v33, %v589_v33  ;;  %v435_v29 = vunpack.c.0.s8 %v434_v27 }
 0x31c   :  { %v590_v37 = vsub.f32 %v578_v28, %v588_v35  ;;  %v593_v38 = vsel %vm579_vm2, %v591_v36, 0.0  ;;  %v430_v28 = vsub.f32 1.0, %v429_v25  ;;  %v438_v32 = vsub.s32 %v435_v29, %v8903_v30 }
 0x31d   :  { %594 = vadd.xlane.f32.xlu0 %v593_v38  ;;  %v457_v36 = vsub.s32 0, %v8903_v30 }
 0x31e   :  { %v592_v39 = vmul.f32 %v590_v37, %v590_v37  ;;  %v431_v31 = vmul.f32 -1e+09, %v430_v28 }
 0x320   :  { %v596_v40 = vsel %vm579_vm2, %v592_v39, 0.0 }
 0x321   :  { %597 = vadd.xlane.f32.xlu1 %v596_v40 }
 0x3a6   :  { %v595_v46 = vpop.xlane.xlu0 %594 }
 0x3a7   :  { %v599_v47 = vmul.f32 0.03125, %v595_v46 }
 0x3a9   :  { %v601_v48 = vadd.f32 1e-05, %v599_v47 }
 0x3aa   :  { %v598_v49 = vpop.xlane.xlu1 %597 }
 0x3ab   :  { %7902 = vrsqrt.f32 %v601_v48  ;;  %v600_v50 = vmul.f32 0.03125, %v598_v49 }
 0x3ad   :  { %v602_v51 = vadd.f32 1e-05, %v600_v50 }
 0x3af   :  { %7904 = vrsqrt.f32 %v602_v51 }
 0x3b8   :  { %v7903_v52 = vpop.eup %7902 }
 0x3b9   :  { %v605_v54 = vmul.f32 %v7903_v52, %v589_v33  ;;  %v439_v33 = vrot.slane %v431_v31, %v438_v32 }
 0x3bb   :  { %v614_v56 = vmul.f32 %v6868_v53, %v605_v54  ;;  %v440_v34 = vcombine.high %v439_v33, %v439_v33  ;;  %v447_v35 = vrot.slane %v439_v33, %v438_v32 }
 0x3bc   :  { %v7905_v57 = vpop.eup %7904 }
 0x3bd   :  { %v8837_v58 = vadd.f32 %v6869_v55, %v614_v56  ;;  %v606_v59 = vmul.f32 %v7905_v57, %v590_v37  ;;  %v454_v37 = vrot.slane %v440_v34, %v438_v32  ;;  %v8907_v38 = vrot.slane %v447_v35, %v457_v36 }
 0x3bf   :  { %7322 = vmatprep.mubr.msk.f32.mxu1 %vm579_vm2, %v8837_v58  ;;  %v615_v60 = vmul.f32 %v6868_v53, %v606_v59  ;;  %v8909_v42 = vrot.slane %v454_v37, %v457_v36 }
 0x3c1   :  { %v8841_v61 = vadd.f32 %v6869_v55, %v615_v60 }
 0x3c3   :  { %7323 = vmatmul.mubr.msk.f32.vlgmr.msra.gmra.mxu1 %vm579_vm2, %v8841_v61 }
 0x3c4   :  { %7326 = vmatpush3.msra.mxu1 %v720_v45  ;;  %7333 = vmatprep.mubr.msk.f32.mxu1 %vm579_vm2, %v8837_v58 }
 0x3c5   :  { %7327 = vmatprep.subr.mxu1 %v719_v62 }
 0x3c6   :  { %7328 = vmatpush3.msra.mxu1 %v719_v62 }
 0x3c7   :  { %7329 = vmatprep.subr.mxu1 %v718_v63 }
 0x3c8   :  { %7330 = vmatpush3.msra.mxu1 %v718_v63 }
 0x3c9   :  { %7331 = vmatprep.subr.mxu1 %v717_v0 }
 0x3ca   :  { %7332 = vmatpush3.msra.mxu1 %v717_v0 }
 0x3cb   :  { %7334 = vmatmul.mubr.msk.f32.vlgmr.msra.gmra.mxu1 %vm579_vm2, %v8841_v61  ;;  %7336 = vmatprep.subr.mxu1 %v806_v1 }
 0x3cc   :  { %7337 = vmatpush3.msra.mxu1 %v806_v1  ;;  %7344 = vmatprep.mubr.msk.f32.mxu1 %vm579_vm2, %v8837_v58 }
 0x3cd   :  { %7338 = vmatprep.subr.mxu1 %v805_v2 }
 0x3ce   :  { %7339 = vmatpush3.msra.mxu1 %v805_v2 }
 0x3cf   :  { %7340 = vmatprep.subr.mxu1 %v804_v3 }
 0x3d0   :  { %7341 = vmatpush3.msra.mxu1 %v804_v3 }
 0x3d1   :  { %7342 = vmatprep.subr.mxu1 %v803_v4 }
 0x3d2   :  { %7343 = vmatpush3.msra.mxu1 %v803_v4 }
 0x3d3   :  { %7345 = vmatmul.mubr.msk.f32.vlgmr.msra.gmra.mxu1 %vm579_vm2, %v8841_v61  ;;  %7347 = vmatprep.subr.mxu1 %v8497_v5 }
 0x3d4   :  { %7349 = vmatprep.mubr.msk.f32.mxu1 %vm8498_vm3, %v8497_v5 }
 0x483   :  { %v7324_v6 = vpop.f32.mrf.mxu1 }
 0x484   :  { %v8886_v17 = vadd.f32 %v7324_v6, %v6870_v13 }
 0x485   :  { %v708_v7 = vpop.f32.mrf.mxu1 }
 0x486   :  { %v8876_v14 = vadd.f32 %v6870_v13, %v708_v7 }
 0x48b   :  { %v7335_v9 = vpop.f32.mrf.mxu1 }
 0x48c   :  { %v8867_v10 = vadd.f32 %v7335_v9, %v6873_v8 }
 0x48d   :  { %v794_v11 = vpop.f32.mrf.mxu1 }
 0x48e   :  { %v8869_v12 = vadd.f32 %v6873_v8, %v794_v11  ;;  %1294 = vrot.lane.b32.xlu0 %v8867_v10, %s8499_s10 }
 0x490   :  { %7348 = vmatpush3.xpose.msk.msra.mxu1 %vm889_vm4, %v8869_v12 }
 0x491   :  { %7352 = vmatprep.subr.mxu1 %v8497_v5 }
 0x493   :  { %v7346_v15 = vpop.f32.mrf.mxu1  ;;  %7350 = vmatmul.mubr.msk.f32.vlgmr.msra.gmra.mxu1 %vm889_vm4, %v8876_v14 }
 0x494   :  { %7353 = vmatpush3.xpose.msk.msra.mxu1 %vm889_vm4, %v8867_v10  ;;  %7354 = vmatprep.mubr.msk.f32.mxu1 %vm8498_vm3, %v8497_v5  ;;  %v8889_v21 = vadd.f32 %v7346_v15, %v6876_v16 }
 0x495   :  { %v880_v18 = vpop.f32.mrf.mxu1  ;;  %7362 = vmatprep.subr.mxu1 %v8497_v5 }
 0x496   :  { %v8891_v23 = vadd.f32 %v6876_v16, %v880_v18 }
 0x497   :  { %7355 = vmatmul.mubr.msk.f32.vlgmr.msra.gmra.mxu1 %vm889_vm4, %v8886_v17 }
 0x498   :  { %7358 = vmatpush3.msra.mxu0 %v8891_v23  ;;  %7363 = vmatpush3.msra.mxu1 %v8889_v21 }
 0x499   :  { %7367 = vmatprep.subr.mxu0 %v8497_v5  ;;  %7364 = vmatprep.mubr.msk.f32.mxu1 %vm8498_vm3, %v8497_v5 }
 0x49a   :  { %7372 = vmatprep.subr.mxu1 %v8497_v5 }
 0x500   :  { %v1295_v6 = vpop.permute.xlu0 %1294 }
 0x553   :  { %v962_v39 = vpop.f32.mrf.mxu1 }
 0x554   :  { %v1042_v40 = vmul.f32 0.35355338, %v962_v39 }
 0x555   :  { %v7351_v41 = vpop.f32.mrf.mxu1 }
 0x556   :  { %v1044_v43 = vadd.f32 %v1042_v40, %v8907_v38 }
 0x557   :  { %v1038_v19 = vpop.f32.mrf.mxu1 }
 0x558   :  { %v1043_v44 = vmul.f32 0.35355338, %v1038_v19  ;;  %v1046_v45 = vsel %vm889_vm4, %v1044_v43, -inf }
 0x559   :  { %v7356_v46 = vpop.f32.mrf.mxu1  ;;  %1047 = vmax.xlane.f32.xlu1 %v1046_v45 }
 0x55a   :  { %v1045_v47 = vadd.f32 %v1043_v44, %v8909_v42 }
 0x55c   :  { %v1049_v48 = vsel %vm889_vm4, %v1045_v47, -inf }
 0x55d   :  { %1050 = vmax.xlane.f32.xlu1 %v1049_v48 }
 0x56e   :  { %1216 = vrot.lane.b32.xlu1 %v8869_v12, %s8499_s10 }
 0x572   :  { %1214 = vrot.lane.b32.xlu1 %v8876_v14, %s8499_s10 }
 0x5e2   :  { %v1048_v49 = vpop.xlane.xlu1 %1047 }
 0x5e3   :  { %v1052_v50 = vsub.f32 %v1044_v43, %v1048_v49 }
 0x5e5   :  { %v1054_v51 = vmul.f32 1.442695, %v1052_v50 }
 0x5e6   :  { %v1051_v52 = vpop.xlane.xlu1 %1050 }
 0x5e7   :  { %7906 = vpow2.f32 %v1054_v51  ;;  %v1053_v53 = vsub.f32 %v1045_v47, %v1051_v52 }
 0x5e9   :  { %v1056_v54 = vmul.f32 1.442695, %v1053_v53 }
 0x5ea   :  { %v1217_v60 = vpop.permute.xlu1 %1216 }
 0x5eb   :  { %7908 = vpow2.f32 %v1056_v54 }
 0x5ee   :  { %v1215_v62 = vpop.permute.xlu1 %1214 }
 0x5f4   :  { %v7907_v55 = vpop.eup %7906 }
 0x5f5   :  { %v1058_v56 = vsel %vm889_vm4, %v7907_v55, 0.0 }
 0x5f6   :  { %1059 = vadd.xlane.f32.xlu1 %v1058_v56 }
 0x5f8   :  { %v7909_v57 = vpop.eup %7908 }
 0x5f9   :  { %v1061_v59 = vsel %vm889_vm4, %v7909_v57, 0.0 }
 0x5fa   :  { %1062 = vadd.xlane.f32.xlu1 %v1061_v59 }
 0x60b   :  { %1292 = vrot.lane.b32.xlu1 %v8886_v17, %s8499_s10 }
 0x67f   :  { %v1060_v63 = vpop.xlane.xlu1 %1059 }
 0x680   :  { %7910 = vrcp.f32 %v1060_v63 }
 0x683   :  { %v1063_v0 = vpop.xlane.xlu1 %1062 }
 0x684   :  { %7912 = vrcp.f32 %v1063_v0 }
 0x687   :  { %v1293_v7 = vpop.permute.xlu1 %1292 }
 0x68d   :  { %v7911_v1 = vpop.eup %7910 }
 0x68e   :  { %v1066_v2 = vmul.f32 %v7911_v1, %v7907_v55 }
 0x690   :  { %7360 = vmatmul.mubr.msk.f32.vlgmr.msra.gmra.mxu0 %vm889_vm4, %v1066_v2 }
 0x691   :  { %v7913_v3 = vpop.eup %7912  ;;  %7368 = vmatpush3.xpose.msk.msra.mxu0 %vm889_vm4, %v1217_v60  ;;  %7369 = vmatprep.mubr.msk.f32.mxu0 %vm8498_vm3, %v8497_v5 }
 0x692   :  { %v1067_v4 = vmul.f32 %v7913_v3, %v7909_v57  ;;  %7377 = vmatprep.subr.mxu0 %v8497_v5 }
 0x694   :  { %7365 = vmatmul.mubr.msk.f32.vlgmr.msra.gmra.mxu1 %vm889_vm4, %v1067_v4  ;;  %7370 = vmatmul.mubr.msk.f32.vlgmr.msra.gmra.mxu0 %vm889_vm4, %v1215_v62 }
 0x695   :  { %7373 = vmatpush3.xpose.msk.msra.mxu1 %vm889_vm4, %v1295_v6  ;;  %7374 = vmatprep.mubr.msk.f32.mxu1 %vm8498_vm3, %v8497_v5 }
 0x696   :  { %7382 = vmatprep.subr.mxu1 %v8497_v5  ;;  %7379 = vmatprep.mubr.msk.f32.mxu0 %vm8498_vm3, %v8497_v5 }
 0x698   :  { %7375 = vmatmul.mubr.msk.f32.vlgmr.msra.gmra.mxu1 %vm889_vm4, %v1293_v7 }
 0x699   :  { %7384 = vmatprep.mubr.msk.f32.mxu1 %vm8498_vm3, %v8497_v5 }
 0x750   :  { %v8939_v8 = vpop.f32.mrf.mxu0 }
 0x752   :  { %v7361_v9 = vpop.f32.mrf.mxu0 }
 0x754   :  { %v8941_v11 = vpop.f32.mrf.mxu1  ;;  %v1288_v13 = vpop.f32.mrf.mxu0 }
 0x755   :  { %v1370_v15 = vmul.f32 0.35355338, %v1288_v13 }
 0x756   :  { %v7366_v16 = vpop.f32.mrf.mxu1  ;;  %v7371_v18 = vpop.f32.mrf.mxu0 }
 0x757   :  { %v1372_v24 = vadd.f32 %v1370_v15, %v8907_v38 }
 0x758   :  { %v1366_v25 = vpop.f32.mrf.mxu1 }
 0x759   :  { %v1371_v26 = vmul.f32 0.35355338, %v1366_v25  ;;  %v1374_v27 = vsel %vm889_vm4, %v1372_v24, -inf }
 0x75a   :  { %1375 = vmax.xlane.f32.xlu1 %v1374_v27  ;;  %v7376_v28 = vpop.f32.mrf.mxu1 }
 0x75b   :  { %v1373_v29 = vadd.f32 %v1371_v26, %v8909_v42 }
 0x75d   :  { %v1377_v31 = vsel %vm889_vm4, %v1373_v29, -inf }
 0x75e   :  { %1378 = vmax.xlane.f32.xlu0 %v1377_v31 }
 0x76b   :  { %1397 = vrot.lane.b32.xlu1 %v8891_v23, %s8499_s10 }
 0x76f   :  { %1552 = vrot.lane.b32.xlu1 %v8869_v12, %s8501_s11 }
 0x773   :  { %1630 = vrot.lane.b32.xlu1 %v8867_v10, %s8501_s11 }
 0x774   :  { %1474 = vrot.lane.b32.xlu0 %v8889_v21, %s8499_s10 }
 0x7e3   :  { %v1376_v32 = vpop.xlane.xlu1 %1375 }
 0x7e4   :  { %v1380_v33 = vsub.f32 %v1372_v24, %v1376_v32 }
 0x7e6   :  { %v1382_v34 = vmul.f32 1.442695, %v1380_v33 }
 0x7e7   :  { %v1379_v35 = vpop.xlane.xlu0 %1378  ;;  %v1398_v36 = vpop.permute.xlu1 %1397 }
 0x7e8   :  { %7914 = vpow2.f32 %v1382_v34  ;;  %v1381_v37 = vsub.f32 %v1373_v29, %v1379_v35  ;;  %7378 = vmatpush3.msra.mxu0 %v1398_v36 }
 0x7e9   :  { %7387 = vmatprep.subr.mxu0 %v8497_v5 }
 0x7ea   :  { %v1384_v39 = vmul.f32 1.442695, %v1381_v37 }
 0x7eb   :  { %v1475_v40 = vpop.permute.xlu0 %1474  ;;  %v1553_v45 = vpop.permute.xlu1 %1552 }
 0x7ec   :  { %7916 = vpow2.f32 %v1384_v39  ;;  %7383 = vmatpush3.msra.mxu1 %v1475_v40 }
 0x7ed   :  { %7392 = vmatprep.subr.mxu1 %v8497_v5 }
 0x7ef   :  { %v1631_v46 = vpop.permute.xlu1 %1630 }
 0x7f5   :  { %v7915_v41 = vpop.eup %7914 }
 0x7f6   :  { %v1386_v43 = vsel %vm889_vm4, %v7915_v41, 0.0 }
 0x7f7   :  { %1387 = vadd.xlane.f32.xlu1 %v1386_v43 }
 0x7f9   :  { %v7917_v19 = vpop.eup %7916 }
 0x7fa   :  { %v1389_v44 = vsel %vm889_vm4, %v7917_v19, 0.0 }
 0x7fb   :  { %1390 = vadd.xlane.f32.xlu0 %v1389_v44 }
 0x808   :  { %1628 = vrot.lane.b32.xlu1 %v8886_v17, %s8501_s11 }
 0x811   :  { %1550 = vrot.lane.b32.xlu0 %v8876_v14, %s8501_s11 }
 0x880   :  { %v1388_v47 = vpop.xlane.xlu1 %1387 }
 0x881   :  { %7918 = vrcp.f32 %v1388_v47 }
 0x884   :  { %v1391_v48 = vpop.xlane.xlu0 %1390  ;;  %v1629_v54 = vpop.permute.xlu1 %1628 }
 0x885   :  { %7920 = vrcp.f32 %v1391_v48 }
 0x888   :  { %v1551_v53 = vpop.permute.xlu0 %1550 }
 0x88e   :  { %v7919_v49 = vpop.eup %7918 }
 0x88f   :  { %v1394_v50 = vmul.f32 %v7919_v49, %v7915_v41 }
 0x891   :  { %7380 = vmatmul.mubr.msk.f32.vlgmr.msra.gmra.mxu0 %vm889_vm4, %v1394_v50 }
 0x892   :  { %v7921_v51 = vpop.eup %7920  ;;  %7388 = vmatpush3.xpose.msk.msra.mxu0 %vm889_vm4, %v1553_v45  ;;  %7389 = vmatprep.mubr.msk.f32.mxu0 %vm8498_vm3, %v8497_v5 }
 0x893   :  { %v1395_v52 = vmul.f32 %v7921_v51, %v7917_v19  ;;  %7397 = vmatprep.subr.mxu0 %v8497_v5 }
 0x895   :  { %7385 = vmatmul.mubr.msk.f32.vlgmr.msra.gmra.mxu1 %vm889_vm4, %v1395_v52  ;;  %7390 = vmatmul.mubr.msk.f32.vlgmr.msra.gmra.mxu0 %vm889_vm4, %v1551_v53 }
 0x896   :  { %7393 = vmatpush3.xpose.msk.msra.mxu1 %vm889_vm4, %v1631_v46  ;;  %7394 = vmatprep.mubr.msk.f32.mxu1 %vm8498_vm3, %v8497_v5 }
 0x897   :  { %7402 = vmatprep.subr.mxu1 %v8497_v5  ;;  %7399 = vmatprep.mubr.msk.f32.mxu0 %vm8498_vm3, %v8497_v5 }
 0x899   :  { %7395 = vmatmul.mubr.msk.f32.vlgmr.msra.gmra.mxu1 %vm889_vm4, %v1629_v54 }
 0x89a   :  { %7404 = vmatprep.mubr.msk.f32.mxu1 %vm8498_vm3, %v8497_v5 }
 0x951   :  { %v8979_v55 = vpop.f32.mrf.mxu0 }
 0x953   :  { %v7381_v56 = vpop.f32.mrf.mxu0 }
 0x955   :  { %v8981_v57 = vpop.f32.mrf.mxu1  ;;  %v1624_v59 = vpop.f32.mrf.mxu0 }
 0x956   :  { %v1706_v60 = vmul.f32 0.35355338, %v1624_v59 }
 0x957   :  { %v7386_v62 = vpop.f32.mrf.mxu1  ;;  %v7391_v63 = vpop.f32.mrf.mxu0 }
 0x958   :  { %v1708_v0 = vadd.f32 %v1706_v60, %v8907_v38 }
 0x959   :  { %v1702_v1 = vpop.f32.mrf.mxu1 }
 0x95a   :  { %v1707_v2 = vmul.f32 0.35355338, %v1702_v1  ;;  %v1710_v3 = vsel %vm889_vm4, %v1708_v0, -inf }
 0x95b   :  { %1711 = vmax.xlane.f32.xlu0 %v1710_v3  ;;  %v7396_v4 = vpop.f32.mrf.mxu1 }
 0x95c   :  { %v1709_v6 = vadd.f32 %v1707_v2, %v8909_v42 }
 0x95e   :  { %v1713_v7 = vsel %vm889_vm4, %v1709_v6, -inf }
 0x95f   :  { %1714 = vmax.xlane.f32.xlu1 %v1713_v7 }
 0x970   :  { %1732 = vrot.lane.b32.xlu1 %v8891_v23, %s8501_s11 }
 0x971   :  { %1808 = vrot.lane.b32.xlu0 %v8889_v21, %s8501_s11 }
 0x974   :  { %1886 = vrot.lane.b32.xlu1 %v8869_v12, %s8502_s15 }
 0x978   :  { %1964 = vrot.lane.b32.xlu1 %v8867_v10, %s8502_s15 }
 0x97c   :  { %1962 = vrot.lane.b32.xlu1 %v8886_v17, %s8502_s15 }
 0x9e4   :  { %v1712_v9 = vpop.xlane.xlu0 %1711 }
 0x9e5   :  { %v1716_v13 = vsub.f32 %v1708_v0, %v1712_v9 }
 0x9e7   :  { %v1718_v15 = vmul.f32 1.442695, %v1716_v13  ;;  %v2253_v13 = vld [vmem:[%s9709_s19 + $0x18] sm:$0xff] }
 0x9e8   :  { %v1809_v16 = vpop.permute.xlu0 %1808  ;;  %v1715_v18 = vpop.xlane.xlu1 %1714 }
 0x9e9   :  { %7922 = vpow2.f32 %v1718_v15  ;;  %v1717_v24 = vsub.f32 %v1709_v6, %v1715_v18  ;;  %7403 = vmatpush3.msra.mxu1 %v1809_v16  ;;  %v2251_v15 = vld [vmem:[%s9709_s19 + $0x8] sm:$0xff]  ;;  %v2250_v16 = vld [vmem:[%s9709_s19] sm:$0xff] }
 0x9ea   :  { %7412 = vmatprep.subr.mxu1 %v8497_v5 }
 0x9eb   :  { %v1720_v25 = vmul.f32 1.442695, %v1717_v24 }
 0x9ec   :  { %v1733_v26 = vpop.permute.xlu1 %1732 }
 0x9ed   :  { %7924 = vpow2.f32 %v1720_v25  ;;  %7398 = vmatpush3.msra.mxu0 %v1733_v26 }
 0x9ee   :  { %7407 = vmatprep.subr.mxu0 %v8497_v5 }
 0x9f0   :  { %v1887_v31 = vpop.permute.xlu1 %1886 }
 0x9f4   :  { %v1965_v35 = vpop.permute.xlu1 %1964 }
 0x9f6   :  { %v7923_v10 = vpop.eup %7922 }
 0x9f7   :  { %v1722_v12 = vsel %vm889_vm4, %v7923_v10, 0.0 }
 0x9f8   :  { %1723 = vadd.xlane.f32.xlu0 %v1722_v12  ;;  %v1963_v37 = vpop.permute.xlu1 %1962 }
 0x9fa   :  { %v7925_v17 = vpop.eup %7924 }
 0x9fb   :  { %v1725_v27 = vsel %vm889_vm4, %v7925_v17, 0.0 }
 0x9fc   :  { %1726 = vadd.xlane.f32.xlu0 %v1725_v27 }
 0xa12   :  { %1884 = vrot.lane.b32.xlu0 %v8876_v14, %s8502_s15 }
 0xa81   :  { %v1724_v28 = vpop.xlane.xlu0 %1723 }
 0xa82   :  { %7926 = vrcp.f32 %v1724_v28 }
 0xa85   :  { %v1727_v29 = vpop.xlane.xlu0 %1726 }
 0xa86   :  { %7928 = vrcp.f32 %v1727_v29 }
 0xa89   :  { %v1885_v14 = vpop.permute.xlu0 %1884 }
 0xa8f   :  { %v7927_v32 = vpop.eup %7926 }
 0xa90   :  { %v1730_v33 = vmul.f32 %v7927_v32, %v7923_v10 }
 0xa92   :  { %7400 = vmatmul.mubr.msk.f32.vlgmr.msra.gmra.mxu0 %vm889_vm4, %v1730_v33 }
 0xa93   :  { %v7929_v34 = vpop.eup %7928  ;;  %7408 = vmatpush3.xpose.msk.msra.mxu0 %vm889_vm4, %v1887_v31  ;;  %7409 = vmatprep.mubr.msk.f32.mxu0 %vm8498_vm3, %v8497_v5 }
 0xa94   :  { %v1731_v36 = vmul.f32 %v7929_v34, %v7925_v17  ;;  %7417 = vmatprep.subr.mxu0 %v8497_v5 }
 0xa96   :  { %7405 = vmatmul.mubr.msk.f32.vlgmr.msra.gmra.mxu1 %vm889_vm4, %v1731_v36  ;;  %7410 = vmatmul.mubr.msk.f32.vlgmr.msra.gmra.mxu0 %vm889_vm4, %v1885_v14 }
 0xa97   :  { %7413 = vmatpush3.xpose.msk.msra.mxu1 %vm889_vm4, %v1965_v35  ;;  %7414 = vmatprep.mubr.msk.f32.mxu1 %vm8498_vm3, %v8497_v5 }
 0xa98   :  { %7422 = vmatprep.subr.mxu1 %v8497_v5  ;;  %7419 = vmatprep.mubr.msk.f32.mxu0 %vm8498_vm3, %v8497_v5 }
 0xa9a   :  { %7415 = vmatmul.mubr.msk.f32.vlgmr.msra.gmra.mxu1 %vm889_vm4, %v1963_v37 }
 0xa9b   :  { %7424 = vmatprep.mubr.msk.f32.mxu1 %vm8498_vm3, %v8497_v5 }
 0xb52   :  { %v1804_v39 = vpop.f32.mrf.mxu0 }
 0xb54   :  { %v7401_v40 = vpop.f32.mrf.mxu0 }
 0xb56   :  { %v1880_v41 = vpop.f32.mrf.mxu1  ;;  %v1958_v43 = vpop.f32.mrf.mxu0 }
 0xb57   :  { %v2040_v19 = vmul.f32 0.35355338, %v1958_v43 }
 0xb58   :  { %v7406_v44 = vpop.f32.mrf.mxu1  ;;  %v7411_v45 = vpop.f32.mrf.mxu0 }
 0xb59   :  { %v2042_v46 = vadd.f32 %v2040_v19, %v8907_v38 }
 0xb5a   :  { %v2036_v47 = vpop.f32.mrf.mxu1 }
 0xb5b   :  { %v2041_v48 = vmul.f32 0.35355338, %v2036_v47  ;;  %v2044_v49 = vsel %vm889_vm4, %v2042_v46, -inf }
 0xb5c   :  { %2045 = vmax.xlane.f32.xlu0 %v2044_v49  ;;  %v7416_v50 = vpop.f32.mrf.mxu1 }
 0xb5d   :  { %v2043_v51 = vadd.f32 %v2041_v48, %v8909_v42 }
 0xb5f   :  { %v2047_v52 = vsel %vm889_vm4, %v2043_v51, -inf }
 0xb60   :  { %2048 = vmax.xlane.f32.xlu1 %v2047_v52  ;;  %v2391_v52 = vld [vmem:[%s9711_s3 + $0x18] sm:$0xff] }
 0xb71   :  { %2066 = vrot.lane.b32.xlu1 %v8891_v23, %s8502_s15 }
 0xb75   :  { %2220 = vrot.lane.b32.xlu1 %v8979_v55, %s8484_s7 }
 0xb79   :  { %2222 = vrot.lane.b32.xlu1 %v8981_v57, %s8484_s7 }
 0xb7d   :  { %2230 = vrot.lane.b32.xlu1 %v1880_v41, %s8503_s21 }
 0xbe5   :  { %v2046_v53 = vpop.xlane.xlu0 %2045 }
 0xbe6   :  { %v2050_v54 = vsub.f32 %v2042_v46, %v2046_v53  ;;  %v2390_v53 = vld [vmem:[%s9711_s3 + $0x10] sm:$0xff] }
 0xbe8   :  { %v2052_v56 = vmul.f32 1.442695, %v2050_v54  ;;  %v2678_v54 = vld [vmem:[%s9712_s9 + $0x8] sm:$0xff] }
 0xbe9   :  { %v2049_v59 = vpop.xlane.xlu1 %2048 }
 0xbea   :  { %7930 = vpow2.f32 %v2052_v56  ;;  %v2051_v60 = vsub.f32 %v2043_v51, %v2049_v59  ;;  %v2389_v56 = vld [vmem:[%s9711_s3 + $0x8] sm:$0xff]  ;;  %v2388_v59 = vld [vmem:[%s9711_s3] sm:$0xff] }
 0xbec   :  { %v2054_v62 = vmul.f32 1.442695, %v2051_v60  ;;  %v2677_v60 = vld [vmem:[%s9712_s9] sm:$0xff] }
 0xbed   :  { %v2067_v63 = vpop.permute.xlu1 %2066 }
 0xbee   :  { %7932 = vpow2.f32 %v2054_v62  ;;  %7418 = vmatpush3.msra.mxu0 %v2067_v63 }
 0xbf1   :  { %v2221_v10 = vpop.permute.xlu1 %2220 }
 0xbf2   :  { %v2242_v27 = vsel %vm889_vm4, %v8939_v8, %v2221_v10  ;;  %v6903_v8 = vld [vmem:[%s9710_s0] ss:$0 sm:$0xff]  ;;  %v2536_v10 = vld [vmem:[%s9715_s22 + $0x10] sm:$0xff] }
 0xbf5   :  { %v2223_v12 = vpop.permute.xlu1 %2222 }
 0xbf6   :  { %v2243_v33 = vsel %vm889_vm4, %v8941_v11, %v2223_v12  ;;  %v2535_v12 = vld [vmem:[%s9715_s22 + $0x8] sm:$0xff] }
 0xbf7   :  { %v7931_v23 = vpop.eup %7930 }
 0xbf8   :  { %v2056_v0 = vsel %vm889_vm4, %v7931_v23, 0.0 }
 0xbf9   :  { %2057 = vadd.xlane.f32.xlu0 %v2056_v0  ;;  %v2231_v28 = vpop.permute.xlu1 %2230 }
 0xbfa   :  { %v2246_v34 = vsel %vm2244_vm6, %v2243_v33, %v2231_v28  ;;  %v6908_v28 = vld [vmem:[%s9716_s24] ss:$0 sm:$0xff] }
 0xbfb   :  { %v7933_v55 = vpop.eup %7932 }
 0xbfc   :  { %v2059_v57 = vsel %vm889_vm4, %v7933_v55, 0.0 }
 0xbfd   :  { %2060 = vadd.xlane.f32.xlu0 %v2059_v57 }
 0xc13   :  { %2142 = vrot.lane.b32.xlu0 %v8889_v21, %s8502_s15  ;;  %v2252_v21 = vld [vmem:[%s9709_s19 + $0x10] sm:$0xff] }
 0xc17   :  { %2228 = vrot.lane.b32.xlu0 %v1804_v39, %s8503_s21 }
 0xc82   :  { %v2058_v1 = vpop.xlane.xlu0 %2057 }
 0xc83   :  { %7934 = vrcp.f32 %v2058_v1 }
 0xc86   :  { %v2061_v2 = vpop.xlane.xlu0 %2060 }
 0xc87   :  { %7936 = vrcp.f32 %v2061_v2  ;;  %v6906_v2 = vld [vmem:[%s9713_s18] ss:$0 sm:$0xff] }
 0xc8a   :  { %v2143_v3 = vpop.permute.xlu0 %2142 }
 0xc8b   :  { %7423 = vmatpush3.msra.mxu1 %v2143_v3 }
 0xc8c   :  { %7427 = vmatprep.subr.mxu1 %v2253_v13 }
 0xc8e   :  { %v2229_v17 = vpop.permute.xlu0 %2228 }
 0xc8f   :  { %v2245_v29 = vsel %vm2244_vm6, %v2242_v27, %v2229_v17  ;;  %v2534_v17 = vld [vmem:[%s9715_s22] sm:$0xff]  ;;  %v9088_v27 = vld [vmem:[%s9698_s17 + $0x78] sm:$0xff] }
 0xc90   :  { %v7935_v4 = vpop.eup %7934 }
 0xc91   :  { %v2064_v6 = vmul.f32 %v7935_v4, %v7931_v23  ;;  %v6907_v4 = vld [vmem:[%s9714_s29] ss:$0 sm:$0xff] }
 0xc93   :  { %7420 = vmatmul.mubr.msk.f32.vlgmr.msra.gmra.mxu0 %vm889_vm4, %v2064_v6 }
 0xc94   :  { %v7937_v7 = vpop.eup %7936 }
 0xc95   :  { %v2065_v9 = vmul.f32 %v7937_v7, %v7933_v55 }
 0xc97   :  { %7425 = vmatmul.mubr.msk.f32.vlgmr.msra.gmra.mxu1 %vm889_vm4, %v2065_v9 }
 0xc98   :  { %7428 = vmatpush3.msra.mxu1 %v2253_v13 }
 0xc99   :  { %7429 = vmatprep.subr.mxu1 %v2252_v21 }
 0xc9a   :  { %7430 = vmatpush3.msra.mxu1 %v2252_v21 }
 0xc9b   :  { %7431 = vmatprep.subr.mxu1 %v2251_v15 }
 0xc9c   :  { %7432 = vmatpush3.msra.mxu1 %v2251_v15 }
 0xc9d   :  { %7433 = vmatprep.subr.mxu1 %v2250_v16 }
 0xc9e   :  { %7434 = vmatpush3.msra.mxu1 %v2250_v16  ;;  %v2541_v16 = vld [vmem:[%s9715_s22 + $0x38] sm:$0xff] }
 0xc9f   :  { %7438 = vmatprep.subr.mxu1 %v2391_v52  ;;  %7449 = vmatprep.subr.mxu0 %v2541_v16 }
 0xca0   :  { %7450 = vmatpush3.msra.mxu0 %v2541_v16 }
 0xd53   :  { %v2138_v18 = vpop.f32.mrf.mxu0 }
 0xd54   :  { %2236 = vrot.lane.b32.xlu0 %v2138_v18, %s8504_s16  ;;  %v2540_v18 = vld [vmem:[%s9715_s22 + $0x30] sm:$0xff] }
 0xd55   :  { %v7421_v24 = vpop.f32.mrf.mxu0  ;;  %7451 = vmatprep.subr.mxu0 %v2540_v18 }
 0xd56   :  { %7452 = vmatpush3.msra.mxu0 %v2540_v18  ;;  %v2539_v24 = vld [vmem:[%s9715_s22 + $0x28] sm:$0xff] }
 0xd57   :  { %v2214_v25 = vpop.f32.mrf.mxu1  ;;  %7453 = vmatprep.subr.mxu0 %v2539_v24 }
 0xd58   :  { %2238 = vrot.lane.b32.xlu1 %v2214_v25, %s8504_s16  ;;  %7454 = vmatpush3.msra.mxu0 %v2539_v24  ;;  %v2538_v25 = vld [vmem:[%s9715_s22 + $0x20] sm:$0xff] }
 0xd59   :  { %v7426_v26 = vpop.f32.mrf.mxu1  ;;  %7455 = vmatprep.subr.mxu0 %v2538_v25 }
 0xd5a   :  { %7456 = vmatpush3.msra.mxu0 %v2538_v25  ;;  %v2537_v26 = vld [vmem:[%s9715_s22 + $0x18] sm:$0xff] }
 0xd5b   :  { %7457 = vmatprep.subr.mxu0 %v2537_v26 }
 0xd5c   :  { %7458 = vmatpush3.msra.mxu0 %v2537_v26 }
 0xd5d   :  { %7459 = vmatprep.subr.mxu0 %v2536_v10 }
 0xd5e   :  { %7460 = vmatpush3.msra.mxu0 %v2536_v10 }
 0xd5f   :  { %7461 = vmatprep.subr.mxu0 %v2535_v12 }
 0xd60   :  { %7462 = vmatpush3.msra.mxu0 %v2535_v12 }
 0xd61   :  { %7463 = vmatprep.subr.mxu0 %v2534_v17 }
 0xd62   :  { %7464 = vmatpush3.msra.mxu0 %v2534_v17 }
 0xd63   :  { %7468 = vmatprep.subr.mxu0 %v9088_v27 }
 0xdc6   :  { %v2237_v31 = vpop.permute.xlu0 %2236 }
 0xdc7   :  { %v2248_v32 = vsel %vm2247_vm5, %v2245_v29, %v2237_v31 }
 0xdc8   :  { %7435 = vmatprep.mubr.msk.f32.mxu1 %vm579_vm2, %v2248_v32 }
 0xdca   :  { %v2239_v35 = vpop.permute.xlu1 %2238 }
 0xdcb   :  { %v2249_v36 = vsel %vm2247_vm5, %v2246_v34, %v2239_v35 }
 0xdcc   :  { %7436 = vmatmul.mubr.msk.f32.vlgmr.msra.gmra.mxu1 %vm579_vm2, %v2249_v36 }
 0xdcd   :  { %7439 = vmatpush3.msra.mxu1 %v2391_v52 }
 0xdce   :  { %7440 = vmatprep.subr.mxu1 %v2390_v53 }
 0xdcf   :  { %7441 = vmatpush3.msra.mxu1 %v2390_v53 }
 0xdd0   :  { %7442 = vmatprep.subr.mxu1 %v2389_v56 }
 0xdd1   :  { %7443 = vmatpush3.msra.mxu1 %v2389_v56 }
 0xdd2   :  { %7444 = vmatprep.subr.mxu1 %v2388_v59 }
 0xdd3   :  { %7445 = vmatpush3.msra.mxu1 %v2388_v59 }
 0xdd4   :  { %7536 = vmatprep.subr.mxu1 %v8497_v5 }
 0xe8c   :  { %v7437_v14 = vpop.f32.mrf.mxu1 }
 0xe8d   :  { %v2339_v37 = vadd.f32 %v7437_v14, %v6903_v8 }
 0xe8e   :  { %v2333_v39 = vpop.f32.mrf.mxu1 }
 0xe8f   :  { %v2334_v40 = vadd.f32 %v6903_v8, %v2333_v39  ;;  %v2343_v41 = vadd.f32 %v2339_v37, %v8841_v61 }
 0xe91   :  { %v2347_v43 = vsel %vm579_vm2, %v2343_v41, 0.0  ;;  %v2342_v19 = vadd.f32 %v2334_v40, %v8837_v58 }
 0xe92   :  { %2348 = vadd.xlane.f32.xlu1 %v2347_v43 }
 0xe93   :  { %v2344_v11 = vsel %vm579_vm2, %v2342_v19, 0.0 }
 0xe94   :  { %2345 = vadd.xlane.f32.xlu0 %v2344_v11 }
 0xea3   :  { %2680 = vperm.xlu1 %7901, %v2677_v60  }
 0xf1b   :  { %v2349_v44 = vpop.xlane.xlu1 %2348 }
 0xf1c   :  { %v2351_v45 = vmul.f32 0.03125, %v2349_v44 }
 0xf1d   :  { %v2346_v46 = vpop.xlane.xlu0 %2345 }
 0xf1e   :  { %v2350_v47 = vmul.f32 0.03125, %v2346_v46  ;;  %v2353_v48 = vsub.f32 %v2343_v41, %v2351_v45 }
 0xf1f   :  { %v2681_v10 = vpop.permute.xlu1 %2680 }
 0xf20   :  { %v2352_v49 = vsub.f32 %v2342_v19, %v2350_v47  ;;  %v2355_v51 = vmul.f32 %v2353_v48, %v2353_v48  ;;  %vm2685_vm10 = vcmp.eq.s32.totalorder %v8819_v20, %v2681_v10  ;;  %v6921_v10 = vld [vmem:[#allocation4] ss:$0 sm:$0xff] }
 0xf22   :  { %v2354_v50 = vmul.f32 %v2352_v49, %v2352_v49  ;;  %v2359_v58 = vsel %vm579_vm2, %v2355_v51, 0.0 }
 0xf24   :  { %v2356_v61 = vsel %vm579_vm2, %v2354_v50, 0.0 }
 0xf25   :  { %2357 = vadd.xlane.f32.xlu0 %v2356_v61 }
 0xf29   :  { %2360 = vadd.xlane.f32.xlu0 %v2359_v58 }
 0xf3f   :  { %2683 = vperm.xlu0 %7900, %v2678_v54  }
 0xfae   :  { %v2358_v62 = vpop.xlane.xlu0 %2357 }
 0xfaf   :  { %v2362_v63 = vmul.f32 0.03125, %v2358_v62 }
 0xfb1   :  { %v2364_v23 = vadd.f32 1e-05, %v2362_v63 }
 0xfb2   :  { %v2361_v0 = vpop.xlane.xlu0 %2360 }
 0xfb3   :  { %7938 = vrsqrt.f32 %v2364_v23  ;;  %v2363_v55 = vmul.f32 0.03125, %v2361_v0 }
 0xfb5   :  { %v2365_v57 = vadd.f32 1e-05, %v2363_v55 }
 0xfb7   :  { %7940 = vrsqrt.f32 %v2365_v57 }
 0xfc0   :  { %v7939_v1 = vpop.eup %7938 }
 0xfc1   :  { %v2368_v3 = vmul.f32 %v7939_v1, %v2352_v49 }
 0xfc3   :  { %v2377_v6 = vmul.f32 %v6906_v2, %v2368_v3 }
 0xfc4   :  { %v7941_v7 = vpop.eup %7940 }
 0xfc5   :  { %v2369_v9 = vmul.f32 %v7941_v7, %v2353_v48  ;;  %v9069_v13 = vadd.f32 %v6907_v4, %v2377_v6 }
 0xfc7   :  { %v2378_v21 = vmul.f32 %v6906_v2, %v2369_v9  ;;  %7446 = vmatprep.mubr.msk.f32.mxu1 %vm579_vm2, %v9069_v13 }
 0xfc9   :  { %v9073_v15 = vadd.f32 %v6907_v4, %v2378_v21 }
 0xfcb   :  { %7447 = vmatmul.mubr.msk.f32.vlgmr.msra.gmra.mxu1 %vm579_vm2, %v9073_v15 }
 0xfcc   :  { %7538 = vmatprep.mubr.msk.f32.mxu1 %vm8498_vm3, %v8497_v5 }
0x108b   :  { %v7448_v29 = vpop.f32.mrf.mxu1 }
0x108c   :  { %v2477_v31 = vadd.f32 %v7448_v29, %v6908_v28  ;;  %v2705_v29 = vld [vmem:[%s9698_s17 + $0x70] sm:$0xff] }
0x108d   :  { %v2471_v32 = vpop.f32.mrf.mxu1 }
0x108e   :  { %v2483_v33 = vmul.f32 0.70710677, %v2477_v31  ;;  %v2472_v34 = vadd.f32 %v6908_v28, %v2471_v32  ;;  %v2481_v12 = vmul.f32 0.5, %v2477_v31  ;;  %v2704_v32 = vld [vmem:[%s9698_s17 + $0x68] sm:$0xff]  ;;  %v2703_v31 = vld [vmem:[%s9698_s17 + $0x60] sm:$0xff] }
0x1090   :  { %v2485_v35 = vand.u32 2147483647, %v2483_v33  ;;  %v2482_v36 = vmul.f32 0.70710677, %v2472_v34  ;;  %vm2525_vm7 = vcmp.ge.f32.partialorder %v2483_v33, 0.0  ;;  %v2480_v25 = vmul.f32 0.5, %v2472_v34 }
0x1091   :  { %v2702_v33 = vld [vmem:[%s9698_s17 + $0x58] sm:$0xff]  ;;  %v2701_v34 = vld [vmem:[%s9698_s17 + $0x50] sm:$0xff] }
0x1092   :  { %v2487_v8 = vmul.f32 0.3275911, %v2485_v35  ;;  %v2484_v14 = vand.u32 2147483647, %v2482_v36  ;;  %v2513_v41 = vsub.f32 0.0, %v2485_v35  ;;  %vm2524_vm8 = vcmp.ge.f32.partialorder %v2482_v36, 0.0 }
0x1093   :  { %v2698_v36 = vld [vmem:[%s9698_s17 + $0x38] sm:$0xff] }
0x1094   :  { %v2489_v37 = vadd.f32 1.0, %v2487_v8  ;;  %v2486_v39 = vmul.f32 0.3275911, %v2484_v14  ;;  %v2512_v43 = vsub.f32 0.0, %v2484_v14  ;;  %v2515_v19 = vmul.f32 %v2513_v41, %v2485_v35  ;;  %v2699_v35 = vld [vmem:[%s9698_s17 + $0x40] sm:$0xff]  ;;  %v2697_v8 = vld [vmem:[%s9698_s17 + $0x30] sm:$0xff] }
0x1095   :  { %v2692_v41 = vld [vmem:[%s9698_s17 + $0x8] sm:$0xff] }
0x1096   :  { %7942 = vrcp.f32 %v2489_v37  ;;  %v2488_v40 = vadd.f32 1.0, %v2486_v39  ;;  %v2514_v44 = vmul.f32 %v2512_v43, %v2484_v14  ;;  %v2518_v46 = vmul.f32 1.442695, %v2515_v19  ;;  %v2696_v14 = vld [vmem:[%s9698_s17 + $0x28] sm:$0xff]  ;;  %v2695_v37 = vld [vmem:[%s9698_s17 + $0x20] sm:$0xff]  ;;  %v2694_v39 = vld [vmem:[%s9698_s17 + $0x18] sm:$0xff]  ;;  %v2684_v19 = vpop.permute.xlu0 %2683 }
0x1097   :  { %v2691_v43 = vld [vmem:[%s9698_s17] sm:$0xff]  ;;  %vm2686_vm11 = vcmp.eq.s32.totalorder %v8819_v20, %v2684_v19 }
0x1098   :  { %7944 = vrcp.f32 %v2488_v40  ;;  %v2516_v50 = vmul.f32 1.442695, %v2514_v44  ;;  %v2693_v40 = vld [vmem:[%s9698_s17 + $0x10] sm:$0xff] }
0x1099   :  { %7946 = vpow2.f32 %v2518_v46 }
0x109a   :  { %7948 = vpow2.f32 %v2516_v50 }
0x10a3   :  { %v7943_v11 = vpop.eup %7942 }
0x10a4   :  { %v2495_v45 = vmul.f32 1.0614054, %v7943_v11 }
0x10a5   :  { %v7945_v47 = vpop.eup %7944 }
0x10a6   :  { %v2497_v48 = vadd.f32 -1.4531521, %v2495_v45  ;;  %v2494_v49 = vmul.f32 1.0614054, %v7945_v47  ;;  %v7947_v55 = vpop.eup %7946  ;;  %v2782_v45 = vld [vmem:[%s9717_s23] sm:$0xff] }
0x10a7   :  { %v7949_v3 = vpop.eup %7948 }
0x10a8   :  { %v2499_v61 = vmul.f32 %v7943_v11, %v2497_v48  ;;  %v2496_v51 = vadd.f32 -1.4531521, %v2494_v49 }
0x10aa   :  { %v2501_v58 = vadd.f32 1.4214138, %v2499_v61  ;;  %v2498_v52 = vmul.f32 %v7945_v47, %v2496_v51 }
0x10ac   :  { %v2503_v53 = vmul.f32 %v7943_v11, %v2501_v58  ;;  %v2500_v54 = vadd.f32 1.4214138, %v2498_v52 }
0x10ae   :  { %v2505_v56 = vadd.f32 -0.28449672, %v2503_v53  ;;  %v2502_v59 = vmul.f32 %v7945_v47, %v2500_v54 }
0x10b0   :  { %v2507_v60 = vmul.f32 %v7943_v11, %v2505_v56  ;;  %v2504_v62 = vadd.f32 -0.28449672, %v2502_v59 }
0x10b2   :  { %v2509_v63 = vadd.f32 0.2548296, %v2507_v60  ;;  %v2506_v23 = vmul.f32 %v7945_v47, %v2504_v62 }
0x10b4   :  { %v2511_v0 = vmul.f32 %v7943_v11, %v2509_v63  ;;  %v2508_v57 = vadd.f32 0.2548296, %v2506_v23  ;;  %v2832_v63 = vld [vmem:[%s9718_s6 + $0x18] sm:$0xff]  ;;  %v2831_v23 = vld [vmem:[%s9718_s6 + $0x10] sm:$0xff] }
0x10b6   :  { %v2521_v1 = vmul.f32 %v7947_v55, %v2511_v0  ;;  %v2510_v2 = vmul.f32 %v7945_v47, %v2508_v57  ;;  %v2830_v0 = vld [vmem:[%s9718_s6 + $0x8] sm:$0xff]  ;;  %v2829_v55 = vld [vmem:[%s9718_s6] sm:$0xff]  ;;  %v2924_v57 = vld [vmem:[%s9719_s26 + $0x18] sm:$0xff] }
0x10b8   :  { %v2523_v4 = vsub.f32 1.0, %v2521_v1  ;;  %v2520_v6 = vmul.f32 %v7949_v3, %v2510_v2 }
0x10ba   :  { %v2527_v7 = vsub.f32 0.0, %v2523_v4  ;;  %v2522_v9 = vsub.f32 1.0, %v2520_v6 }
0x10bc   :  { %v2529_v21 = vsel %vm2525_vm7, %v2523_v4, %v2527_v7  ;;  %v2526_v16 = vsub.f32 0.0, %v2522_v9 }
0x10bd   :  { %v2531_v18 = vadd.f32 1.0, %v2529_v21 }
0x10be   :  { %v2528_v24 = vsel %vm2524_vm8, %v2522_v9, %v2526_v16  ;;  %v6920_v16 = vld [vmem:[#allocation2] ss:$0 sm:$0xff] }
0x10bf   :  { %v2530_v26 = vadd.f32 1.0, %v2528_v24  ;;  %v2533_v28 = vmul.f32 %v2531_v18, %v2481_v12 }
0x10c1   :  { %v2532_v17 = vmul.f32 %v2530_v26, %v2480_v25 }
0x10c3   :  { %7465 = vmatprep.mubr.msk.f32.mxu0 %vm2549_vm9, %v2532_v17 }
0x10c4   :  { %7466 = vmatmul.mubr.msk.f32.vlgmr.msra.gmra.mxu0 %vm2549_vm9, %v2533_v28  ;;  %v2923_v28 = vld [vmem:[%s9719_s26 + $0x10] sm:$0xff] }
0x10c5   :  { %7469 = vmatpush3.msra.mxu0 %v9088_v27  ;;  %7500 = vmatprep.mubr.msk.f32.mxu0 %vm2685_vm10, %v8496_v22  ;;  %v2700_v27 = vld [vmem:[%s9698_s17 + $0x48] sm:$0xff] }
0x10c6   :  { %7470 = vmatprep.subr.mxu0 %v2705_v29 }
0x10c7   :  { %7471 = vmatpush3.msra.mxu0 %v2705_v29  ;;  %v2922_v29 = vld [vmem:[%s9719_s26 + $0x8] sm:$0xff] }
0x10c8   :  { %7472 = vmatprep.subr.mxu0 %v2704_v32 }
0x10c9   :  { %7473 = vmatpush3.msra.mxu0 %v2704_v32  ;;  %v2921_v32 = vld [vmem:[%s9719_s26] sm:$0xff] }
0x10ca   :  { %7474 = vmatprep.subr.mxu0 %v2703_v31 }
0x10cb   :  { %7475 = vmatpush3.msra.mxu0 %v2703_v31  ;;  %v3010_v31 = vld [vmem:[%s9720_s5 + $0x18] sm:$0xff] }
0x10cc   :  { %7476 = vmatprep.subr.mxu0 %v2702_v33 }
0x10cd   :  { %7477 = vmatpush3.msra.mxu0 %v2702_v33  ;;  %v3009_v33 = vld [vmem:[%s9720_s5 + $0x10] sm:$0xff] }
0x10ce   :  { %7478 = vmatprep.subr.mxu0 %v2701_v34 }
0x10cf   :  { %7479 = vmatpush3.msra.mxu0 %v2701_v34  ;;  %v3008_v34 = vld [vmem:[%s9720_s5 + $0x8] sm:$0xff] }
0x10d0   :  { %7480 = vmatprep.subr.mxu0 %v2700_v27 }
0x10d1   :  { %7481 = vmatpush3.msra.mxu0 %v2700_v27  ;;  %v3007_v27 = vld [vmem:[%s9720_s5] sm:$0xff] }
0x10d2   :  { %7482 = vmatprep.subr.mxu0 %v2699_v35 }
0x10d3   :  { %7483 = vmatpush3.msra.mxu0 %v2699_v35 }
0x10d4   :  { %7484 = vmatprep.subr.mxu0 %v2698_v36 }
0x10d5   :  { %7485 = vmatpush3.msra.mxu0 %v2698_v36 }
0x10d6   :  { %7486 = vmatprep.subr.mxu0 %v2697_v8 }
0x10d7   :  { %7487 = vmatpush3.msra.mxu0 %v2697_v8 }
0x10d8   :  { %7488 = vmatprep.subr.mxu0 %v2696_v14 }
0x10d9   :  { %7489 = vmatpush3.msra.mxu0 %v2696_v14  ;;  %v6925_v14 = vld [vmem:[#allocation16] ss:$0 sm:$0xff] }
0x10da   :  { %7490 = vmatprep.subr.mxu0 %v2695_v37 }
0x10db   :  { %7491 = vmatpush3.msra.mxu0 %v2695_v37 }
0x10dc   :  { %7492 = vmatprep.subr.mxu0 %v2694_v39 }
0x10dd   :  { %7493 = vmatpush3.msra.mxu0 %v2694_v39 }
0x10de   :  { %7494 = vmatprep.subr.mxu0 %v2693_v40 }
0x10df   :  { %7495 = vmatpush3.msra.mxu0 %v2693_v40  ;;  %v6922_v40 = vld [vmem:[#allocation15] ss:$0 sm:$0xff] }
0x10e0   :  { %7496 = vmatprep.subr.mxu0 %v2692_v41 }
0x10e1   :  { %7497 = vmatpush3.msra.mxu0 %v2692_v41 }
0x10e2   :  { %7498 = vmatprep.subr.mxu0 %v2691_v43 }
0x10e3   :  { %7499 = vmatpush3.msra.mxu0 %v2691_v43 }
0x10e4   :  { %7501 = vmatmul.mubr.msk.f32.vlgmr.msra.gmra.mxu0 %vm2686_vm11, %v8496_v22  ;;  %7503 = vmatprep.subr.mxu0 %v2832_v63 }
0x10e5   :  { %7504 = vmatpush3.msra.mxu0 %v2832_v63 }
0x10e6   :  { %7505 = vmatprep.subr.mxu0 %v2831_v23 }
0x10e7   :  { %7506 = vmatpush3.msra.mxu0 %v2831_v23 }
0x10e8   :  { %7507 = vmatprep.subr.mxu0 %v2830_v0 }
0x10e9   :  { %7508 = vmatpush3.msra.mxu0 %v2830_v0 }
0x10ea   :  { %7509 = vmatprep.subr.mxu0 %v2829_v55 }
0x10eb   :  { %7510 = vmatpush3.msra.mxu0 %v2829_v55 }
0x10ec   :  { %7514 = vmatprep.subr.mxu0 %v2924_v57 }
0x1184   :  { %v9114_v11 = vpop.f32.mrf.mxu0 }
0x1186   :  { %v9116_v44 = vpop.f32.mrf.mxu0 }
0x11a4   :  { %v7502_v46 = vpop.f32.mrf.mxu0 }
0x11a5   :  { %v2784_v47 = vadd.f32 %v7502_v46, %v2782_v45 }
0x11a6   :  { %v2773_v48 = vpop.f32.mrf.mxu0 }
0x11a7   :  { %v2783_v49 = vadd.f32 %v2782_v45, %v2773_v48  ;;  %v2788_v50 = vsel %vm579_vm2, %v2784_v47, 0.0  ;;  %v6928_v45 = vld [vmem:[#allocation18] ss:$0 sm:$0xff] }
0x11a8   :  { %2789 = vadd.xlane.f32.xlu0 %v2788_v50 }
0x11a9   :  { %v2785_v61 = vsel %vm579_vm2, %v2783_v49, 0.0 }
0x11aa   :  { %2786 = vadd.xlane.f32.xlu1 %v2785_v61  ;;  %v8505_v61 = vmov -1e+09  }
0x1231   :  { %v2790_v51 = vpop.xlane.xlu0 %2789 }
0x1232   :  { %v2792_v22 = vmul.f32 0.03125, %v2790_v51  ;;  %v9186_v51 = vsel %vm469_vm12, 0.0, %v8505_v61 }
0x1233   :  { %v2787_v58 = vpop.xlane.xlu1 %2786 }
0x1234   :  { %v2794_v52 = vsub.f32 %v2784_v47, %v2792_v22  ;;  %v2791_v53 = vmul.f32 0.03125, %v2787_v58 }
0x1236   :  { %v2793_v54 = vsub.f32 %v2783_v49, %v2791_v53  ;;  %v2796_v56 = vmul.f32 %v2794_v52, %v2794_v52 }
0x1238   :  { %v2800_v59 = vsel %vm579_vm2, %v2796_v56, 0.0  ;;  %v2795_v60 = vmul.f32 %v2793_v54, %v2793_v54 }
0x1239   :  { %2801 = vadd.xlane.f32.xlu0 %v2800_v59 }
0x123a   :  { %v2797_v62 = vsel %vm579_vm2, %v2795_v60, 0.0 }
0x123b   :  { %2798 = vadd.xlane.f32.xlu1 %v2797_v62 }
0x12c2   :  { %v2802_v1 = vpop.xlane.xlu0 %2801 }
0x12c3   :  { %v2804_v2 = vmul.f32 0.03125, %v2802_v1 }
0x12c4   :  { %v2799_v3 = vpop.xlane.xlu1 %2798 }
0x12c5   :  { %v2806_v4 = vadd.f32 1e-05, %v2804_v2  ;;  %v2803_v6 = vmul.f32 0.03125, %v2799_v3 }
0x12c7   :  { %7950 = vrsqrt.f32 %v2806_v4  ;;  %v2805_v7 = vadd.f32 1e-05, %v2803_v6 }
0x12c9   :  { %7952 = vrsqrt.f32 %v2805_v7 }
0x12d4   :  { %v7951_v9 = vpop.eup %7950 }
0x12d5   :  { %v2810_v21 = vmul.f32 %v7951_v9, %v2794_v52 }
0x12d6   :  { %v7953_v18 = vpop.eup %7952 }
0x12d7   :  { %v2809_v24 = vmul.f32 %v7953_v18, %v2793_v54  ;;  %v2819_v25 = vmul.f32 %v6920_v16, %v2810_v21 }
0x12d9   :  { %v2818_v26 = vmul.f32 %v6920_v16, %v2809_v24  ;;  %v9130_v17 = vadd.f32 %v6921_v10, %v2819_v25 }
0x12db   :  { %v9128_v12 = vadd.f32 %v6921_v10, %v2818_v26 }
0x12dd   :  { %7511 = vmatprep.mubr.msk.f32.mxu0 %vm579_vm2, %v9128_v12 }
0x12de   :  { %7512 = vmatmul.mubr.msk.f32.vlgmr.msra.gmra.mxu0 %vm579_vm2, %v9130_v17 }
0x12df   :  { %7515 = vmatpush3.msra.mxu0 %v2924_v57  ;;  %7522 = vmatprep.mubr.msk.f32.mxu0 %vm579_vm2, %v9128_v12 }
0x12e0   :  { %7516 = vmatprep.subr.mxu0 %v2923_v28 }
0x12e1   :  { %7517 = vmatpush3.msra.mxu0 %v2923_v28 }
0x12e2   :  { %7518 = vmatprep.subr.mxu0 %v2922_v29 }
0x12e3   :  { %7519 = vmatpush3.msra.mxu0 %v2922_v29 }
0x12e4   :  { %7520 = vmatprep.subr.mxu0 %v2921_v32 }
0x12e5   :  { %7521 = vmatpush3.msra.mxu0 %v2921_v32 }
0x12e6   :  { %7523 = vmatmul.mubr.msk.f32.vlgmr.msra.gmra.mxu0 %vm579_vm2, %v9130_v17  ;;  %7525 = vmatprep.subr.mxu0 %v3010_v31 }
0x12e7   :  { %7526 = vmatpush3.msra.mxu0 %v3010_v31  ;;  %7533 = vmatprep.mubr.msk.f32.mxu0 %vm579_vm2, %v9128_v12 }
0x12e8   :  { %7527 = vmatprep.subr.mxu0 %v3009_v33 }
0x12e9   :  { %7528 = vmatpush3.msra.mxu0 %v3009_v33 }
0x12ea   :  { %7529 = vmatprep.subr.mxu0 %v3008_v34 }
0x12eb   :  { %7530 = vmatpush3.msra.mxu0 %v3008_v34 }
0x12ec   :  { %7531 = vmatprep.subr.mxu0 %v3007_v27 }
0x12ed   :  { %7532 = vmatpush3.msra.mxu0 %v3007_v27 }
0x12ee   :  { %7534 = vmatmul.mubr.msk.f32.vlgmr.msra.gmra.mxu0 %vm579_vm2, %v9130_v17  ;;  %7546 = vmatprep.subr.mxu0 %v8497_v5 }
0x12ef   :  { %7548 = vmatprep.mubr.msk.f32.mxu0 %vm8498_vm3, %v8497_v5 }
0x139e   :  { %v7513_v35 = vpop.f32.mrf.mxu0 }
0x139f   :  { %v9169_v46 = vadd.f32 %v7513_v35, %v6922_v40 }
0x13a0   :  { %v2912_v36 = vpop.f32.mrf.mxu0 }
0x13a1   :  { %v9158_v41 = vadd.f32 %v6922_v40, %v2912_v36 }
0x13a6   :  { %v7524_v8 = vpop.f32.mrf.mxu0 }
0x13a7   :  { %v9161_v43 = vadd.f32 %v7524_v8, %v6925_v14 }
0x13a8   :  { %v2998_v37 = vpop.f32.mrf.mxu0 }
0x13a9   :  { %v9154_v39 = vadd.f32 %v6925_v14, %v2998_v37 }
0x13ab   :  { %7537 = vmatpush3.xpose.msk.msra.mxu1 %vm889_vm4, %v9154_v39 }
0x13ac   :  { %7541 = vmatprep.subr.mxu1 %v8497_v5 }
0x13ae   :  { %v7535_v19 = vpop.f32.mrf.mxu0  ;;  %7539 = vmatmul.mubr.msk.f32.vlgmr.msra.gmra.mxu1 %vm889_vm4, %v9158_v41 }
0x13af   :  { %7542 = vmatpush3.xpose.msk.msra.mxu1 %vm889_vm4, %v9161_v43  ;;  %7543 = vmatprep.mubr.msk.f32.mxu1 %vm8498_vm3, %v8497_v5  ;;  %v9172_v48 = vadd.f32 %v7535_v19, %v6928_v45 }
0x13b0   :  { %v3084_v47 = vpop.f32.mrf.mxu0  ;;  %7551 = vmatprep.subr.mxu1 %v8497_v5 }
0x13b1   :  { %v9174_v49 = vadd.f32 %v6928_v45, %v3084_v47 }
0x13b2   :  { %7544 = vmatmul.mubr.msk.f32.vlgmr.msra.gmra.mxu1 %vm889_vm4, %v9169_v46 }
0x13b3   :  { %7547 = vmatpush3.msra.mxu0 %v9174_v49  ;;  %7552 = vmatpush3.msra.mxu1 %v9172_v48 }
0x13b4   :  { %7556 = vmatprep.subr.mxu0 %v8497_v5  ;;  %7553 = vmatprep.mubr.msk.f32.mxu1 %vm8498_vm3, %v8497_v5 }
0x13b5   :  { %7561 = vmatprep.subr.mxu1 %v8497_v5 }
0x146e   :  { %v3165_v50 = vpop.f32.mrf.mxu1 }
0x146f   :  { %v3245_v22 = vmul.f32 0.35355338, %v3165_v50 }
0x1470   :  { %v7540_v58 = vpop.f32.mrf.mxu1 }
0x1471   :  { %v3247_v52 = vadd.f32 %v3245_v22, %v9186_v51 }
0x1472   :  { %v3241_v53 = vpop.f32.mrf.mxu1 }
0x1473   :  { %v3246_v54 = vmul.f32 0.35355338, %v3241_v53  ;;  %v3249_v56 = vsel %vm889_vm4, %v3247_v52, -inf }
0x1474   :  { %3250 = vmax.xlane.f32.xlu1 %v3249_v56  ;;  %v7545_v59 = vpop.f32.mrf.mxu1 }
0x1475   :  { %v3248_v60 = vadd.f32 %v3246_v54, %v9186_v51 }
0x1477   :  { %v3252_v62 = vsel %vm889_vm4, %v3248_v60, -inf }
0x1478   :  { %3253 = vmax.xlane.f32.xlu0 %v3252_v62 }
0x1485   :  { %3419 = vrot.lane.b32.xlu1 %v9154_v39, %s8499_s10 }
0x14fd   :  { %v3251_v20 = vpop.xlane.xlu1 %3250 }
0x14fe   :  { %v3255_v30 = vsub.f32 %v3247_v52, %v3251_v20 }
0x1500   :  { %v3257_v63 = vmul.f32 1.442695, %v3255_v30 }
0x1501   :  { %v3254_v23 = vpop.xlane.xlu0 %3253  ;;  %v3420_v4 = vpop.permute.xlu1 %3419 }
0x1502   :  { %7954 = vpow2.f32 %v3257_v63  ;;  %v3256_v0 = vsub.f32 %v3248_v60, %v3254_v23 }
0x1504   :  { %v3259_v55 = vmul.f32 1.442695, %v3256_v0 }
0x1506   :  { %7956 = vpow2.f32 %v3259_v55 }
0x150f   :  { %v7955_v57 = vpop.eup %7954 }
0x1510   :  { %v3261_v1 = vsel %vm889_vm4, %v7955_v57, 0.0 }
0x1511   :  { %3262 = vadd.xlane.f32.xlu1 %v3261_v1 }
0x1513   :  { %v7957_v2 = vpop.eup %7956 }
0x1514   :  { %v3264_v3 = vsel %vm889_vm4, %v7957_v2, 0.0 }
0x1515   :  { %3265 = vadd.xlane.f32.xlu0 %v3264_v3 }
0x1522   :  { %3417 = vrot.lane.b32.xlu1 %v9158_v41, %s8499_s10 }
0x1526   :  { %3495 = vrot.lane.b32.xlu1 %v9169_v46, %s8499_s10 }
0x152b   :  { %3497 = vrot.lane.b32.xlu0 %v9161_v43, %s8499_s10 }
0x159a   :  { %v3263_v6 = vpop.xlane.xlu1 %3262 }
0x159b   :  { %7958 = vrcp.f32 %v3263_v6 }
0x159e   :  { %v3266_v7 = vpop.xlane.xlu0 %3265  ;;  %v3418_v18 = vpop.permute.xlu1 %3417 }
0x159f   :  { %7960 = vrcp.f32 %v3266_v7 }
0x15a2   :  { %v3498_v25 = vpop.permute.xlu0 %3497  ;;  %v3496_v26 = vpop.permute.xlu1 %3495 }
0x15a8   :  { %v7959_v9 = vpop.eup %7958 }
0x15a9   :  { %v3269_v21 = vmul.f32 %v7959_v9, %v7955_v57 }
0x15ab   :  { %7549 = vmatmul.mubr.msk.f32.vlgmr.msra.gmra.mxu0 %vm889_vm4, %v3269_v21 }
0x15ac   :  { %v7961_v16 = vpop.eup %7960  ;;  %7557 = vmatpush3.xpose.msk.msra.mxu0 %vm889_vm4, %v3420_v4  ;;  %7558 = vmatprep.mubr.msk.f32.mxu0 %vm8498_vm3, %v8497_v5 }
0x15ad   :  { %v3270_v24 = vmul.f32 %v7961_v16, %v7957_v2  ;;  %7566 = vmatprep.subr.mxu0 %v8497_v5 }
0x15af   :  { %7554 = vmatmul.mubr.msk.f32.vlgmr.msra.gmra.mxu1 %vm889_vm4, %v3270_v24  ;;  %7559 = vmatmul.mubr.msk.f32.vlgmr.msra.gmra.mxu0 %vm889_vm4, %v3418_v18 }
0x15b0   :  { %7562 = vmatpush3.xpose.msk.msra.mxu1 %vm889_vm4, %v3498_v25  ;;  %7563 = vmatprep.mubr.msk.f32.mxu1 %vm8498_vm3, %v8497_v5 }
0x15b1   :  { %7571 = vmatprep.subr.mxu1 %v8497_v5  ;;  %7568 = vmatprep.mubr.msk.f32.mxu0 %vm8498_vm3, %v8497_v5 }
0x15b3   :  { %7564 = vmatmul.mubr.msk.f32.vlgmr.msra.gmra.mxu1 %vm889_vm4, %v3496_v26 }
0x15b4   :  { %7573 = vmatprep.mubr.msk.f32.mxu1 %vm8498_vm3, %v8497_v5 }
0x166b   :  { %v9218_v10 = vpop.f32.mrf.mxu0 }
0x166d   :  { %v7550_v28 = vpop.f32.mrf.mxu0 }
0x166f   :  { %v9220_v29 = vpop.f32.mrf.mxu1  ;;  %v3491_v32 = vpop.f32.mrf.mxu0 }
0x1670   :  { %v3573_v31 = vmul.f32 0.35355338, %v3491_v32 }
0x1671   :  { %v7555_v33 = vpop.f32.mrf.mxu1  ;;  %v7560_v34 = vpop.f32.mrf.mxu0 }
0x1672   :  { %v3575_v27 = vadd.f32 %v3573_v31, %v9186_v51 }
0x1673   :  { %v3569_v35 = vpop.f32.mrf.mxu1 }
0x1674   :  { %v3574_v36 = vmul.f32 0.35355338, %v3569_v35  ;;  %v3577_v8 = vsel %vm889_vm4, %v3575_v27, -inf }
0x1675   :  { %3578 = vmax.xlane.f32.xlu0 %v3577_v8  ;;  %v7565_v14 = vpop.f32.mrf.mxu1 }
0x1676   :  { %v3576_v37 = vadd.f32 %v3574_v36, %v9186_v51 }
0x1678   :  { %v3580_v40 = vsel %vm889_vm4, %v3576_v37, -inf }
0x1679   :  { %3581 = vmax.xlane.f32.xlu1 %v3580_v40 }
0x168a   :  { %3600 = vrot.lane.b32.xlu1 %v9174_v49, %s8499_s10 }
0x168b   :  { %3677 = vrot.lane.b32.xlu0 %v9172_v48, %s8499_s10 }
0x168e   :  { %3755 = vrot.lane.b32.xlu1 %v9154_v39, %s8501_s11 }
0x1692   :  { %3833 = vrot.lane.b32.xlu1 %v9161_v43, %s8501_s11 }
0x1696   :  { %3831 = vrot.lane.b32.xlu1 %v9169_v46, %s8501_s11 }
0x16fe   :  { %v3579_v19 = vpop.xlane.xlu0 %3578 }
0x16ff   :  { %v3583_v45 = vsub.f32 %v3575_v27, %v3579_v19 }
0x1701   :  { %v3585_v47 = vmul.f32 1.442695, %v3583_v45 }
0x1702   :  { %v3678_v50 = vpop.permute.xlu0 %3677  ;;  %v3582_v61 = vpop.xlane.xlu1 %3581 }
0x1703   :  { %7962 = vpow2.f32 %v3585_v47  ;;  %v3584_v22 = vsub.f32 %v3576_v37, %v3582_v61  ;;  %7572 = vmatpush3.msra.mxu1 %v3678_v50 }
0x1704   :  { %7581 = vmatprep.subr.mxu1 %v8497_v5 }
0x1705   :  { %v3587_v58 = vmul.f32 1.442695, %v3584_v22 }
0x1706   :  { %v3601_v52 = vpop.permute.xlu1 %3600 }
0x1707   :  { %7964 = vpow2.f32 %v3587_v58  ;;  %7567 = vmatpush3.msra.mxu0 %v3601_v52 }
0x1708   :  { %7576 = vmatprep.subr.mxu0 %v8497_v5 }
0x170a   :  { %v3756_v20 = vpop.permute.xlu1 %3755 }
0x170e   :  { %v3834_v0 = vpop.permute.xlu1 %3833 }
0x1710   :  { %v7963_v53 = vpop.eup %7962 }
0x1711   :  { %v3589_v54 = vsel %vm889_vm4, %v7963_v53, 0.0 }
0x1712   :  { %3590 = vadd.xlane.f32.xlu0 %v3589_v54  ;;  %v3832_v1 = vpop.permute.xlu1 %3831 }
0x1714   :  { %v7965_v56 = vpop.eup %7964 }
0x1715   :  { %v3592_v59 = vsel %vm889_vm4, %v7965_v56, 0.0 }
0x1716   :  { %3593 = vadd.xlane.f32.xlu0 %v3592_v59 }
0x172c   :  { %3753 = vrot.lane.b32.xlu0 %v9158_v41, %s8501_s11 }
0x179b   :  { %v3591_v60 = vpop.xlane.xlu0 %3590 }
0x179c   :  { %7966 = vrcp.f32 %v3591_v60 }
0x179f   :  { %v3594_v62 = vpop.xlane.xlu0 %3593 }
0x17a0   :  { %7968 = vrcp.f32 %v3594_v62 }
0x17a3   :  { %v3754_v57 = vpop.permute.xlu0 %3753 }
0x17a9   :  { %v7967_v30 = vpop.eup %7966 }
0x17aa   :  { %v3597_v63 = vmul.f32 %v7967_v30, %v7963_v53 }
0x17ac   :  { %7569 = vmatmul.mubr.msk.f32.vlgmr.msra.gmra.mxu0 %vm889_vm4, %v3597_v63 }
0x17ad   :  { %v7969_v23 = vpop.eup %7968  ;;  %7577 = vmatpush3.xpose.msk.msra.mxu0 %vm889_vm4, %v3756_v20  ;;  %7578 = vmatprep.mubr.msk.f32.mxu0 %vm8498_vm3, %v8497_v5 }
0x17ae   :  { %v3598_v55 = vmul.f32 %v7969_v23, %v7965_v56  ;;  %7586 = vmatprep.subr.mxu0 %v8497_v5 }
0x17b0   :  { %7574 = vmatmul.mubr.msk.f32.vlgmr.msra.gmra.mxu1 %vm889_vm4, %v3598_v55  ;;  %7579 = vmatmul.mubr.msk.f32.vlgmr.msra.gmra.mxu0 %vm889_vm4, %v3754_v57 }
0x17b1   :  { %7582 = vmatpush3.xpose.msk.msra.mxu1 %vm889_vm4, %v3834_v0  ;;  %7583 = vmatprep.mubr.msk.f32.mxu1 %vm8498_vm3, %v8497_v5 }
0x17b2   :  { %7591 = vmatprep.subr.mxu1 %v8497_v5  ;;  %7588 = vmatprep.mubr.msk.f32.mxu0 %vm8498_vm3, %v8497_v5 }
0x17b4   :  { %7584 = vmatmul.mubr.msk.f32.vlgmr.msra.gmra.mxu1 %vm889_vm4, %v3832_v1 }
0x17b5   :  { %7593 = vmatprep.mubr.msk.f32.mxu1 %vm8498_vm3, %v8497_v5 }
0x186c   :  { %v9258_v2 = vpop.f32.mrf.mxu0 }
0x186e   :  { %v7570_v3 = vpop.f32.mrf.mxu0 }
0x1870   :  { %v9260_v4 = vpop.f32.mrf.mxu1  ;;  %v3827_v6 = vpop.f32.mrf.mxu0 }
0x1871   :  { %v3909_v7 = vmul.f32 0.35355338, %v3827_v6 }
0x1872   :  { %v7575_v9 = vpop.f32.mrf.mxu1  ;;  %v7580_v21 = vpop.f32.mrf.mxu0 }
0x1873   :  { %v3911_v16 = vadd.f32 %v3909_v7, %v9186_v51 }
0x1874   :  { %v3905_v18 = vpop.f32.mrf.mxu1 }
0x1875   :  { %v3910_v24 = vmul.f32 0.35355338, %v3905_v18  ;;  %v3913_v25 = vsel %vm889_vm4, %v3911_v16, -inf }
0x1876   :  { %3914 = vmax.xlane.f32.xlu0 %v3913_v25  ;;  %v7585_v26 = vpop.f32.mrf.mxu1 }
0x1877   :  { %v3912_v28 = vadd.f32 %v3910_v24, %v9186_v51 }
0x1879   :  { %v3916_v32 = vsel %vm889_vm4, %v3912_v28, -inf }
0x187a   :  { %3917 = vmax.xlane.f32.xlu1 %v3916_v32 }
0x188b   :  { %3935 = vrot.lane.b32.xlu1 %v9174_v49, %s8501_s11 }
0x188c   :  { %4011 = vrot.lane.b32.xlu0 %v9172_v48, %s8501_s11 }
0x188f   :  { %4089 = vrot.lane.b32.xlu1 %v9154_v39, %s8502_s15 }
0x1893   :  { %4167 = vrot.lane.b32.xlu1 %v9161_v43, %s8502_s15 }
0x1897   :  { %4165 = vrot.lane.b32.xlu1 %v9169_v46, %s8502_s15 }
0x18ff   :  { %v3915_v31 = vpop.xlane.xlu0 %3914 }
0x1900   :  { %v3919_v33 = vsub.f32 %v3911_v16, %v3915_v31 }
0x1902   :  { %v3921_v34 = vmul.f32 1.442695, %v3919_v33 }
0x1903   :  { %v4012_v27 = vpop.permute.xlu0 %4011  ;;  %v3918_v35 = vpop.xlane.xlu1 %3917 }
0x1904   :  { %7970 = vpow2.f32 %v3921_v34  ;;  %v3920_v36 = vsub.f32 %v3912_v28, %v3918_v35  ;;  %7592 = vmatpush3.msra.mxu1 %v4012_v27  ;;  %v4454_v34 = vld [vmem:[%s9721_s20 + $0x18] sm:$0xff]  ;;  %v4452_v27 = vld [vmem:[%s9721_s20 + $0x8] sm:$0xff]  ;;  %v4451_v35 = vld [vmem:[%s9721_s20] sm:$0xff] }
0x1905   :  { %7601 = vmatprep.subr.mxu1 %v8497_v5 }
0x1906   :  { %v3923_v8 = vmul.f32 1.442695, %v3920_v36 }
0x1907   :  { %v3936_v14 = vpop.permute.xlu1 %3935 }
0x1908   :  { %7972 = vpow2.f32 %v3923_v8  ;;  %7587 = vmatpush3.msra.mxu0 %v3936_v14 }
0x1909   :  { %7596 = vmatprep.subr.mxu0 %v8497_v5 }
0x190b   :  { %v4090_v45 = vpop.permute.xlu1 %4089 }
0x190f   :  { %v4168_v22 = vpop.permute.xlu1 %4167 }
0x1911   :  { %v7971_v39 = vpop.eup %7970 }
0x1912   :  { %v3925_v43 = vsel %vm889_vm4, %v7971_v39, 0.0 }
0x1913   :  { %3926 = vadd.xlane.f32.xlu0 %v3925_v43  ;;  %v4166_v52 = vpop.permute.xlu1 %4165  ;;  %v6911_v43 = vld [vmem:[%s9722_s28] ss:$0 sm:$0xff] }
0x1915   :  { %v7973_v46 = vpop.eup %7972 }
0x1916   :  { %v3928_v37 = vsel %vm889_vm4, %v7973_v46, 0.0 }
0x1917   :  { %3929 = vadd.xlane.f32.xlu0 %v3928_v37 }
0x192d   :  { %4087 = vrot.lane.b32.xlu0 %v9158_v41, %s8502_s15 }
0x199c   :  { %v3927_v40 = vpop.xlane.xlu0 %3926 }
0x199d   :  { %7974 = vrcp.f32 %v3927_v40 }
0x19a0   :  { %v3930_v19 = vpop.xlane.xlu0 %3929 }
0x19a1   :  { %7976 = vrcp.f32 %v3930_v19  ;;  %v2628_v19 = vadd.f32 %v9114_v11, %v6911_v43 }
0x19a4   :  { %v4088_v41 = vpop.permute.xlu0 %4087 }
0x19aa   :  { %v7975_v47 = vpop.eup %7974 }
0x19ab   :  { %v3933_v50 = vmul.f32 %v7975_v47, %v7971_v39 }
0x19ad   :  { %7589 = vmatmul.mubr.msk.f32.vlgmr.msra.gmra.mxu0 %vm889_vm4, %v3933_v50 }
0x19ae   :  { %v7977_v61 = vpop.eup %7976  ;;  %7597 = vmatpush3.xpose.msk.msra.mxu0 %vm889_vm4, %v4090_v45  ;;  %7598 = vmatprep.mubr.msk.f32.mxu0 %vm8498_vm3, %v8497_v5  ;;  %v2632_v45 = vadd.f32 %v2628_v19, %v9073_v15  ;;  %v4592_v19 = vld [vmem:[%s9726_s14 + $0x18] sm:$0xff] }
0x19af   :  { %v3934_v58 = vmul.f32 %v7977_v61, %v7973_v46  ;;  %7606 = vmatprep.subr.mxu0 %v8497_v5  ;;  %v2623_v46 = vadd.f32 %v6911_v43, %v9116_v44 }
0x19b0   :  { %v2636_v47 = vsel %vm579_vm2, %v2632_v45, 0.0 }
0x19b1   :  { %7594 = vmatmul.mubr.msk.f32.vlgmr.msra.gmra.mxu1 %vm889_vm4, %v3934_v58  ;;  %7599 = vmatmul.mubr.msk.f32.vlgmr.msra.gmra.mxu0 %vm889_vm4, %v4088_v41  ;;  %v2631_v37 = vadd.f32 %v2623_v46, %v9069_v13 }
0x19b2   :  { %7602 = vmatpush3.xpose.msk.msra.mxu1 %vm889_vm4, %v4168_v22  ;;  %7603 = vmatprep.mubr.msk.f32.mxu1 %vm8498_vm3, %v8497_v5 }
0x19b3   :  { %7611 = vmatprep.subr.mxu1 %v8497_v5  ;;  %7608 = vmatprep.mubr.msk.f32.mxu0 %vm8498_vm3, %v8497_v5  ;;  %v2633_v40 = vsel %vm579_vm2, %v2631_v37, 0.0 }
0x19b5   :  { %7604 = vmatmul.mubr.msk.f32.vlgmr.msra.gmra.mxu1 %vm889_vm4, %v4166_v52 }
0x19b6   :  { %7613 = vmatprep.mubr.msk.f32.mxu1 %vm8498_vm3, %v8497_v5 }
0x1a6d   :  { %v4007_v53 = vpop.f32.mrf.mxu0 }
0x1a6f   :  { %v7590_v54 = vpop.f32.mrf.mxu0 }
0x1a71   :  { %v4083_v56 = vpop.f32.mrf.mxu1  ;;  %v4161_v59 = vpop.f32.mrf.mxu0 }
0x1a72   :  { %v4243_v60 = vmul.f32 0.35355338, %v4161_v59 }
0x1a73   :  { %v7595_v62 = vpop.f32.mrf.mxu1  ;;  %v7600_v20 = vpop.f32.mrf.mxu0 }
0x1a74   :  { %v4245_v30 = vadd.f32 %v4243_v60, %v9186_v51 }
0x1a75   :  { %v4239_v63 = vpop.f32.mrf.mxu1 }
0x1a76   :  { %v4244_v23 = vmul.f32 0.35355338, %v4239_v63  ;;  %v4247_v0 = vsel %vm889_vm4, %v4245_v30, -inf  ;;  %v6955_v63 = vld [vmem:[#allocation19] ss:$0 sm:$0xff] }
0x1a77   :  { %4248 = vmax.xlane.f32.xlu0 %v4247_v0  ;;  %v7605_v55 = vpop.f32.mrf.mxu1 }
0x1a78   :  { %v4246_v57 = vadd.f32 %v4244_v23, %v9186_v51 }
0x1a7a   :  { %v4250_v1 = vsel %vm889_vm4, %v4246_v57, -inf }
0x1a7b   :  { %4251 = vmax.xlane.f32.xlu1 %v4250_v1 }
0x1a8c   :  { %4269 = vrot.lane.b32.xlu1 %v9174_v49, %s8502_s15 }
0x1a90   :  { %4423 = vrot.lane.b32.xlu1 %v9258_v2, %s8484_s7 }
0x1a94   :  { %4425 = vrot.lane.b32.xlu1 %v9260_v4, %s8484_s7 }
0x1a98   :  { %4433 = vrot.lane.b32.xlu1 %v4083_v56, %s8503_s21 }
0x1b00   :  { %v4249_v3 = vpop.xlane.xlu0 %4248 }
0x1b01   :  { %v4253_v6 = vsub.f32 %v4245_v30, %v4249_v3 }
0x1b03   :  { %v4255_v7 = vmul.f32 1.442695, %v4253_v6 }
0x1b04   :  { %v4252_v9 = vpop.xlane.xlu1 %4251 }
0x1b05   :  { %7978 = vpow2.f32 %v4255_v7  ;;  %v4254_v51 = vsub.f32 %v4246_v57, %v4252_v9 }
0x1b07   :  { %v4257_v21 = vmul.f32 1.442695, %v4254_v51 }
0x1b08   :  { %v4270_v16 = vpop.permute.xlu1 %4269 }
0x1b09   :  { %7980 = vpow2.f32 %v4257_v21  ;;  %7607 = vmatpush3.msra.mxu0 %v4270_v16 }
0x1b0a   :  { %7616 = vmatprep.subr.mxu0 %v4454_v34 }
0x1b0c   :  { %v4424_v50 = vpop.permute.xlu1 %4423 }
0x1b0d   :  { %v4445_v58 = vsel %vm889_vm4, %v9218_v10, %v4424_v50  ;;  %v4590_v50 = vld [vmem:[%s9726_s14 + $0x8] sm:$0xff] }
0x1b10   :  { %v4426_v61 = vpop.permute.xlu1 %4425 }
0x1b11   :  { %v4446_v15 = vsel %vm889_vm4, %v9220_v29, %v4426_v61 }
0x1b12   :  { %v7979_v18 = vpop.eup %7978 }
0x1b13   :  { %v4259_v49 = vsel %vm889_vm4, %v7979_v18, 0.0 }
0x1b14   :  { %4260 = vadd.xlane.f32.xlu0 %v4259_v49  ;;  %v4434_v41 = vpop.permute.xlu1 %4433 }
0x1b15   :  { %v4448_v11 = vsel %vm2244_vm6, %v4446_v15, %v4434_v41  ;;  %v4776_v41 = vld [vmem:[%s9727_s4 + $0x18] sm:$0xff] }
0x1b16   :  { %v7981_v2 = vpop.eup %7980 }
0x1b17   :  { %v4262_v24 = vsel %vm889_vm4, %v7981_v2, 0.0 }
0x1b18   :  { %4263 = vadd.xlane.f32.xlu0 %v4262_v24  ;;  %v6915_v24 = vld [vmem:[%s9724_s2] ss:$0 sm:$0xff] }
0x1b2e   :  { %4345 = vrot.lane.b32.xlu0 %v9172_v48, %s8502_s15  ;;  %v4453_v48 = vld [vmem:[%s9721_s20 + $0x10] sm:$0xff] }
0x1b32   :  { %4431 = vrot.lane.b32.xlu0 %v4007_v53, %s8503_s21 }
0x1b9d   :  { %v4261_v4 = vpop.xlane.xlu0 %4260 }
0x1b9e   :  { %7982 = vrcp.f32 %v4261_v4 }
0x1ba1   :  { %v4264_v25 = vpop.xlane.xlu0 %4263 }
0x1ba2   :  { %7984 = vrcp.f32 %v4264_v25 }
0x1ba5   :  { %v4346_v26 = vpop.permute.xlu0 %4345 }
0x1ba6   :  { %7612 = vmatpush3.msra.mxu1 %v4346_v26  ;;  %v4683_v26 = vld [vmem:[%s9725_s13 + $0x10] sm:$0xff] }
0x1ba7   :  { %7627 = vmatprep.subr.mxu1 %v4592_v19 }
0x1ba9   :  { %v4432_v22 = vpop.permute.xlu0 %4431 }
0x1baa   :  { %v4447_v44 = vsel %vm2244_vm6, %v4445_v58, %v4432_v22  ;;  %v4589_v58 = vld [vmem:[%s9726_s14] sm:$0xff] }
0x1bab   :  { %v7983_v28 = vpop.eup %7982 }
0x1bac   :  { %v4267_v32 = vmul.f32 %v7983_v28, %v7979_v18  ;;  %v4682_v28 = vld [vmem:[%s9725_s13 + $0x8] sm:$0xff] }
0x1bae   :  { %7609 = vmatmul.mubr.msk.f32.vlgmr.msra.gmra.mxu0 %vm889_vm4, %v4267_v32  ;;  %v4681_v32 = vld [vmem:[%s9725_s13] sm:$0xff] }
0x1baf   :  { %v7985_v31 = vpop.eup %7984  ;;  %7617 = vmatpush3.msra.mxu0 %v4454_v34 }
0x1bb0   :  { %v4268_v33 = vmul.f32 %v7985_v31, %v7981_v2  ;;  %7618 = vmatprep.subr.mxu0 %v4453_v48 }
0x1bb1   :  { %7619 = vmatpush3.msra.mxu0 %v4453_v48 }
0x1bb2   :  { %7614 = vmatmul.mubr.msk.f32.vlgmr.msra.gmra.mxu1 %vm889_vm4, %v4268_v33  ;;  %7620 = vmatprep.subr.mxu0 %v4452_v27 }
0x1bb3   :  { %7621 = vmatpush3.msra.mxu0 %v4452_v27  ;;  %7628 = vmatpush3.msra.mxu1 %v4592_v19 }
0x1bb4   :  { %7622 = vmatprep.subr.mxu0 %v4451_v35 }
0x1bb5   :  { %7623 = vmatpush3.msra.mxu0 %v4451_v35 }
0x1c6e   :  { %v4341_v36 = vpop.f32.mrf.mxu0 }
0x1c6f   :  { %4439 = vrot.lane.b32.xlu0 %v4341_v36, %s8504_s16 }
0x1c70   :  { %v7610_v8 = vpop.f32.mrf.mxu0 }
0x1c72   :  { %v4417_v14 = vpop.f32.mrf.mxu1 }
0x1c73   :  { %4441 = vrot.lane.b32.xlu1 %v4417_v14, %s8504_s16 }
0x1c74   :  { %v7615_v39 = vpop.f32.mrf.mxu1 }
0x1c8e   :  { %2634 = vadd.xlane.f32.xlu0 %v2633_v40 }
0x1c97   :  { %2637 = vadd.xlane.f32.xlu1 %v2636_v47 }
0x1ce1   :  { %v4440_v13 = vpop.permute.xlu0 %4439 }
0x1ce2   :  { %v4449_v52 = vsel %vm2247_vm5, %v4447_v44, %v4440_v13 }
0x1ce3   :  { %7624 = vmatprep.mubr.msk.f32.mxu0 %vm579_vm2, %v4449_v52 }
0x1ce5   :  { %v4442_v53 = vpop.permute.xlu1 %4441 }
0x1ce6   :  { %v4450_v54 = vsel %vm2247_vm5, %v4448_v11, %v4442_v53 }
0x1ce7   :  { %7625 = vmatmul.mubr.msk.f32.vlgmr.msra.gmra.mxu0 %vm579_vm2, %v4450_v54 }
0x1d17   :  { %v2635_v56 = vpop.xlane.xlu0 %2634 }
0x1d18   :  { %v2639_v10 = vmul.f32 0.03125, %v2635_v56  ;;  %v6958_v56 = vld [vmem:[#allocation6] ss:$0 sm:$0xff] }
0x1d1a   :  { %v2641_v59 = vsub.f32 %v2631_v37, %v2639_v10 }
0x1d1c   :  { %v2643_v60 = vmul.f32 %v2641_v59, %v2641_v59 }
0x1d1e   :  { %v2645_v62 = vsel %vm579_vm2, %v2643_v60, 0.0 }
0x1d1f   :  { %2646 = vadd.xlane.f32.xlu1 %v2645_v62 }
0x1d20   :  { %v2638_v20 = vpop.xlane.xlu1 %2637 }
0x1d21   :  { %v2640_v55 = vmul.f32 0.03125, %v2638_v20 }
0x1d23   :  { %v2642_v7 = vsub.f32 %v2632_v45, %v2640_v55  ;;  %v4591_v45 = vld [vmem:[%s9726_s14 + $0x10] sm:$0xff]  ;;  %v4773_v55 = vld [vmem:[%s9727_s4] sm:$0xff] }
0x1d24   :  { %7629 = vmatprep.subr.mxu1 %v4591_v45 }
0x1d25   :  { %v2644_v16 = vmul.f32 %v2642_v7, %v2642_v7  ;;  %7630 = vmatpush3.msra.mxu1 %v4591_v45 }
0x1d26   :  { %7631 = vmatprep.subr.mxu1 %v4590_v50 }
0x1d27   :  { %v2648_v18 = vsel %vm579_vm2, %v2644_v16, 0.0  ;;  %7632 = vmatpush3.msra.mxu1 %v4590_v50 }
0x1d28   :  { %7633 = vmatprep.subr.mxu1 %v4589_v58 }
0x1d29   :  { %7634 = vmatpush3.msra.mxu1 %v4589_v58 }
0x1d2a   :  { %7649 = vmatprep.subr.mxu1 %v4776_v41 }
0x1da7   :  { %v7626_v30 = vpop.f32.mrf.mxu0 }
0x1da8   :  { %v2647_v23 = vpop.xlane.xlu1 %2646  ;;  %v4540_v57 = vadd.f32 %v7626_v30, %v6955_v63 }
0x1da9   :  { %v2651_v0 = vmul.f32 0.03125, %v2647_v23  ;;  %v4534_v29 = vpop.f32.mrf.mxu0 }
0x1daa   :  { %v4535_v1 = vadd.f32 %v6955_v63, %v4534_v29  ;;  %v4544_v51 = vadd.f32 %v4540_v57, %v9130_v17  ;;  %v4684_v17 = vld [vmem:[%s9725_s13 + $0x18] sm:$0xff]  ;;  %v4774_v29 = vld [vmem:[%s9727_s4 + $0x8] sm:$0xff] }
0x1dab   :  { %v2653_v3 = vadd.f32 1e-05, %v2651_v0  ;;  %7638 = vmatprep.subr.mxu0 %v4684_v17  ;;  %v4775_v0 = vld [vmem:[%s9727_s4 + $0x10] sm:$0xff]  ;;  %v6963_v57 = vld [vmem:[#allocation22] ss:$0 sm:$0xff] }
0x1dac   :  { %v4543_v6 = vadd.f32 %v4535_v1, %v9128_v12  ;;  %v4548_v21 = vsel %vm579_vm2, %v4544_v51, 0.0  ;;  %v6914_v12 = vld [vmem:[%s9723_s1] ss:$0 sm:$0xff]  ;;  %7639 = vmatpush3.msra.mxu0 %v4684_v17 }
0x1dad   :  { %7986 = vrsqrt.f32 %v2653_v3  ;;  %7640 = vmatprep.subr.mxu0 %v4683_v26 }
0x1dae   :  { %v4545_v9 = vsel %vm579_vm2, %v4543_v6, 0.0  ;;  %7641 = vmatpush3.msra.mxu0 %v4683_v26 }
0x1daf   :  { %4546 = vadd.xlane.f32.xlu0 %v4545_v9  ;;  %7642 = vmatprep.subr.mxu0 %v4682_v28  ;;  %v6960_v9 = vld [vmem:[#allocation21] ss:$0 sm:$0xff] }
0x1db0   :  { %7643 = vmatpush3.msra.mxu0 %v4682_v28 }
0x1db1   :  { %7644 = vmatprep.subr.mxu0 %v4681_v32 }
0x1db2   :  { %7645 = vmatpush3.msra.mxu0 %v4681_v32 }
0x1db3   :  { %4549 = vadd.xlane.f32.xlu0 %v4548_v21  ;;  %7660 = vmatprep.subr.mxu0 %v8497_v5 }
0x1db7   :  { %2649 = vadd.xlane.f32.xlu0 %v2648_v18 }
0x1dba   :  { %v7987_v49 = vpop.eup %7986 }
0x1dbb   :  { %v2657_v2 = vmul.f32 %v7987_v49, %v2641_v59  ;;  %v6959_v59 = vld [vmem:[#allocation7] ss:$0 sm:$0xff]  ;;  %v6966_v49 = vld [vmem:[%s9728_s12] ss:$0 sm:$0xff] }
0x1dbd   :  { %v2666_v4 = vmul.f32 %v6914_v12, %v2657_v2 }
0x1dbf   :  { %v9347_v25 = vadd.f32 %v6915_v24, %v2666_v4 }
0x1dc1   :  { %7646 = vmatprep.mubr.msk.f32.mxu0 %vm579_vm2, %v9347_v25 }
0x1e38   :  { %v4547_v31 = vpop.xlane.xlu0 %4546 }
0x1e39   :  { %v4551_v33 = vmul.f32 0.03125, %v4547_v31 }
0x1e3b   :  { %v4553_v34 = vsub.f32 %v4543_v6, %v4551_v33 }
0x1e3c   :  { %v4550_v48 = vpop.xlane.xlu0 %4549 }
0x1e3d   :  { %v4552_v27 = vmul.f32 0.03125, %v4550_v48  ;;  %v4555_v35 = vmul.f32 %v4553_v34, %v4553_v34 }
0x1e3f   :  { %v4554_v36 = vsub.f32 %v4544_v51, %v4552_v27  ;;  %v4557_v8 = vsel %vm579_vm2, %v4555_v35, 0.0 }
0x1e40   :  { %4558 = vadd.xlane.f32.xlu1 %v4557_v8  ;;  %v2650_v14 = vpop.xlane.xlu0 %2649 }
0x1e41   :  { %v2652_v39 = vmul.f32 0.03125, %v2650_v14  ;;  %v4556_v43 = vmul.f32 %v4554_v36, %v4554_v36 }
0x1e43   :  { %v2654_v46 = vadd.f32 1e-05, %v2652_v39  ;;  %v4560_v37 = vsel %vm579_vm2, %v4556_v43, 0.0 }
0x1e44   :  { %4561 = vadd.xlane.f32.xlu0 %v4560_v37 }
0x1e45   :  { %7988 = vrsqrt.f32 %v2654_v46 }
0x1e52   :  { %v7989_v40 = vpop.eup %7988 }
0x1e53   :  { %v2658_v47 = vmul.f32 %v7989_v40, %v2642_v7 }
0x1e55   :  { %v2667_v61 = vmul.f32 %v6914_v12, %v2658_v47 }
0x1e57   :  { %v2676_v22 = vadd.f32 %v6915_v24, %v2667_v61 }
0x1e59   :  { %7647 = vmatmul.mubr.msk.f32.vlgmr.msra.gmra.mxu0 %vm579_vm2, %v2676_v22 }
0x1e5a   :  { %7662 = vmatprep.mubr.msk.f32.mxu0 %vm8498_vm3, %v8497_v5 }
0x1ec9   :  { %v4559_v44 = vpop.xlane.xlu1 %4558 }
0x1eca   :  { %v4563_v13 = vmul.f32 0.03125, %v4559_v44 }
0x1ecc   :  { %v4565_v52 = vadd.f32 1e-05, %v4563_v13 }
0x1ecd   :  { %v4562_v15 = vpop.xlane.xlu0 %4561 }
0x1ece   :  { %7990 = vrsqrt.f32 %v4565_v52  ;;  %v4564_v11 = vmul.f32 0.03125, %v4562_v15 }
0x1ed0   :  { %v4566_v53 = vadd.f32 1e-05, %v4564_v11 }
0x1ed2   :  { %7992 = vrsqrt.f32 %v4566_v53 }
0x1edb   :  { %v7991_v54 = vpop.eup %7990 }
0x1edc   :  { %v4569_v10 = vmul.f32 %v7991_v54, %v4553_v34 }
0x1ede   :  { %v4578_v60 = vmul.f32 %v6958_v56, %v4569_v10 }
0x1edf   :  { %v7993_v62 = vpop.eup %7992 }
0x1ee0   :  { %v4570_v20 = vmul.f32 %v7993_v62, %v4554_v36  ;;  %v9366_v30 = vadd.f32 %v6959_v59, %v4578_v60 }
0x1ee2   :  { %v4579_v63 = vmul.f32 %v6958_v56, %v4570_v20  ;;  %7635 = vmatprep.mubr.msk.f32.mxu1 %vm579_vm2, %v9366_v30 }
0x1ee4   :  { %v9370_v23 = vadd.f32 %v6959_v59, %v4579_v63 }
0x1ee6   :  { %7636 = vmatmul.mubr.msk.f32.vlgmr.msra.gmra.mxu1 %vm579_vm2, %v9370_v23 }
0x1ee7   :  { %7650 = vmatpush3.msra.mxu1 %v4776_v41  ;;  %7657 = vmatprep.mubr.msk.f32.mxu1 %vm579_vm2, %v9347_v25 }
0x1ee8   :  { %7651 = vmatprep.subr.mxu1 %v4775_v0 }
0x1ee9   :  { %7652 = vmatpush3.msra.mxu1 %v4775_v0 }
0x1eea   :  { %7653 = vmatprep.subr.mxu1 %v4774_v29 }
0x1eeb   :  { %7654 = vmatpush3.msra.mxu1 %v4774_v29 }
0x1eec   :  { %7655 = vmatprep.subr.mxu1 %v4773_v55 }
0x1eed   :  { %7656 = vmatpush3.msra.mxu1 %v4773_v55 }
0x1eee   :  { %7658 = vmatmul.mubr.msk.f32.vlgmr.msra.gmra.mxu1 %vm579_vm2, %v2676_v22  ;;  %7665 = vmatprep.subr.mxu1 %v8497_v5 }
0x1eef   :  { %7667 = vmatprep.mubr.msk.f32.mxu1 %vm8498_vm3, %v8497_v5 }
0x1f19   :  { %v7648_v1 = vpop.f32.mrf.mxu0 }
0x1f1a   :  { %v9383_v3 = vadd.f32 %v7648_v1, %v6963_v57 }
0x1f1b   :  { %v4764_v6 = vpop.f32.mrf.mxu0 }
0x1f1c   :  { %v9385_v7 = vadd.f32 %v6963_v57, %v4764_v6  ;;  %7666 = vmatpush3.xpose.msk.msra.mxu1 %vm889_vm4, %v9383_v3 }
0x1f1d   :  { %7675 = vmatprep.subr.mxu1 %v8497_v5 }
0x1f1e   :  { %7661 = vmatpush3.xpose.msk.msra.mxu0 %vm889_vm4, %v9385_v7 }
0x1f1f   :  { %7670 = vmatprep.subr.mxu0 %v8497_v5 }
0x1fa6   :  { %v7637_v51 = vpop.f32.mrf.mxu1 }
0x1fa7   :  { %v9393_v21 = vadd.f32 %v7637_v51, %v6960_v9 }
0x1fa8   :  { %v4672_v16 = vpop.f32.mrf.mxu1 }
0x1fa9   :  { %v9395_v18 = vadd.f32 %v6960_v9, %v4672_v16  ;;  %7668 = vmatmul.mubr.msk.f32.vlgmr.msra.gmra.mxu1 %vm889_vm4, %v9393_v21 }
0x1faa   :  { %7677 = vmatprep.mubr.msk.f32.mxu1 %vm8498_vm3, %v8497_v5 }
0x1fab   :  { %7663 = vmatmul.mubr.msk.f32.vlgmr.msra.gmra.mxu0 %vm889_vm4, %v9395_v18 }
0x1fac   :  { %7672 = vmatprep.mubr.msk.f32.mxu0 %vm8498_vm3, %v8497_v5 }
0x1fae   :  { %v7659_v12 = vpop.f32.mrf.mxu1 }
0x1faf   :  { %v9406_v2 = vadd.f32 %v7659_v12, %v6966_v49 }
0x1fb0   :  { %v4850_v24 = vpop.f32.mrf.mxu1 }
0x1fb1   :  { %v9408_v4 = vadd.f32 %v6966_v49, %v4850_v24  ;;  %7676 = vmatpush3.msra.mxu1 %v9406_v2 }
0x1fb2   :  { %7685 = vmatprep.subr.mxu1 %v8497_v5 }
0x1fb3   :  { %7671 = vmatpush3.msra.mxu0 %v9408_v4 }
0x1fb4   :  { %7680 = vmatprep.subr.mxu0 %v8497_v5 }
0x2069   :  { %v5007_v25 = vpop.f32.mrf.mxu1 }
0x206a   :  { %v5012_v17 = vmul.f32 0.35355338, %v5007_v25 }
0x206b   :  { %v4931_v26 = vpop.f32.mrf.mxu0  ;;  %v7669_v28 = vpop.f32.mrf.mxu1 }
0x206c   :  { %v5014_v32 = vadd.f32 %v5012_v17, %v8909_v42  ;;  %v5011_v31 = vmul.f32 0.35355338, %v4931_v26 }
0x206d   :  { %v7664_v33 = vpop.f32.mrf.mxu0 }
0x206e   :  { %v5013_v34 = vadd.f32 %v5011_v31, %v8907_v38  ;;  %v5018_v48 = vsel %vm889_vm4, %v5014_v32, -inf }
0x206f   :  { %5019 = vmax.xlane.f32.xlu0 %v5018_v48 }
0x2070   :  { %v5015_v27 = vsel %vm889_vm4, %v5013_v34, -inf }
0x2071   :  { %5016 = vmax.xlane.f32.xlu1 %v5015_v27 }
0x2082   :  { %5185 = vrot.lane.b32.xlu1 %v9385_v7, %s8499_s10 }
0x2086   :  { %5183 = vrot.lane.b32.xlu1 %v9395_v18, %s8499_s10 }
0x20f8   :  { %v5020_v35 = vpop.xlane.xlu0 %5019 }
0x20f9   :  { %v5022_v36 = vsub.f32 %v5014_v32, %v5020_v35 }
0x20fa   :  { %v5017_v8 = vpop.xlane.xlu1 %5016 }
0x20fb   :  { %v5025_v14 = vmul.f32 1.442695, %v5022_v36  ;;  %v5021_v39 = vsub.f32 %v5013_v34, %v5017_v8 }
0x20fd   :  { %7994 = vpow2.f32 %v5025_v14  ;;  %v5023_v43 = vmul.f32 1.442695, %v5021_v39 }
0x20fe   :  { %v5186_v45 = vpop.permute.xlu1 %5185 }
0x20ff   :  { %7996 = vpow2.f32 %v5023_v43 }
0x2102   :  { %v5184_v47 = vpop.permute.xlu1 %5183 }
0x210a   :  { %v7995_v46 = vpop.eup %7994 }
0x210b   :  { %v5030_v37 = vsel %vm889_vm4, %v7995_v46, 0.0 }
0x210c   :  { %v7997_v40 = vpop.eup %7996  ;;  %5031 = vadd.xlane.f32.xlu0 %v5030_v37 }
0x210d   :  { %v5027_v19 = vsel %vm889_vm4, %v7997_v40, 0.0 }
0x210e   :  { %5028 = vadd.xlane.f32.xlu1 %v5027_v19 }
0x211f   :  { %5261 = vrot.lane.b32.xlu1 %v9393_v21, %s8499_s10 }
0x2122   :  { %5263 = vrot.lane.b32.xlu0 %v9383_v3, %s8499_s10 }
0x2195   :  { %v5032_v50 = vpop.xlane.xlu0 %5031 }
0x2196   :  { %7998 = vrcp.f32 %v5032_v50 }
0x2197   :  { %v5029_v61 = vpop.xlane.xlu1 %5028 }
0x2198   :  { %8000 = vrcp.f32 %v5029_v61 }
0x2199   :  { %v5264_v44 = vpop.permute.xlu0 %5263 }
0x219b   :  { %v5262_v52 = vpop.permute.xlu1 %5261 }
0x21a3   :  { %v7999_v22 = vpop.eup %7998 }
0x21a4   :  { %v5036_v58 = vmul.f32 %v7999_v22, %v7995_v46 }
0x21a5   :  { %v8001_v41 = vpop.eup %8000 }
0x21a6   :  { %7678 = vmatmul.mubr.msk.f32.vlgmr.msra.gmra.mxu1 %vm889_vm4, %v5036_v58  ;;  %v5035_v13 = vmul.f32 %v8001_v41, %v7997_v40 }
0x21a7   :  { %7686 = vmatpush3.xpose.msk.msra.mxu1 %vm889_vm4, %v5264_v44  ;;  %7687 = vmatprep.mubr.msk.f32.mxu1 %vm8498_vm3, %v8497_v5 }
0x21a8   :  { %7673 = vmatmul.mubr.msk.f32.vlgmr.msra.gmra.mxu0 %vm889_vm4, %v5035_v13  ;;  %7695 = vmatprep.subr.mxu1 %v8497_v5 }
0x21a9   :  { %7681 = vmatpush3.xpose.msk.msra.mxu0 %vm889_vm4, %v5186_v45  ;;  %7682 = vmatprep.mubr.msk.f32.mxu0 %vm8498_vm3, %v8497_v5 }
0x21aa   :  { %7688 = vmatmul.mubr.msk.f32.vlgmr.msra.gmra.mxu1 %vm889_vm4, %v5262_v52  ;;  %7690 = vmatprep.subr.mxu0 %v8497_v5 }
0x21ab   :  { %7697 = vmatprep.mubr.msk.f32.mxu1 %vm8498_vm3, %v8497_v5 }
0x21ac   :  { %7683 = vmatmul.mubr.msk.f32.vlgmr.msra.gmra.mxu0 %vm889_vm4, %v5184_v47 }
0x21ad   :  { %7692 = vmatprep.mubr.msk.f32.mxu0 %vm8498_vm3, %v8497_v5 }
0x2266   :  { %v9444_v15 = vpop.f32.mrf.mxu1 }
0x2268   :  { %v9446_v11 = vpop.f32.mrf.mxu0  ;;  %v7679_v53 = vpop.f32.mrf.mxu1 }
0x226a   :  { %v7674_v54 = vpop.f32.mrf.mxu0  ;;  %v5335_v56 = vpop.f32.mrf.mxu1 }
0x226b   :  { %v5340_v10 = vmul.f32 0.35355338, %v5335_v56 }
0x226c   :  { %v5257_v59 = vpop.f32.mrf.mxu0  ;;  %v7689_v60 = vpop.f32.mrf.mxu1 }
0x226d   :  { %v5342_v62 = vadd.f32 %v5340_v10, %v8909_v42  ;;  %v5339_v20 = vmul.f32 0.35355338, %v5257_v59 }
0x226e   :  { %v7684_v63 = vpop.f32.mrf.mxu0 }
0x226f   :  { %v5341_v0 = vadd.f32 %v5339_v20, %v8907_v38  ;;  %v5346_v29 = vsel %vm889_vm4, %v5342_v62, -inf }
0x2270   :  { %5347 = vmax.xlane.f32.xlu1 %v5346_v29 }
0x2271   :  { %v5343_v55 = vsel %vm889_vm4, %v5341_v0, -inf }
0x2272   :  { %5344 = vmax.xlane.f32.xlu0 %v5343_v55 }
0x2281   :  { %5366 = vrot.lane.b32.xlu1 %v9408_v4, %s8499_s10 }
0x2285   :  { %5521 = vrot.lane.b32.xlu1 %v9385_v7, %s8501_s11 }
0x2289   :  { %5599 = vrot.lane.b32.xlu1 %v9383_v3, %s8501_s11 }
0x228d   :  { %5597 = vrot.lane.b32.xlu1 %v9393_v21, %s8501_s11 }
0x22f9   :  { %v5348_v57 = vpop.xlane.xlu1 %5347 }
0x22fa   :  { %v5350_v1 = vsub.f32 %v5342_v62, %v5348_v57 }
0x22fb   :  { %v5345_v6 = vpop.xlane.xlu0 %5344 }
0x22fc   :  { %v5353_v9 = vmul.f32 1.442695, %v5350_v1  ;;  %v5349_v51 = vsub.f32 %v5341_v0, %v5345_v6 }
0x22fd   :  { %v5367_v16 = vpop.permute.xlu1 %5366 }
0x22fe   :  { %8002 = vpow2.f32 %v5353_v9  ;;  %v5351_v49 = vmul.f32 1.442695, %v5349_v51  ;;  %7691 = vmatpush3.msra.mxu0 %v5367_v16 }
0x22ff   :  { %7700 = vmatprep.subr.mxu0 %v8497_v5 }
0x2300   :  { %8004 = vpow2.f32 %v5351_v49 }
0x2301   :  { %v5522_v32 = vpop.permute.xlu1 %5521 }
0x2305   :  { %v5600_v34 = vpop.permute.xlu1 %5599 }
0x2309   :  { %v5598_v36 = vpop.permute.xlu1 %5597 }
0x230b   :  { %v8003_v12 = vpop.eup %8002 }
0x230c   :  { %v5358_v24 = vsel %vm889_vm4, %v8003_v12, 0.0 }
0x230d   :  { %v8005_v25 = vpop.eup %8004  ;;  %5359 = vadd.xlane.f32.xlu0 %v5358_v24 }
0x230e   :  { %v5355_v17 = vsel %vm889_vm4, %v8005_v25, 0.0 }
0x2311   :  { %5356 = vadd.xlane.f32.xlu0 %v5355_v17 }
0x2327   :  { %5443 = vrot.lane.b32.xlu0 %v9406_v2, %s8499_s10 }
0x232b   :  { %5519 = vrot.lane.b32.xlu0 %v9395_v18, %s8501_s11 }
0x2396   :  { %v5360_v26 = vpop.xlane.xlu0 %5359 }
0x2397   :  { %8006 = vrcp.f32 %v5360_v26 }
0x239a   :  { %v5357_v28 = vpop.xlane.xlu0 %5356 }
0x239b   :  { %8008 = vrcp.f32 %v5357_v28 }
0x239e   :  { %v5444_v31 = vpop.permute.xlu0 %5443 }
0x239f   :  { %7696 = vmatpush3.msra.mxu1 %v5444_v31 }
0x23a0   :  { %7705 = vmatprep.subr.mxu1 %v8497_v5 }
0x23a2   :  { %v5520_v8 = vpop.permute.xlu0 %5519 }
0x23a4   :  { %v8007_v33 = vpop.eup %8006 }
0x23a5   :  { %v5364_v48 = vmul.f32 %v8007_v33, %v8003_v12 }
0x23a7   :  { %7698 = vmatmul.mubr.msk.f32.vlgmr.msra.gmra.mxu1 %vm889_vm4, %v5364_v48 }
0x23a8   :  { %v8009_v27 = vpop.eup %8008  ;;  %7706 = vmatpush3.xpose.msk.msra.mxu1 %vm889_vm4, %v5600_v34  ;;  %7707 = vmatprep.mubr.msk.f32.mxu1 %vm8498_vm3, %v8497_v5 }
0x23a9   :  { %v5363_v35 = vmul.f32 %v8009_v27, %v8005_v25  ;;  %7715 = vmatprep.subr.mxu1 %v8497_v5 }
0x23ab   :  { %7693 = vmatmul.mubr.msk.f32.vlgmr.msra.gmra.mxu0 %vm889_vm4, %v5363_v35  ;;  %7708 = vmatmul.mubr.msk.f32.vlgmr.msra.gmra.mxu1 %vm889_vm4, %v5598_v36 }
0x23ac   :  { %7701 = vmatpush3.xpose.msk.msra.mxu0 %vm889_vm4, %v5522_v32  ;;  %7702 = vmatprep.mubr.msk.f32.mxu0 %vm8498_vm3, %v8497_v5 }
0x23ad   :  { %7710 = vmatprep.subr.mxu0 %v8497_v5  ;;  %7717 = vmatprep.mubr.msk.f32.mxu1 %vm8498_vm3, %v8497_v5 }
0x23af   :  { %7703 = vmatmul.mubr.msk.f32.vlgmr.msra.gmra.mxu0 %vm889_vm4, %v5520_v8 }
0x23b0   :  { %7712 = vmatprep.mubr.msk.f32.mxu0 %vm8498_vm3, %v8497_v5 }
0x2467   :  { %v9484_v14 = vpop.f32.mrf.mxu1 }
0x2469   :  { %v7699_v39 = vpop.f32.mrf.mxu1 }
0x246b   :  { %v9486_v43 = vpop.f32.mrf.mxu0  ;;  %v5671_v46 = vpop.f32.mrf.mxu1 }
0x246c   :  { %v5676_v37 = vmul.f32 0.35355338, %v5671_v46 }
0x246d   :  { %v7694_v40 = vpop.f32.mrf.mxu0  ;;  %v7709_v19 = vpop.f32.mrf.mxu1 }
0x246e   :  { %v5678_v45 = vadd.f32 %v5676_v37, %v8909_v42 }
0x246f   :  { %v5593_v47 = vpop.f32.mrf.mxu0 }
0x2470   :  { %v5675_v50 = vmul.f32 0.35355338, %v5593_v47  ;;  %v5682_v61 = vsel %vm889_vm4, %v5678_v45, -inf }
0x2471   :  { %5683 = vmax.xlane.f32.xlu1 %v5682_v61  ;;  %v7704_v22 = vpop.f32.mrf.mxu0 }
0x2472   :  { %v5677_v58 = vadd.f32 %v5675_v50, %v8907_v38 }
0x2474   :  { %v5679_v41 = vsel %vm889_vm4, %v5677_v58, -inf }
0x2475   :  { %5680 = vmax.xlane.f32.xlu0 %v5679_v41 }
0x2482   :  { %5701 = vrot.lane.b32.xlu1 %v9408_v4, %s8501_s11 }
0x2486   :  { %5855 = vrot.lane.b32.xlu1 %v9385_v7, %s8502_s15 }
0x248a   :  { %5933 = vrot.lane.b32.xlu1 %v9383_v3, %s8502_s15 }
0x248e   :  { %5931 = vrot.lane.b32.xlu1 %v9393_v21, %s8502_s15 }
0x24fa   :  { %v5684_v44 = vpop.xlane.xlu1 %5683 }
0x24fb   :  { %v5686_v13 = vsub.f32 %v5678_v45, %v5684_v44 }
0x24fd   :  { %v5689_v52 = vmul.f32 1.442695, %v5686_v13 }
0x24fe   :  { %v5702_v53 = vpop.permute.xlu1 %5701  ;;  %v5681_v54 = vpop.xlane.xlu0 %5680 }
0x24ff   :  { %8010 = vpow2.f32 %v5689_v52  ;;  %v5685_v56 = vsub.f32 %v5677_v58, %v5681_v54  ;;  %7711 = vmatpush3.msra.mxu0 %v5702_v53 }
0x2500   :  { %7720 = vmatprep.subr.mxu0 %v8497_v5 }
0x2501   :  { %v5687_v10 = vmul.f32 1.442695, %v5685_v56 }
0x2502   :  { %v5856_v20 = vpop.permute.xlu1 %5855 }
0x2503   :  { %8012 = vpow2.f32 %v5687_v10 }
0x2506   :  { %v5934_v29 = vpop.permute.xlu1 %5933 }
0x250a   :  { %v5932_v1 = vpop.permute.xlu1 %5931 }
0x250c   :  { %v8011_v59 = vpop.eup %8010 }
0x250d   :  { %v5694_v7 = vsel %vm889_vm4, %v8011_v59, 0.0 }
0x250e   :  { %5695 = vadd.xlane.f32.xlu0 %v5694_v7 }
0x2510   :  { %v8013_v3 = vpop.eup %8012 }
0x2511   :  { %v5691_v60 = vsel %vm889_vm4, %v8013_v3, 0.0 }
0x2512   :  { %5692 = vadd.xlane.f32.xlu0 %v5691_v60 }
0x2528   :  { %5777 = vrot.lane.b32.xlu0 %v9406_v2, %s8501_s11 }
0x252c   :  { %5853 = vrot.lane.b32.xlu0 %v9395_v18, %s8502_s15 }
0x2597   :  { %v5696_v21 = vpop.xlane.xlu0 %5695 }
0x2598   :  { %8014 = vrcp.f32 %v5696_v21 }
0x259b   :  { %v5693_v62 = vpop.xlane.xlu0 %5692 }
0x259c   :  { %8016 = vrcp.f32 %v5693_v62 }
0x259f   :  { %v5778_v63 = vpop.permute.xlu0 %5777 }
0x25a0   :  { %7716 = vmatpush3.msra.mxu1 %v5778_v63  ;;  %v6993_v63 = vld [vmem:[#allocation24] ss:$0 sm:$0xff] }
0x25a1   :  { %7725 = vmatprep.subr.mxu1 %v8497_v5 }
0x25a3   :  { %v5854_v6 = vpop.permute.xlu0 %5853 }
0x25a5   :  { %v8015_v0 = vpop.eup %8014 }
0x25a6   :  { %v5700_v55 = vmul.f32 %v8015_v0, %v8011_v59 }
0x25a8   :  { %7718 = vmatmul.mubr.msk.f32.vlgmr.msra.gmra.mxu1 %vm889_vm4, %v5700_v55 }
0x25a9   :  { %v8017_v57 = vpop.eup %8016  ;;  %7726 = vmatpush3.xpose.msk.msra.mxu1 %vm889_vm4, %v5934_v29  ;;  %7727 = vmatprep.mubr.msk.f32.mxu1 %vm8498_vm3, %v8497_v5 }
0x25aa   :  { %v5699_v18 = vmul.f32 %v8017_v57, %v8013_v3  ;;  %7735 = vmatprep.subr.mxu1 %v8497_v5 }
0x25ac   :  { %7713 = vmatmul.mubr.msk.f32.vlgmr.msra.gmra.mxu0 %vm889_vm4, %v5699_v18  ;;  %7728 = vmatmul.mubr.msk.f32.vlgmr.msra.gmra.mxu1 %vm889_vm4, %v5932_v1 }
0x25ad   :  { %7721 = vmatpush3.xpose.msk.msra.mxu0 %vm889_vm4, %v5856_v20  ;;  %7722 = vmatprep.mubr.msk.f32.mxu0 %vm8498_vm3, %v8497_v5 }
0x25ae   :  { %7730 = vmatprep.subr.mxu0 %v8497_v5  ;;  %7737 = vmatprep.mubr.msk.f32.mxu1 %vm8498_vm3, %v8497_v5 }
0x25b0   :  { %7723 = vmatmul.mubr.msk.f32.vlgmr.msra.gmra.mxu0 %vm889_vm4, %v5854_v6 }
0x25b1   :  { %7732 = vmatprep.mubr.msk.f32.mxu0 %vm8498_vm3, %v8497_v5 }
0x2668   :  { %v5849_v9 = vpop.f32.mrf.mxu1 }
0x266a   :  { %v7719_v51 = vpop.f32.mrf.mxu1 }
0x266c   :  { %v5773_v16 = vpop.f32.mrf.mxu0  ;;  %v6005_v49 = vpop.f32.mrf.mxu1 }
0x266d   :  { %v6010_v12 = vmul.f32 0.35355338, %v6005_v49 }
0x266e   :  { %v7714_v24 = vpop.f32.mrf.mxu0  ;;  %v7729_v25 = vpop.f32.mrf.mxu1 }
0x266f   :  { %v6012_v17 = vadd.f32 %v6010_v12, %v8909_v42 }
0x2670   :  { %v5927_v26 = vpop.f32.mrf.mxu0 }
0x2671   :  { %v6009_v28 = vmul.f32 0.35355338, %v5927_v26  ;;  %v6016_v32 = vsel %vm889_vm4, %v6012_v17, -inf  ;;  %v6357_v26 = vld [vmem:[#allocation25 + $0x10] sm:$0xff] }
0x2672   :  { %6017 = vmax.xlane.f32.xlu1 %v6016_v32  ;;  %v7724_v31 = vpop.f32.mrf.mxu0  ;;  %v6355_v32 = vld [vmem:[#allocation25] sm:$0xff] }
0x2673   :  { %v6011_v33 = vadd.f32 %v6009_v28, %v8907_v38  ;;  %v6356_v28 = vld [vmem:[#allocation25 + $0x8] sm:$0xff] }
0x2675   :  { %v6013_v34 = vsel %vm889_vm4, %v6011_v33, -inf }
0x2676   :  { %6014 = vmax.xlane.f32.xlu0 %v6013_v34 }
0x2683   :  { %6035 = vrot.lane.b32.xlu1 %v9408_v4, %s8502_s15 }
0x2687   :  { %6189 = vrot.lane.b32.xlu1 %v9486_v43, %s8484_s7 }
0x268b   :  { %6191 = vrot.lane.b32.xlu1 %v9484_v14, %s8484_s7  ;;  %s9729_s7 = sld [smem:[#allocation70_spill]] }
0x268f   :  { %6199 = vrot.lane.b32.xlu1 %v5849_v9, %s8503_s21 }
0x2691   :  { %v6219_v50 = vld [vmem:[%s9729_s7 + $0x10] sm:$0xff]  ;;  %v6218_v61 = vld [vmem:[%s9729_s7 + $0x8] sm:$0xff]  ;;  %v6217_v22 = vld [vmem:[%s9729_s7] sm:$0xff] }
0x26fb   :  { %v6018_v5 = vpop.xlane.xlu1 %6017 }
0x26fc   :  { %v6020_v42 = vsub.f32 %v6012_v17, %v6018_v5 }
0x26fe   :  { %v6023_v48 = vmul.f32 1.442695, %v6020_v42 }
0x26ff   :  { %v6036_v27 = vpop.permute.xlu1 %6035  ;;  %v6015_v35 = vpop.xlane.xlu0 %6014 }
0x2700   :  { %8018 = vpow2.f32 %v6023_v48  ;;  %v6019_v38 = vsub.f32 %v6011_v33, %v6015_v35  ;;  %7731 = vmatpush3.msra.mxu0 %v6036_v27  ;;  %v6996_v35 = vld [vmem:[#allocation9] ss:$0 sm:$0xff] }
0x2702   :  { %v6021_v36 = vmul.f32 1.442695, %v6019_v38 }
0x2703   :  { %v6190_v52 = vpop.permute.xlu1 %6189 }
0x2704   :  { %8020 = vpow2.f32 %v6021_v36  ;;  %v6211_v10 = vsel %vm889_vm4, %v9446_v11, %v6190_v52  ;;  %v6997_v36 = vld [vmem:[#allocation10] ss:$0 sm:$0xff] }
0x2707   :  { %v6192_v53 = vpop.permute.xlu1 %6191 }
0x2708   :  { %v6212_v7 = vsel %vm889_vm4, %v9444_v15, %v6192_v53 }
0x270b   :  { %v6200_v54 = vpop.permute.xlu1 %6199 }
0x270c   :  { %v6214_v21 = vsel %vm2244_vm6, %v6212_v7, %v6200_v54 }
0x270d   :  { %v8019_v8 = vpop.eup %8018 }
0x270e   :  { %v6028_v4 = vsel %vm889_vm4, %v8019_v8, 0.0 }
0x270f   :  { %6029 = vadd.xlane.f32.xlu0 %v6028_v4 }
0x2711   :  { %v8021_v39 = vpop.eup %8020 }
0x2712   :  { %v6025_v43 = vsel %vm889_vm4, %v8021_v39, 0.0 }
0x2713   :  { %6026 = vadd.xlane.f32.xlu0 %v6025_v43 }
0x2729   :  { %6111 = vrot.lane.b32.xlu0 %v9406_v2, %s8502_s15  ;;  %v6220_v2 = vld [vmem:[%s9729_s7 + $0x18] sm:$0xff] }
0x272a   :  { %7740 = vmatprep.subr.mxu0 %v6220_v2 }
0x272d   :  { %6197 = vrot.lane.b32.xlu0 %v5773_v16, %s8503_s21 }
0x2798   :  { %v6030_v14 = vpop.xlane.xlu0 %6029 }
0x2799   :  { %8022 = vrcp.f32 %v6030_v14 }
0x279c   :  { %v6027_v46 = vpop.xlane.xlu0 %6026 }
0x279d   :  { %8024 = vrcp.f32 %v6027_v46 }
0x27a0   :  { %v6112_v37 = vpop.permute.xlu0 %6111 }
0x27a1   :  { %7736 = vmatpush3.msra.mxu1 %v6112_v37  ;;  %v6508_v37 = vld [vmem:[%s8769_s8 + $0x38] sm:$0xff] }
0x27a4   :  { %v6198_v56 = vpop.permute.xlu0 %6197 }
0x27a5   :  { %v6213_v3 = vsel %vm2244_vm6, %v6211_v10, %v6198_v56 }
0x27a6   :  { %v8023_v40 = vpop.eup %8022 }
0x27a7   :  { %v6034_v19 = vmul.f32 %v8023_v40, %v8019_v8  ;;  %v6507_v40 = vld [vmem:[%s8769_s8 + $0x30] sm:$0xff] }
0x27a9   :  { %7738 = vmatmul.mubr.msk.f32.vlgmr.msra.gmra.mxu1 %vm889_vm4, %v6034_v19  ;;  %v6506_v19 = vld [vmem:[%s8769_s8 + $0x28] sm:$0xff] }
0x27aa   :  { %v8025_v45 = vpop.eup %8024 }
0x27ab   :  { %v6033_v47 = vmul.f32 %v8025_v45, %v8021_v39  ;;  %v6505_v45 = vld [vmem:[%s8769_s8 + $0x20] sm:$0xff] }
0x27ad   :  { %7733 = vmatmul.mubr.msk.f32.vlgmr.msra.gmra.mxu0 %vm889_vm4, %v6033_v47  ;;  %v6504_v47 = vld [vmem:[%s8769_s8 + $0x18] sm:$0xff] }
0x27ae   :  { %7741 = vmatpush3.msra.mxu0 %v6220_v2  ;;  %v6503_v2 = vld [vmem:[%s8769_s8 + $0x10] sm:$0xff] }
0x27af   :  { %7742 = vmatprep.subr.mxu0 %v6219_v50 }
0x27b0   :  { %7743 = vmatpush3.msra.mxu0 %v6219_v50  ;;  %v6502_v50 = vld [vmem:[%s8769_s8 + $0x8] sm:$0xff] }
0x27b1   :  { %7744 = vmatprep.subr.mxu0 %v6218_v61 }
0x27b2   :  { %7745 = vmatpush3.msra.mxu0 %v6218_v61  ;;  %v6501_v61 = vld [vmem:[%s8769_s8] sm:$0xff]  ;;  %s9730_s8 = sld [smem:[#allocation46_spill]] }
0x27b3   :  { %7746 = vmatprep.subr.mxu0 %v6217_v22 }
0x27b4   :  { %7747 = vmatpush3.msra.mxu0 %v6217_v22  ;;  %v6998_v22 = vld [vmem:[#allocation27] ss:$0 sm:$0xff] }
0x27b5   :  { %7762 = vmatprep.subr.mxu0 %v6508_v37 }
0x2869   :  { %v6183_v58 = vpop.f32.mrf.mxu1 }
0x286a   :  { %6207 = vrot.lane.b32.xlu1 %v6183_v58, %s8504_s16 }
0x286b   :  { %v7739_v41 = vpop.f32.mrf.mxu1 }
0x286d   :  { %v6107_v44 = vpop.f32.mrf.mxu0 }
0x286e   :  { %6205 = vrot.lane.b32.xlu0 %v6107_v44, %s8504_s16 }
0x286f   :  { %v7734_v13 = vpop.f32.mrf.mxu0 }
0x28dc   :  { %v6208_v59 = vpop.permute.xlu1 %6207 }
0x28dd   :  { %v6216_v20 = vsel %vm2247_vm5, %v6214_v21, %v6208_v59 }
0x28e0   :  { %v6206_v60 = vpop.permute.xlu0 %6205 }
0x28e1   :  { %v6215_v62 = vsel %vm2247_vm5, %v6213_v3, %v6206_v60 }
0x28e2   :  { %7748 = vmatprep.mubr.msk.f32.mxu0 %vm579_vm2, %v6215_v62 }
0x28e3   :  { %7749 = vmatmul.mubr.msk.f32.vlgmr.msra.gmra.mxu0 %vm579_vm2, %v6216_v20 }
0x28e4   :  { %7763 = vmatpush3.msra.mxu0 %v6508_v37 }
0x28e5   :  { %7764 = vmatprep.subr.mxu0 %v6507_v40 }
0x28e6   :  { %7765 = vmatpush3.msra.mxu0 %v6507_v40  ;;  %v7001_v40 = vld [vmem:[#allocation28] ss:$0 sm:$0xff] }
0x28e7   :  { %7766 = vmatprep.subr.mxu0 %v6506_v19 }
0x28e8   :  { %7767 = vmatpush3.msra.mxu0 %v6506_v19 }
0x28e9   :  { %7768 = vmatprep.subr.mxu0 %v6505_v45 }
0x28ea   :  { %7769 = vmatpush3.msra.mxu0 %v6505_v45 }
0x28eb   :  { %7770 = vmatprep.subr.mxu0 %v6504_v47 }
0x28ec   :  { %7771 = vmatpush3.msra.mxu0 %v6504_v47 }
0x28ed   :  { %7772 = vmatprep.subr.mxu0 %v6503_v2 }
0x28ee   :  { %7773 = vmatpush3.msra.mxu0 %v6503_v2 }
0x28ef   :  { %7774 = vmatprep.subr.mxu0 %v6502_v50 }
0x28f0   :  { %7775 = vmatpush3.msra.mxu0 %v6502_v50 }
0x28f1   :  { %7776 = vmatprep.subr.mxu0 %v6501_v61 }
0x28f2   :  { %7777 = vmatpush3.msra.mxu0 %v6501_v61 }
0x29a3   :  { %v7750_v0 = vpop.f32.mrf.mxu0 }
0x29a4   :  { %v6306_v11 = vadd.f32 %v7750_v0, %v6993_v63 }
0x29a5   :  { %v6300_v29 = vpop.f32.mrf.mxu0 }
0x29a6   :  { %v6310_v55 = vadd.f32 %v6306_v11, %v9370_v23  ;;  %v6301_v15 = vadd.f32 %v6993_v63, %v6300_v29 }
0x29a8   :  { %v6309_v57 = vadd.f32 %v6301_v15, %v9366_v30  ;;  %v6314_v18 = vsel %vm579_vm2, %v6310_v55, 0.0  ;;  %v6358_v30 = vld [vmem:[#allocation25 + $0x18] sm:$0xff] }
0x29a9   :  { %6315 = vadd.xlane.f32.xlu1 %v6314_v18  ;;  %7751 = vmatprep.subr.mxu1 %v6358_v30 }
0x29aa   :  { %v6311_v1 = vsel %vm579_vm2, %v6309_v57, 0.0  ;;  %7752 = vmatpush3.msra.mxu1 %v6358_v30 }
0x29ab   :  { %6312 = vadd.xlane.f32.xlu0 %v6311_v1  ;;  %7753 = vmatprep.subr.mxu1 %v6357_v26 }
0x29ac   :  { %7754 = vmatpush3.msra.mxu1 %v6357_v26 }
0x29ad   :  { %7755 = vmatprep.subr.mxu1 %v6356_v28 }
0x29ae   :  { %7756 = vmatpush3.msra.mxu1 %v6356_v28 }
0x29af   :  { %7757 = vmatprep.subr.mxu1 %v6355_v32 }
0x29b0   :  { %7758 = vmatpush3.msra.mxu1 %v6355_v32 }
0x2a32   :  { %v6316_v6 = vpop.xlane.xlu1 %6315 }
0x2a33   :  { %v6318_v9 = vmul.f32 0.03125, %v6316_v6 }
0x2a34   :  { %v6313_v51 = vpop.xlane.xlu0 %6312 }
0x2a35   :  { %v6317_v16 = vmul.f32 0.03125, %v6313_v51  ;;  %v6320_v49 = vsub.f32 %v6310_v55, %v6318_v9 }
0x2a37   :  { %v6319_v12 = vsub.f32 %v6309_v57, %v6317_v16  ;;  %v6322_v17 = vmul.f32 %v6320_v49, %v6320_v49 }
0x2a39   :  { %v6321_v24 = vmul.f32 %v6319_v12, %v6319_v12  ;;  %v6326_v23 = vsel %vm579_vm2, %v6322_v17, 0.0 }
0x2a3b   :  { %v6323_v25 = vsel %vm579_vm2, %v6321_v24, 0.0 }
0x2a3c   :  { %6324 = vadd.xlane.f32.xlu0 %v6323_v25 }
0x2a40   :  { %6327 = vadd.xlane.f32.xlu0 %v6326_v23 }
0x2ac5   :  { %v6325_v31 = vpop.xlane.xlu0 %6324 }
0x2ac6   :  { %v6329_v33 = vmul.f32 0.03125, %v6325_v31 }
0x2ac8   :  { %v6331_v34 = vadd.f32 1e-05, %v6329_v33 }
0x2ac9   :  { %v6328_v5 = vpop.xlane.xlu0 %6327 }
0x2aca   :  { %8026 = vrsqrt.f32 %v6331_v34  ;;  %v6330_v42 = vmul.f32 0.03125, %v6328_v5 }
0x2acc   :  { %v6332_v48 = vadd.f32 1e-05, %v6330_v42 }
0x2ace   :  { %8028 = vrsqrt.f32 %v6332_v48 }
0x2ad7   :  { %v8027_v27 = vpop.eup %8026 }
0x2ad8   :  { %v6335_v38 = vmul.f32 %v8027_v27, %v6319_v12 }
0x2ada   :  { %v6344_v8 = vmul.f32 %v6996_v35, %v6335_v38 }
0x2adb   :  { %v8029_v4 = vpop.eup %8028 }
0x2adc   :  { %v6336_v39 = vmul.f32 %v8029_v4, %v6320_v49  ;;  %v9564_v43 = vadd.f32 %v6997_v36, %v6344_v8 }
0x2ade   :  { %v6345_v14 = vmul.f32 %v6996_v35, %v6336_v39  ;;  %7759 = vmatprep.mubr.msk.f32.mxu1 %vm579_vm2, %v9564_v43 }
0x2ae0   :  { %v9568_v46 = vadd.f32 %v6997_v36, %v6345_v14 }
0x2ae2   :  { %7760 = vmatmul.mubr.msk.f32.vlgmr.msra.gmra.mxu1 %vm579_vm2, %v9568_v46 }
0x2ba2   :  { %v7761_v58 = vpop.f32.mrf.mxu1 }
0x2ba3   :  { %v6444_v41 = vadd.f32 %v7761_v58, %v6998_v22 }
0x2ba4   :  { %v6438_v44 = vpop.f32.mrf.mxu1 }
0x2ba5   :  { %v6450_v13 = vmul.f32 0.70710677, %v6444_v41  ;;  %v6439_v52 = vadd.f32 %v6998_v22, %v6438_v44  ;;  %v6448_v39 = vmul.f32 0.5, %v6444_v41  ;;  %v6658_v41 = vld [vmem:[%s9698_s17 + $0x78] sm:$0xff]  ;;  %v6657_v44 = vld [vmem:[%s9698_s17 + $0x70] sm:$0xff] }
0x2ba6   :  { %7781 = vmatprep.subr.msk.mxu1 %vm579_vm2, %v6658_v41 }
0x2ba7   :  { %v6452_v53 = vand.u32 2147483647, %v6450_v13  ;;  %v6449_v54 = vmul.f32 0.70710677, %v6439_v52  ;;  %vm6492_vm13 = vcmp.ge.f32.partialorder %v6450_v13, 0.0  ;;  %v6447_v8 = vmul.f32 0.5, %v6439_v52  ;;  %7782 = vmatpush3.xpose.msk.msra.mxu1 %vm579_vm2, %v6658_v41 }
0x2ba8   :  { %7783 = vmatprep.subr.msk.mxu1 %vm579_vm2, %v6657_v44  ;;  %v6654_v13 = vld [vmem:[%s9698_s17 + $0x58] sm:$0xff]  ;;  %v6653_v52 = vld [vmem:[%s9698_s17 + $0x50] sm:$0xff] }
0x2ba9   :  { %v6454_v56 = vmul.f32 0.3275911, %v6452_v53  ;;  %v6451_v10 = vand.u32 2147483647, %v6449_v54  ;;  %v6480_v60 = vsub.f32 0.0, %v6452_v53  ;;  %vm6491_vm14 = vcmp.ge.f32.partialorder %v6449_v54, 0.0 }
0x2baa   :  { %v6651_v54 = vld [vmem:[%s9698_s17 + $0x40] sm:$0xff] }
0x2bab   :  { %v6456_v59 = vadd.f32 1.0, %v6454_v56  ;;  %v6453_v7 = vmul.f32 0.3275911, %v6451_v10  ;;  %v6479_v21 = vsub.f32 0.0, %v6451_v10  ;;  %v6482_v62 = vmul.f32 %v6480_v60, %v6452_v53  ;;  %7784 = vmatpush3.xpose.msk.msra.mxu1 %vm579_vm2, %v6657_v44  ;;  %v6652_v53 = vld [vmem:[%s9698_s17 + $0x48] sm:$0xff]  ;;  %v6650_v56 = vld [vmem:[%s9698_s17 + $0x38] sm:$0xff] }
0x2bad   :  { %8030 = vrcp.f32 %v6456_v59  ;;  %v6455_v3 = vadd.f32 1.0, %v6453_v7  ;;  %v6481_v63 = vmul.f32 %v6479_v21, %v6451_v10  ;;  %v6485_v11 = vmul.f32 1.442695, %v6482_v62  ;;  %v6649_v10 = vld [vmem:[%s9698_s17 + $0x30] sm:$0xff] }
0x2baf   :  { %8032 = vrcp.f32 %v6455_v3  ;;  %v6483_v57 = vmul.f32 1.442695, %v6481_v63 }
0x2bb0   :  { %8034 = vpow2.f32 %v6485_v11 }
0x2bb1   :  { %8036 = vpow2.f32 %v6483_v57  ;;  %v6645_v57 = vld [vmem:[%s9698_s17 + $0x10] sm:$0xff] }
0x2bba   :  { %v8031_v20 = vpop.eup %8030 }
0x2bbb   :  { %v6462_v0 = vmul.f32 1.0614054, %v8031_v20 }
0x2bbc   :  { %v8033_v29 = vpop.eup %8032 }
0x2bbd   :  { %v6464_v55 = vadd.f32 -1.4531521, %v6462_v0  ;;  %v6461_v15 = vmul.f32 1.0614054, %v8033_v29  ;;  %v8035_v26 = vpop.eup %8034 }
0x2bbe   :  { %v8037_v33 = vpop.eup %8036 }
0x2bbf   :  { %v6466_v18 = vmul.f32 %v8031_v20, %v6464_v55  ;;  %v6463_v1 = vadd.f32 -1.4531521, %v6461_v15  ;;  %v6647_v55 = vld [vmem:[%s9698_s17 + $0x20] sm:$0xff]  ;;  %v6646_v15 = vld [vmem:[%s9698_s17 + $0x18] sm:$0xff] }
0x2bc1   :  { %v6468_v6 = vadd.f32 1.4214138, %v6466_v18  ;;  %v6465_v9 = vmul.f32 %v8033_v29, %v6463_v1  ;;  %v6644_v18 = vld [vmem:[%s9698_s17 + $0x8] sm:$0xff]  ;;  %v6643_v1 = vld [vmem:[%s9698_s17] sm:$0xff] }
0x2bc3   :  { %v6470_v51 = vmul.f32 %v8031_v20, %v6468_v6  ;;  %v6467_v16 = vadd.f32 1.4214138, %v6465_v9 }
0x2bc5   :  { %v6472_v49 = vadd.f32 -0.28449672, %v6470_v51  ;;  %v6469_v12 = vmul.f32 %v8033_v29, %v6467_v16 }
0x2bc7   :  { %v6474_v24 = vmul.f32 %v8031_v20, %v6472_v49  ;;  %v6471_v25 = vadd.f32 -0.28449672, %v6469_v12 }
0x2bc9   :  { %v6476_v17 = vadd.f32 0.2548296, %v6474_v24  ;;  %v6473_v23 = vmul.f32 %v8033_v29, %v6471_v25 }
0x2bcb   :  { %v6478_v30 = vmul.f32 %v8031_v20, %v6476_v17  ;;  %v6475_v28 = vadd.f32 0.2548296, %v6473_v23  ;;  %v7004_v17 = vld [vmem:[#allocation12] ss:$0 sm:$0xff] }
0x2bcd   :  { %v6488_v32 = vmul.f32 %v8035_v26, %v6478_v30  ;;  %v6477_v31 = vmul.f32 %v8033_v29, %v6475_v28  ;;  %v6648_v29 = vld [vmem:[%s9698_s17 + $0x28] sm:$0xff] }
0x2bcf   :  { %v6490_v34 = vsub.f32 1.0, %v6488_v32  ;;  %v6487_v5 = vmul.f32 %v8037_v33, %v6477_v31  ;;  %v7005_v32 = vld [vmem:[#allocation13] ss:$0 sm:$0xff] }
0x2bd1   :  { %v6494_v42 = vsub.f32 0.0, %v6490_v34  ;;  %v6489_v48 = vsub.f32 1.0, %v6487_v5 }
0x2bd3   :  { %v6496_v27 = vsel %vm6492_vm13, %v6490_v34, %v6494_v42  ;;  %v6493_v35 = vsub.f32 0.0, %v6489_v48  ;;  %v7006_v34 = vld [vmem:[%s9730_s8] ss:$0 sm:$0xff] }
0x2bd4   :  { %v6498_v38 = vadd.f32 1.0, %v6496_v27 }
0x2bd5   :  { %v6495_v36 = vsel %vm6491_vm14, %v6489_v48, %v6493_v35 }
0x2bd6   :  { %v6497_v4 = vadd.f32 1.0, %v6495_v36  ;;  %v6500_v37 = vmul.f32 %v6498_v38, %v6448_v39 }
0x2bd8   :  { %v6499_v14 = vmul.f32 %v6497_v4, %v6447_v8 }
0x2bda   :  { %7778 = vmatprep.mubr.msk.f32.mxu0 %vm2549_vm9, %v6499_v14 }
0x2bdb   :  { %7779 = vmatmul.mubr.msk.f32.vlgmr.msra.gmra.mxu0 %vm2549_vm9, %v6500_v37 }
0x2c9b   :  { %v7780_v19 = vpop.f32.mrf.mxu0 }
0x2c9c   :  { %v6594_v45 = vadd.f32 %v7780_v19, %v7001_v40 }
0x2c9d   :  { %v6588_v47 = vpop.f32.mrf.mxu0 }
0x2c9e   :  { %v6598_v2 = vadd.f32 %v6594_v45, %v9568_v46  ;;  %v6589_v50 = vadd.f32 %v7001_v40, %v6588_v47  ;;  %v6656_v46 = vld [vmem:[%s9698_s17 + $0x68] sm:$0xff] }
0x2c9f   :  { %7785 = vmatprep.subr.msk.mxu1 %vm579_vm2, %v6656_v46 }
0x2ca0   :  { %v6597_v61 = vadd.f32 %v6589_v50, %v9564_v43  ;;  %v6602_v22 = vsel %vm579_vm2, %v6598_v2, 0.0  ;;  %v6655_v43 = vld [vmem:[%s9698_s17 + $0x60] sm:$0xff]  ;;  %7786 = vmatpush3.xpose.msk.msra.mxu1 %vm579_vm2, %v6656_v46 }
0x2ca1   :  { %6603 = vadd.xlane.f32.xlu0 %v6602_v22  ;;  %7787 = vmatprep.subr.msk.mxu1 %vm579_vm2, %v6655_v43 }
0x2ca2   :  { %v6599_v58 = vsel %vm579_vm2, %v6597_v61, 0.0 }
0x2ca3   :  { %6600 = vadd.xlane.f32.xlu1 %v6599_v58 }
0x2ca4   :  { %7788 = vmatpush3.xpose.msk.msra.mxu1 %vm579_vm2, %v6655_v43 }
0x2ca5   :  { %7789 = vmatprep.subr.msk.mxu1 %vm579_vm2, %v6654_v13 }
0x2ca8   :  { %7790 = vmatpush3.xpose.msk.msra.mxu1 %vm579_vm2, %v6654_v13 }
0x2ca9   :  { %7791 = vmatprep.subr.msk.mxu1 %vm579_vm2, %v6653_v52 }
0x2cac   :  { %7792 = vmatpush3.xpose.msk.msra.mxu1 %vm579_vm2, %v6653_v52 }
0x2cad   :  { %7793 = vmatprep.subr.msk.mxu1 %vm579_vm2, %v6652_v53 }
0x2cb0   :  { %7794 = vmatpush3.xpose.msk.msra.mxu1 %vm579_vm2, %v6652_v53 }
0x2cb1   :  { %7795 = vmatprep.subr.msk.mxu1 %vm579_vm2, %v6651_v54 }
0x2cb4   :  { %7796 = vmatpush3.xpose.msk.msra.mxu1 %vm579_vm2, %v6651_v54 }
0x2cb5   :  { %7797 = vmatprep.subr.msk.mxu1 %vm579_vm2, %v6650_v56 }
0x2cb8   :  { %7798 = vmatpush3.xpose.msk.msra.mxu1 %vm579_vm2, %v6650_v56 }
0x2cb9   :  { %7799 = vmatprep.subr.msk.mxu1 %vm579_vm2, %v6649_v10 }
0x2cbc   :  { %7800 = vmatpush3.xpose.msk.msra.mxu1 %vm579_vm2, %v6649_v10 }
0x2cbd   :  { %7801 = vmatprep.subr.msk.mxu1 %vm579_vm2, %v6648_v29 }
0x2cc0   :  { %7802 = vmatpush3.xpose.msk.msra.mxu1 %vm579_vm2, %v6648_v29 }
0x2cc1   :  { %7803 = vmatprep.subr.msk.mxu1 %vm579_vm2, %v6647_v55 }
0x2cc4   :  { %7804 = vmatpush3.xpose.msk.msra.mxu1 %vm579_vm2, %v6647_v55 }
0x2cc5   :  { %7805 = vmatprep.subr.msk.mxu1 %vm579_vm2, %v6646_v15 }
0x2cc8   :  { %7806 = vmatpush3.xpose.msk.msra.mxu1 %vm579_vm2, %v6646_v15 }
0x2cc9   :  { %7807 = vmatprep.subr.msk.mxu1 %vm579_vm2, %v6645_v57 }
0x2ccc   :  { %7808 = vmatpush3.xpose.msk.msra.mxu1 %vm579_vm2, %v6645_v57 }
0x2ccd   :  { %7809 = vmatprep.subr.msk.mxu1 %vm579_vm2, %v6644_v18 }
0x2cd0   :  { %7810 = vmatpush3.xpose.msk.msra.mxu1 %vm579_vm2, %v6644_v18 }
0x2cd1   :  { %7811 = vmatprep.subr.msk.mxu1 %vm579_vm2, %v6643_v1 }
0x2cd4   :  { %7812 = vmatpush3.xpose.msk.msra.mxu1 %vm579_vm2, %v6643_v1 }
0x2d2a   :  { %v6604_v59 = vpop.xlane.xlu0 %6603 }
0x2d2b   :  { %v6606_v7 = vmul.f32 0.03125, %v6604_v59 }
0x2d2c   :  { %v6601_v3 = vpop.xlane.xlu1 %6600 }
0x2d2d   :  { %v6608_v60 = vsub.f32 %v6598_v2, %v6606_v7  ;;  %v6605_v21 = vmul.f32 0.03125, %v6601_v3 }
0x2d2f   :  { %v6607_v62 = vsub.f32 %v6597_v61, %v6605_v21  ;;  %v6610_v20 = vmul.f32 %v6608_v60, %v6608_v60 }
0x2d31   :  { %v6614_v63 = vsel %vm579_vm2, %v6610_v20, 0.0  ;;  %v6609_v0 = vmul.f32 %v6607_v62, %v6607_v62 }
0x2d32   :  { %6615 = vadd.xlane.f32.xlu0 %v6614_v63 }
0x2d33   :  { %v6611_v11 = vsel %vm579_vm2, %v6609_v0, 0.0 }
0x2d34   :  { %6612 = vadd.xlane.f32.xlu1 %v6611_v11 }
0x2dbb   :  { %v6616_v6 = vpop.xlane.xlu0 %6615 }
0x2dbc   :  { %v6618_v9 = vmul.f32 0.03125, %v6616_v6 }
0x2dbd   :  { %v6613_v51 = vpop.xlane.xlu1 %6612 }
0x2dbe   :  { %v6620_v16 = vadd.f32 1e-05, %v6618_v9  ;;  %v6617_v49 = vmul.f32 0.03125, %v6613_v51 }
0x2dc0   :  { %8038 = vrsqrt.f32 %v6620_v16  ;;  %v6619_v12 = vadd.f32 1e-05, %v6617_v49 }
0x2dc2   :  { %8040 = vrsqrt.f32 %v6619_v12 }
0x2dcd   :  { %v8039_v24 = vpop.eup %8038 }
0x2dce   :  { %v6624_v25 = vmul.f32 %v8039_v24, %v6608_v60 }
0x2dcf   :  { %v8041_v23 = vpop.eup %8040 }
0x2dd0   :  { %v6623_v30 = vmul.f32 %v8041_v23, %v6607_v62  ;;  %v6633_v26 = vmul.f32 %v7004_v17, %v6624_v25 }
0x2dd2   :  { %v6632_v28 = vmul.f32 %v7004_v17, %v6623_v30  ;;  %v6642_v33 = vadd.f32 %v7005_v32, %v6633_v26 }
0x2dd4   :  { %v6641_v31 = vadd.f32 %v7005_v32, %v6632_v28 }
0x2dd6   :  { %7813 = vmatprep.mubr.msk.f32.mxu1 %vm579_vm2, %v6641_v31 }
0x2dd7   :  { %7814 = vmatmul.mubr.msk.f32.vlgmr.msra.gmra.mxu1 %vm579_vm2, %v6642_v33 }
0x2e97   :  { %v7815_v5 = vpop.f32.mrf.mxu1 }
0x2e98   :  { %v6792_v42 = vadd.f32 %v7815_v5, %v7006_v34 }
0x2e99   :  { %v6786_v48 = vpop.f32.mrf.mxu1 }
0x2e9a   :  { %6796 = vst [vmem:[%s8779_s25 + $0x8] sm:$0xff] %v6792_v42  ;;  %v6787_v27 = vadd.f32 %v7006_v34, %v6786_v48 }
0x2e9c   :  { %6795 = vst [vmem:[%s8779_s25] sm:$0xff] %v6787_v27 }
0x2e9d   :  { %6801 = vsyncpa [#allocation3], 1 }
0x2e9e   :  { %6802 = vsyncpa [#allocation5], 1 }
0x2e9f   :  { %6803 = vsyncpa [#allocation8], 1 }
0x2ea0   :  { %6804 = vsyncpa [#allocation11], 1 }
0x2ea1   :  { %6805 = vsyncpa [#allocation14], 1 }
0x2ea2   :  { %6806 = vsyncpa [#allocation17], 1 }
0x2ea3   :  { %6807 = vsyncpa [#allocation20], 1 }
0x2ea4   :  { %6808 = vsyncpa [#allocation23], 1 }
0x2ea5   :  { %6809 = vsyncpa [#allocation26], 1 }
0x2ea6   :  { %6810 = vsyncpa [#allocation29], 1 }

</bundles_post_ra>
